<compile_context>
chip_gen: v7x
topology: tpu7x:2x2x1
jax: 0.10.0
libtpu: 0.0.40
codegen_flags: <defaults>
</compile_context>

<pallas_src>
from functools import partial

import numpy as np
import jax
import jax.numpy as jnp
from jax.experimental import pallas as pl
from jax.experimental.pallas import tpu as pltpu


# ------------------------------ Pallas kernel ------------------------------ #
def _resblock_kernel(xp_ref, w1_ref, b1_ref, w2_ref, b2_ref, out_ref, y1p_ref):
    # xp_ref : (H+2, W+2, Cin)  zero-padded NHWC input, one batch element
    # w1_ref : (9, Cin, Cout)   conv1 weights, tap-major (dy*3+dx)
    # b1_ref : (1, Cout)
    # w2_ref : (9, Cout, Cout)  conv2 weights
    # b2_ref : (1, Cout)
    # out_ref: (H, W, Cout)
    # y1p_ref: (H+2, W+2, Cout) VMEM scratch holding the zero-padded conv1 out
    Hp, Wp, cin = xp_ref.shape
    H, W = Hp - 2, Wp - 2
    cout = out_ref.shape[-1]

    xp = xp_ref[...].astype(jnp.float32)        # (H+2, W+2, Cin)
    b1 = b1_ref[...].astype(jnp.float32)        # (1, Cout)
    b2 = b2_ref[...].astype(jnp.float32)        # (1, Cout)

    # ---- conv1 (3x3, pad=1) + bias + ReLU : 9 shifted MXU matmuls ---------
    acc1 = jnp.zeros((H * W, cout), jnp.float32)
    for k in range(9):                          # 9 taps, fully unrolled
        dy, dx = k // 3, k % 3
        tap = xp[dy:dy + H, dx:dx + W, :].reshape(H * W, cin)
        acc1 = acc1 + jnp.dot(tap, w1_ref[k].astype(jnp.float32),
                              preferred_element_type=jnp.float32)
    y1 = jnp.maximum(acc1 + b1, 0.0)            # (H*W, Cout)

    # ---- zero-pad the intermediate in VMEM scratch (conv2 padding=1) ------
    y1p_ref[...] = jnp.zeros_like(y1p_ref)
    y1p_ref[1:H + 1, 1:W + 1, :] = y1.reshape(H, W, cout)
    y1p = y1p_ref[...]                          # (H+2, W+2, Cout)

    # ---- conv2 (3x3, pad=1) + bias, no activation --------------------------
    acc2 = jnp.zeros((H * W, cout), jnp.float32)
    for k in range(9):
        dy, dx = k // 3, k % 3
        tap = y1p[dy:dy + H, dx:dx + W, :].reshape(H * W, cout)
        acc2 = acc2 + jnp.dot(tap, w2_ref[k].astype(jnp.float32),
                              preferred_element_type=jnp.float32)
    y2 = acc2 + b2

    # ---- residual add: interior of the padded input == original x ---------
    res = xp[1:H + 1, 1:W + 1, :].reshape(H * W, cin)
    out = res + y2
    out_ref[...] = out.reshape(H, W, cout).astype(out_ref.dtype)


# ------------------------------ host wrapper ------------------------------- #
@partial(jax.jit, static_argnames=("stride",))
def res_block_forward(x, w1, b1, w2, b2, *, stride=1):
    """ResBlock forward. x: (N, Cin, H, W) NCHW; weights in PyTorch layout."""
    if stride != 1:
        # TODO(synk): stride != 1 (conv3 1x1 downsample shortcut) not implemented.
        raise NotImplementedError("Pallas ResBlock only supports stride == 1")

    N, cin, H, W = x.shape
    cout = w1.shape[0]
    assert w1.shape == (cout, cin, 3, 3)
    assert w2.shape == (cout, cout, 3, 3)
    assert cin == cout, "stride=1 residual add requires inc == filter_num"

    # Host-side layout plumbing: NCHW -> NHWC, spatial zero-pad, tap-major
    # weight layout (dy*3+dx, Cin, Cout).  All free / outside the kernel.
    x_nhwc = jnp.transpose(x, (0, 2, 3, 1))
    xp = jnp.pad(x_nhwc, ((0, 0), (1, 1), (1, 1), (0, 0)))
    w1r = jnp.transpose(w1, (2, 3, 1, 0)).reshape(9, cin, cout)
    w2r = jnp.transpose(w2, (2, 3, 1, 0)).reshape(9, cout, cout)
    b1r = b1.reshape(1, cout)
    b2r = b2.reshape(1, cout)

    out_nhwc = pl.pallas_call(
        _resblock_kernel,
        out_shape=jax.ShapeDtypeStruct((N, H, W, cout), x.dtype),
        grid_spec=pltpu.PrefetchScalarGridSpec(
            num_scalar_prefetch=0,
            grid=(N,),
            in_specs=[
                pl.BlockSpec((None, H + 2, W + 2, cin), lambda n: (n, 0, 0, 0)),
                pl.BlockSpec((9, cin, cout), lambda n: (0, 0, 0)),
                pl.BlockSpec((1, cout), lambda n: (0, 0)),
                pl.BlockSpec((9, cout, cout), lambda n: (0, 0, 0)),
                pl.BlockSpec((1, cout), lambda n: (0, 0)),
            ],
            out_specs=pl.BlockSpec((None, H, W, cout), lambda n: (n, 0, 0, 0)),
            scratch_shapes=[pltpu.VMEM((H + 2, W + 2, cout), jnp.float32)],
        ),
        compiler_params=pltpu.CompilerParams(
            dimension_semantics=("parallel",)),
    )(xp, w1r, b1r, w2r, b2r)

    return jnp.transpose(out_nhwc, (0, 3, 1, 2))    # back to NCHW


# ---------------------- independent NumPy reference ------------------------ #
def _conv3x3_np(x, w, b):
    N, C, H, W = x.shape
    F = w.shape[0]
    xp = np.zeros((N, C, H + 2, W + 2), x.dtype)
    xp[:, :, 1:H + 1, 1:W + 1] = x
    out = np.zeros((N, F, H, W), x.dtype)
    for dy in range(3):
        for dx in range(3):
            out += np.einsum('nchw,fc->nfhw',
                             xp[:, :, dy:dy + H, dx:dx + W], w[:, :, dy, dx])
    return out + b[None, :, None, None]


def reference_resblock(x, w1, b1, w2, b2):
    y = np.maximum(_conv3x3_np(x, w1, b1), 0.0)   # conv1 + ReLU
    y = _conv3x3_np(y, w2, b2)                    # conv2 (no activation)
    return x + y                                  # residual


# ----------------------------------- main ---------------------------------- #
if __name__ == "__main__":
    key = jax.random.PRNGKey(0)
    kx, k1, k2, k3, k4 = jax.random.split(key, 5)

    # ResBlock(inc=4, filter_num=4), stride=1 — default configuration.
    N, C, H, W = 2, 4, 16, 16
    F = C
    bound1 = 1.0 / np.sqrt(C * 9)   # PyTorch Conv2d default init bound
    bound2 = 1.0 / np.sqrt(F * 9)

    x = jax.random.normal(kx, (N, C, H, W), jnp.float32)
    w1 = jax.random.uniform(k1, (F, C, 3, 3), jnp.float32, -bound1, bound1)
    b1 = jax.random.uniform(k2, (F,), jnp.float32, -bound1, bound1)
    w2 = jax.random.uniform(k3, (F, F, 3, 3), jnp.float32, -bound2, bound2)
    b2 = jax.random.uniform(k4, (F,), jnp.float32, -bound2, bound2)

    out = res_block_forward(x, w1, b1, w2, b2)
    out = jax.block_until_ready(out)

    ref = reference_resblock(np.asarray(x, np.float64),
                             np.asarray(w1, np.float64),
                             np.asarray(b1, np.float64),
                             np.asarray(w2, np.float64),
                             np.asarray(b2, np.float64))
    np.testing.assert_allclose(np.asarray(out), ref.astype(np.float32),
                               atol=5e-3, rtol=5e-3)
    print("KERNEL_OK")
</pallas_src>

<mosaic_0001>
module attributes {stable_mosaic.version = 11 : i64} {
  func.func @_resblock_kernel(%arg0: i32, %arg1: memref<1x18x18x4xf32, #tpu.memory_space<vmem>>, %arg2: memref<9x4x4xf32, #tpu.memory_space<vmem>>, %arg3: memref<1x4xf32, #tpu.memory_space<vmem>>, %arg4: memref<9x4x4xf32, #tpu.memory_space<vmem>>, %arg5: memref<1x4xf32, #tpu.memory_space<vmem>>, %arg6: memref<1x16x16x4xf32, #tpu.memory_space<vmem>>, %arg7: memref<18x18x4xf32, #tpu.memory_space<vmem>>) attributes {dimension_semantics = [#tpu.dimension_semantics<parallel>], iteration_bounds = array<i64: 2>, scalar_prefetch = 0 : i64, scratch_operands = 1 : i64, tpu.core_type = #tpu.core_type<tc>, window_params = [{transform_indices = @transform_0, window_bounds = array<i64: 1, 18, 18, 4>}, {pipeline_mode = #tpu.pipeline_mode<synchronous>, transform_indices = @transform_1, window_bounds = array<i64: 9, 4, 4>}, {pipeline_mode = #tpu.pipeline_mode<synchronous>, transform_indices = @transform_2, window_bounds = array<i64: 1, 4>}, {pipeline_mode = #tpu.pipeline_mode<synchronous>, transform_indices = @transform_3, window_bounds = array<i64: 9, 4, 4>}, {pipeline_mode = #tpu.pipeline_mode<synchronous>, transform_indices = @transform_4, window_bounds = array<i64: 1, 4>}, {transform_indices = @transform_5, window_bounds = array<i64: 1, 16, 16, 4>}]} {
    %c0 = arith.constant 0 : index
    %c0_0 = arith.constant 0 : index
    %c0_1 = arith.constant 0 : index
    %c0_2 = arith.constant 0 : index
    %0 = vector.load %arg1[%c0, %c0_0, %c0_1, %c0_2] : memref<1x18x18x4xf32, #tpu.memory_space<vmem>>, vector<1x18x18x4xf32>
    %1 = vector.shape_cast %0 : vector<1x18x18x4xf32> to vector<18x18x4xf32>
    %c0_3 = arith.constant 0 : index
    %c0_4 = arith.constant 0 : index
    %2 = vector.load %arg3[%c0_3, %c0_4] : memref<1x4xf32, #tpu.memory_space<vmem>>, vector<1x4xf32>
    %c0_5 = arith.constant 0 : index
    %c0_6 = arith.constant 0 : index
    %3 = vector.load %arg5[%c0_5, %c0_6] : memref<1x4xf32, #tpu.memory_space<vmem>>, vector<1x4xf32>
    %cst = arith.constant 0.000000e+00 : f32
    %4 = vector.broadcast %cst : f32 to vector<256x4xf32>
    %5 = vector.extract_strided_slice %1 {offsets = [0, 0, 0], sizes = [16, 16, 4], strides = [1, 1, 1]} : vector<18x18x4xf32> to vector<16x16x4xf32>
    %6 = vector.shape_cast %5 : vector<16x16x4xf32> to vector<256x4xf32>
    %c0_7 = arith.constant 0 : index
    %c0_8 = arith.constant 0 : index
    %c0_9 = arith.constant 0 : index
    %7 = vector.load %arg2[%c0_7, %c0_8, %c0_9] : memref<9x4x4xf32, #tpu.memory_space<vmem>>, vector<1x4x4xf32>
    %8 = vector.shape_cast %7 : vector<1x4x4xf32> to vector<4x4xf32>
    %cst_10 = arith.constant dense<0.000000e+00> : vector<256x4xf32>
    %9 = tpu.matmul %6, %8, %cst_10 {dimension_numbers = #tpu.dot_dimension_numbers<[1], [0], [0], [1], [0, 0, 1, 1], [], []>} : vector<256x4xf32>, vector<4x4xf32>, vector<256x4xf32> -> vector<256x4xf32>
    %10 = arith.addf %4, %9 : vector<256x4xf32>
    %11 = vector.extract_strided_slice %1 {offsets = [0, 1, 0], sizes = [16, 16, 4], strides = [1, 1, 1]} : vector<18x18x4xf32> to vector<16x16x4xf32>
    %12 = vector.shape_cast %11 : vector<16x16x4xf32> to vector<256x4xf32>
    %c1 = arith.constant 1 : index
    %c0_11 = arith.constant 0 : index
    %c0_12 = arith.constant 0 : index
    %13 = vector.load %arg2[%c1, %c0_11, %c0_12] : memref<9x4x4xf32, #tpu.memory_space<vmem>>, vector<1x4x4xf32>
    %14 = vector.shape_cast %13 : vector<1x4x4xf32> to vector<4x4xf32>
    %cst_13 = arith.constant dense<0.000000e+00> : vector<256x4xf32>
    %15 = tpu.matmul %12, %14, %cst_13 {dimension_numbers = #tpu.dot_dimension_numbers<[1], [0], [0], [1], [0, 0, 1, 1], [], []>} : vector<256x4xf32>, vector<4x4xf32>, vector<256x4xf32> -> vector<256x4xf32>
    %16 = arith.addf %10, %15 : vector<256x4xf32>
    %17 = vector.extract_strided_slice %1 {offsets = [0, 2, 0], sizes = [16, 16, 4], strides = [1, 1, 1]} : vector<18x18x4xf32> to vector<16x16x4xf32>
    %18 = vector.shape_cast %17 : vector<16x16x4xf32> to vector<256x4xf32>
    %c2 = arith.constant 2 : index
    %c0_14 = arith.constant 0 : index
    %c0_15 = arith.constant 0 : index
    %19 = vector.load %arg2[%c2, %c0_14, %c0_15] : memref<9x4x4xf32, #tpu.memory_space<vmem>>, vector<1x4x4xf32>
    %20 = vector.shape_cast %19 : vector<1x4x4xf32> to vector<4x4xf32>
    %cst_16 = arith.constant dense<0.000000e+00> : vector<256x4xf32>
    %21 = tpu.matmul %18, %20, %cst_16 {dimension_numbers = #tpu.dot_dimension_numbers<[1], [0], [0], [1], [0, 0, 1, 1], [], []>} : vector<256x4xf32>, vector<4x4xf32>, vector<256x4xf32> -> vector<256x4xf32>
    %22 = arith.addf %16, %21 : vector<256x4xf32>
    %23 = vector.extract_strided_slice %1 {offsets = [1, 0, 0], sizes = [16, 16, 4], strides = [1, 1, 1]} : vector<18x18x4xf32> to vector<16x16x4xf32>
    %24 = vector.shape_cast %23 : vector<16x16x4xf32> to vector<256x4xf32>
    %c3 = arith.constant 3 : index
    %c0_17 = arith.constant 0 : index
    %c0_18 = arith.constant 0 : index
    %25 = vector.load %arg2[%c3, %c0_17, %c0_18] : memref<9x4x4xf32, #tpu.memory_space<vmem>>, vector<1x4x4xf32>
    %26 = vector.shape_cast %25 : vector<1x4x4xf32> to vector<4x4xf32>
    %cst_19 = arith.constant dense<0.000000e+00> : vector<256x4xf32>
    %27 = tpu.matmul %24, %26, %cst_19 {dimension_numbers = #tpu.dot_dimension_numbers<[1], [0], [0], [1], [0, 0, 1, 1], [], []>} : vector<256x4xf32>, vector<4x4xf32>, vector<256x4xf32> -> vector<256x4xf32>
    %28 = arith.addf %22, %27 : vector<256x4xf32>
    %29 = vector.extract_strided_slice %1 {offsets = [1, 1, 0], sizes = [16, 16, 4], strides = [1, 1, 1]} : vector<18x18x4xf32> to vector<16x16x4xf32>
    %30 = vector.shape_cast %29 : vector<16x16x4xf32> to vector<256x4xf32>
    %c4 = arith.constant 4 : index
    %c0_20 = arith.constant 0 : index
    %c0_21 = arith.constant 0 : index
    %31 = vector.load %arg2[%c4, %c0_20, %c0_21] : memref<9x4x4xf32, #tpu.memory_space<vmem>>, vector<1x4x4xf32>
    %32 = vector.shape_cast %31 : vector<1x4x4xf32> to vector<4x4xf32>
    %cst_22 = arith.constant dense<0.000000e+00> : vector<256x4xf32>
    %33 = tpu.matmul %30, %32, %cst_22 {dimension_numbers = #tpu.dot_dimension_numbers<[1], [0], [0], [1], [0, 0, 1, 1], [], []>} : vector<256x4xf32>, vector<4x4xf32>, vector<256x4xf32> -> vector<256x4xf32>
    %34 = arith.addf %28, %33 : vector<256x4xf32>
    %35 = vector.extract_strided_slice %1 {offsets = [1, 2, 0], sizes = [16, 16, 4], strides = [1, 1, 1]} : vector<18x18x4xf32> to vector<16x16x4xf32>
    %36 = vector.shape_cast %35 : vector<16x16x4xf32> to vector<256x4xf32>
    %c5 = arith.constant 5 : index
    %c0_23 = arith.constant 0 : index
    %c0_24 = arith.constant 0 : index
    %37 = vector.load %arg2[%c5, %c0_23, %c0_24] : memref<9x4x4xf32, #tpu.memory_space<vmem>>, vector<1x4x4xf32>
    %38 = vector.shape_cast %37 : vector<1x4x4xf32> to vector<4x4xf32>
    %cst_25 = arith.constant dense<0.000000e+00> : vector<256x4xf32>
    %39 = tpu.matmul %36, %38, %cst_25 {dimension_numbers = #tpu.dot_dimension_numbers<[1], [0], [0], [1], [0, 0, 1, 1], [], []>} : vector<256x4xf32>, vector<4x4xf32>, vector<256x4xf32> -> vector<256x4xf32>
    %40 = arith.addf %34, %39 : vector<256x4xf32>
    %41 = vector.extract_strided_slice %1 {offsets = [2, 0, 0], sizes = [16, 16, 4], strides = [1, 1, 1]} : vector<18x18x4xf32> to vector<16x16x4xf32>
    %42 = vector.shape_cast %41 : vector<16x16x4xf32> to vector<256x4xf32>
    %c6 = arith.constant 6 : index
    %c0_26 = arith.constant 0 : index
    %c0_27 = arith.constant 0 : index
    %43 = vector.load %arg2[%c6, %c0_26, %c0_27] : memref<9x4x4xf32, #tpu.memory_space<vmem>>, vector<1x4x4xf32>
    %44 = vector.shape_cast %43 : vector<1x4x4xf32> to vector<4x4xf32>
    %cst_28 = arith.constant dense<0.000000e+00> : vector<256x4xf32>
    %45 = tpu.matmul %42, %44, %cst_28 {dimension_numbers = #tpu.dot_dimension_numbers<[1], [0], [0], [1], [0, 0, 1, 1], [], []>} : vector<256x4xf32>, vector<4x4xf32>, vector<256x4xf32> -> vector<256x4xf32>
    %46 = arith.addf %40, %45 : vector<256x4xf32>
    %47 = vector.extract_strided_slice %1 {offsets = [2, 1, 0], sizes = [16, 16, 4], strides = [1, 1, 1]} : vector<18x18x4xf32> to vector<16x16x4xf32>
    %48 = vector.shape_cast %47 : vector<16x16x4xf32> to vector<256x4xf32>
    %c7 = arith.constant 7 : index
    %c0_29 = arith.constant 0 : index
    %c0_30 = arith.constant 0 : index
    %49 = vector.load %arg2[%c7, %c0_29, %c0_30] : memref<9x4x4xf32, #tpu.memory_space<vmem>>, vector<1x4x4xf32>
    %50 = vector.shape_cast %49 : vector<1x4x4xf32> to vector<4x4xf32>
    %cst_31 = arith.constant dense<0.000000e+00> : vector<256x4xf32>
    %51 = tpu.matmul %48, %50, %cst_31 {dimension_numbers = #tpu.dot_dimension_numbers<[1], [0], [0], [1], [0, 0, 1, 1], [], []>} : vector<256x4xf32>, vector<4x4xf32>, vector<256x4xf32> -> vector<256x4xf32>
    %52 = arith.addf %46, %51 : vector<256x4xf32>
    %53 = vector.extract_strided_slice %1 {offsets = [2, 2, 0], sizes = [16, 16, 4], strides = [1, 1, 1]} : vector<18x18x4xf32> to vector<16x16x4xf32>
    %54 = vector.shape_cast %53 : vector<16x16x4xf32> to vector<256x4xf32>
    %c8 = arith.constant 8 : index
    %c0_32 = arith.constant 0 : index
    %c0_33 = arith.constant 0 : index
    %55 = vector.load %arg2[%c8, %c0_32, %c0_33] : memref<9x4x4xf32, #tpu.memory_space<vmem>>, vector<1x4x4xf32>
    %56 = vector.shape_cast %55 : vector<1x4x4xf32> to vector<4x4xf32>
    %cst_34 = arith.constant dense<0.000000e+00> : vector<256x4xf32>
    %57 = tpu.matmul %54, %56, %cst_34 {dimension_numbers = #tpu.dot_dimension_numbers<[1], [0], [0], [1], [0, 0, 1, 1], [], []>} : vector<256x4xf32>, vector<4x4xf32>, vector<256x4xf32> -> vector<256x4xf32>
    %58 = arith.addf %52, %57 : vector<256x4xf32>
    %59 = vector.broadcast %2 : vector<1x4xf32> to vector<256x4xf32>
    %60 = arith.addf %58, %59 : vector<256x4xf32>
    %cst_35 = arith.constant 0.000000e+00 : f32
    %61 = vector.broadcast %cst_35 : f32 to vector<256x4xf32>
    %62 = arith.maximumf %60, %61 : vector<256x4xf32>
    %cst_36 = arith.constant 0.000000e+00 : f32
    %63 = vector.broadcast %cst_36 : f32 to vector<18x18x4xf32>
    %c0_37 = arith.constant 0 : index
    %c0_38 = arith.constant 0 : index
    %c0_39 = arith.constant 0 : index
    %64 = vector.load %arg7[%c0_37, %c0_38, %c0_39] : memref<18x18x4xf32, #tpu.memory_space<vmem>>, vector<18x18x4xf32>
    tpu.vector_store %arg7[%c0_37, %c0_38, %c0_39], %63 {strides = array<i32>} : memref<18x18x4xf32, #tpu.memory_space<vmem>>, vector<18x18x4xf32>,
    %65 = vector.shape_cast %62 : vector<256x4xf32> to vector<16x16x4xf32>
    %c1_40 = arith.constant 1 : index
    %c1_41 = arith.constant 1 : index
    %c0_42 = arith.constant 0 : index
    %66 = vector.load %arg7[%c1_40, %c1_41, %c0_42] : memref<18x18x4xf32, #tpu.memory_space<vmem>>, vector<16x16x4xf32>
    tpu.vector_store %arg7[%c1_40, %c1_41, %c0_42], %65 {strides = array<i32>} : memref<18x18x4xf32, #tpu.memory_space<vmem>>, vector<16x16x4xf32>,
    %c0_43 = arith.constant 0 : index
    %c0_44 = arith.constant 0 : index
    %c0_45 = arith.constant 0 : index
    %67 = vector.load %arg7[%c0_43, %c0_44, %c0_45] : memref<18x18x4xf32, #tpu.memory_space<vmem>>, vector<18x18x4xf32>
    %cst_46 = arith.constant 0.000000e+00 : f32
    %68 = vector.broadcast %cst_46 : f32 to vector<256x4xf32>
    %69 = vector.extract_strided_slice %67 {offsets = [0, 0, 0], sizes = [16, 16, 4], strides = [1, 1, 1]} : vector<18x18x4xf32> to vector<16x16x4xf32>
    %70 = vector.shape_cast %69 : vector<16x16x4xf32> to vector<256x4xf32>
    %c0_47 = arith.constant 0 : index
    %c0_48 = arith.constant 0 : index
    %c0_49 = arith.constant 0 : index
    %71 = vector.load %arg4[%c0_47, %c0_48, %c0_49] : memref<9x4x4xf32, #tpu.memory_space<vmem>>, vector<1x4x4xf32>
    %72 = vector.shape_cast %71 : vector<1x4x4xf32> to vector<4x4xf32>
    %cst_50 = arith.constant dense<0.000000e+00> : vector<256x4xf32>
    %73 = tpu.matmul %70, %72, %cst_50 {dimension_numbers = #tpu.dot_dimension_numbers<[1], [0], [0], [1], [0, 0, 1, 1], [], []>} : vector<256x4xf32>, vector<4x4xf32>, vector<256x4xf32> -> vector<256x4xf32>
    %74 = arith.addf %68, %73 : vector<256x4xf32>
    %75 = vector.extract_strided_slice %67 {offsets = [0, 1, 0], sizes = [16, 16, 4], strides = [1, 1, 1]} : vector<18x18x4xf32> to vector<16x16x4xf32>
    %76 = vector.shape_cast %75 : vector<16x16x4xf32> to vector<256x4xf32>
    %c1_51 = arith.constant 1 : index
    %c0_52 = arith.constant 0 : index
    %c0_53 = arith.constant 0 : index
    %77 = vector.load %arg4[%c1_51, %c0_52, %c0_53] : memref<9x4x4xf32, #tpu.memory_space<vmem>>, vector<1x4x4xf32>
    %78 = vector.shape_cast %77 : vector<1x4x4xf32> to vector<4x4xf32>
    %cst_54 = arith.constant dense<0.000000e+00> : vector<256x4xf32>
    %79 = tpu.matmul %76, %78, %cst_54 {dimension_numbers = #tpu.dot_dimension_numbers<[1], [0], [0], [1], [0, 0, 1, 1], [], []>} : vector<256x4xf32>, vector<4x4xf32>, vector<256x4xf32> -> vector<256x4xf32>
    %80 = arith.addf %74, %79 : vector<256x4xf32>
    %81 = vector.extract_strided_slice %67 {offsets = [0, 2, 0], sizes = [16, 16, 4], strides = [1, 1, 1]} : vector<18x18x4xf32> to vector<16x16x4xf32>
    %82 = vector.shape_cast %81 : vector<16x16x4xf32> to vector<256x4xf32>
    %c2_55 = arith.constant 2 : index
    %c0_56 = arith.constant 0 : index
    %c0_57 = arith.constant 0 : index
    %83 = vector.load %arg4[%c2_55, %c0_56, %c0_57] : memref<9x4x4xf32, #tpu.memory_space<vmem>>, vector<1x4x4xf32>
    %84 = vector.shape_cast %83 : vector<1x4x4xf32> to vector<4x4xf32>
    %cst_58 = arith.constant dense<0.000000e+00> : vector<256x4xf32>
    %85 = tpu.matmul %82, %84, %cst_58 {dimension_numbers = #tpu.dot_dimension_numbers<[1], [0], [0], [1], [0, 0, 1, 1], [], []>} : vector<256x4xf32>, vector<4x4xf32>, vector<256x4xf32> -> vector<256x4xf32>
    %86 = arith.addf %80, %85 : vector<256x4xf32>
    %87 = vector.extract_strided_slice %67 {offsets = [1, 0, 0], sizes = [16, 16, 4], strides = [1, 1, 1]} : vector<18x18x4xf32> to vector<16x16x4xf32>
    %88 = vector.shape_cast %87 : vector<16x16x4xf32> to vector<256x4xf32>
    %c3_59 = arith.constant 3 : index
    %c0_60 = arith.constant 0 : index
    %c0_61 = arith.constant 0 : index
    %89 = vector.load %arg4[%c3_59, %c0_60, %c0_61] : memref<9x4x4xf32, #tpu.memory_space<vmem>>, vector<1x4x4xf32>
    %90 = vector.shape_cast %89 : vector<1x4x4xf32> to vector<4x4xf32>
    %cst_62 = arith.constant dense<0.000000e+00> : vector<256x4xf32>
    %91 = tpu.matmul %88, %90, %cst_62 {dimension_numbers = #tpu.dot_dimension_numbers<[1], [0], [0], [1], [0, 0, 1, 1], [], []>} : vector<256x4xf32>, vector<4x4xf32>, vector<256x4xf32> -> vector<256x4xf32>
    %92 = arith.addf %86, %91 : vector<256x4xf32>
    %93 = vector.extract_strided_slice %67 {offsets = [1, 1, 0], sizes = [16, 16, 4], strides = [1, 1, 1]} : vector<18x18x4xf32> to vector<16x16x4xf32>
    %94 = vector.shape_cast %93 : vector<16x16x4xf32> to vector<256x4xf32>
    %c4_63 = arith.constant 4 : index
    %c0_64 = arith.constant 0 : index
    %c0_65 = arith.constant 0 : index
    %95 = vector.load %arg4[%c4_63, %c0_64, %c0_65] : memref<9x4x4xf32, #tpu.memory_space<vmem>>, vector<1x4x4xf32>
    %96 = vector.shape_cast %95 : vector<1x4x4xf32> to vector<4x4xf32>
    %cst_66 = arith.constant dense<0.000000e+00> : vector<256x4xf32>
    %97 = tpu.matmul %94, %96, %cst_66 {dimension_numbers = #tpu.dot_dimension_numbers<[1], [0], [0], [1], [0, 0, 1, 1], [], []>} : vector<256x4xf32>, vector<4x4xf32>, vector<256x4xf32> -> vector<256x4xf32>
    %98 = arith.addf %92, %97 : vector<256x4xf32>
    %99 = vector.extract_strided_slice %67 {offsets = [1, 2, 0], sizes = [16, 16, 4], strides = [1, 1, 1]} : vector<18x18x4xf32> to vector<16x16x4xf32>
    %100 = vector.shape_cast %99 : vector<16x16x4xf32> to vector<256x4xf32>
    %c5_67 = arith.constant 5 : index
    %c0_68 = arith.constant 0 : index
    %c0_69 = arith.constant 0 : index
    %101 = vector.load %arg4[%c5_67, %c0_68, %c0_69] : memref<9x4x4xf32, #tpu.memory_space<vmem>>, vector<1x4x4xf32>
    %102 = vector.shape_cast %101 : vector<1x4x4xf32> to vector<4x4xf32>
    %cst_70 = arith.constant dense<0.000000e+00> : vector<256x4xf32>
    %103 = tpu.matmul %100, %102, %cst_70 {dimension_numbers = #tpu.dot_dimension_numbers<[1], [0], [0], [1], [0, 0, 1, 1], [], []>} : vector<256x4xf32>, vector<4x4xf32>, vector<256x4xf32> -> vector<256x4xf32>
    %104 = arith.addf %98, %103 : vector<256x4xf32>
    %105 = vector.extract_strided_slice %67 {offsets = [2, 0, 0], sizes = [16, 16, 4], strides = [1, 1, 1]} : vector<18x18x4xf32> to vector<16x16x4xf32>
    %106 = vector.shape_cast %105 : vector<16x16x4xf32> to vector<256x4xf32>
    %c6_71 = arith.constant 6 : index
    %c0_72 = arith.constant 0 : index
    %c0_73 = arith.constant 0 : index
    %107 = vector.load %arg4[%c6_71, %c0_72, %c0_73] : memref<9x4x4xf32, #tpu.memory_space<vmem>>, vector<1x4x4xf32>
    %108 = vector.shape_cast %107 : vector<1x4x4xf32> to vector<4x4xf32>
    %cst_74 = arith.constant dense<0.000000e+00> : vector<256x4xf32>
    %109 = tpu.matmul %106, %108, %cst_74 {dimension_numbers = #tpu.dot_dimension_numbers<[1], [0], [0], [1], [0, 0, 1, 1], [], []>} : vector<256x4xf32>, vector<4x4xf32>, vector<256x4xf32> -> vector<256x4xf32>
    %110 = arith.addf %104, %109 : vector<256x4xf32>
    %111 = vector.extract_strided_slice %67 {offsets = [2, 1, 0], sizes = [16, 16, 4], strides = [1, 1, 1]} : vector<18x18x4xf32> to vector<16x16x4xf32>
    %112 = vector.shape_cast %111 : vector<16x16x4xf32> to vector<256x4xf32>
    %c7_75 = arith.constant 7 : index
    %c0_76 = arith.constant 0 : index
    %c0_77 = arith.constant 0 : index
    %113 = vector.load %arg4[%c7_75, %c0_76, %c0_77] : memref<9x4x4xf32, #tpu.memory_space<vmem>>, vector<1x4x4xf32>
    %114 = vector.shape_cast %113 : vector<1x4x4xf32> to vector<4x4xf32>
    %cst_78 = arith.constant dense<0.000000e+00> : vector<256x4xf32>
    %115 = tpu.matmul %112, %114, %cst_78 {dimension_numbers = #tpu.dot_dimension_numbers<[1], [0], [0], [1], [0, 0, 1, 1], [], []>} : vector<256x4xf32>, vector<4x4xf32>, vector<256x4xf32> -> vector<256x4xf32>
    %116 = arith.addf %110, %115 : vector<256x4xf32>
    %117 = vector.extract_strided_slice %67 {offsets = [2, 2, 0], sizes = [16, 16, 4], strides = [1, 1, 1]} : vector<18x18x4xf32> to vector<16x16x4xf32>
    %118 = vector.shape_cast %117 : vector<16x16x4xf32> to vector<256x4xf32>
    %c8_79 = arith.constant 8 : index
    %c0_80 = arith.constant 0 : index
    %c0_81 = arith.constant 0 : index
    %119 = vector.load %arg4[%c8_79, %c0_80, %c0_81] : memref<9x4x4xf32, #tpu.memory_space<vmem>>, vector<1x4x4xf32>
    %120 = vector.shape_cast %119 : vector<1x4x4xf32> to vector<4x4xf32>
    %cst_82 = arith.constant dense<0.000000e+00> : vector<256x4xf32>
    %121 = tpu.matmul %118, %120, %cst_82 {dimension_numbers = #tpu.dot_dimension_numbers<[1], [0], [0], [1], [0, 0, 1, 1], [], []>} : vector<256x4xf32>, vector<4x4xf32>, vector<256x4xf32> -> vector<256x4xf32>
    %122 = arith.addf %116, %121 : vector<256x4xf32>
    %123 = vector.broadcast %3 : vector<1x4xf32> to vector<256x4xf32>
    %124 = arith.addf %122, %123 : vector<256x4xf32>
    %125 = vector.extract_strided_slice %1 {offsets = [1, 1, 0], sizes = [16, 16, 4], strides = [1, 1, 1]} : vector<18x18x4xf32> to vector<16x16x4xf32>
    %126 = vector.shape_cast %125 : vector<16x16x4xf32> to vector<256x4xf32>
    %127 = arith.addf %126, %124 : vector<256x4xf32>
    %128 = vector.shape_cast %127 : vector<256x4xf32> to vector<16x16x4xf32>
    %c0_83 = arith.constant 0 : index
    %c0_84 = arith.constant 0 : index
    %c0_85 = arith.constant 0 : index
    %c0_86 = arith.constant 0 : index
    %129 = vector.load %arg6[%c0_83, %c0_84, %c0_85, %c0_86] : memref<1x16x16x4xf32, #tpu.memory_space<vmem>>, vector<1x16x16x4xf32>
    %130 = vector.shape_cast %129 : vector<1x16x16x4xf32> to vector<16x16x4xf32>
    %131 = vector.shape_cast %128 : vector<16x16x4xf32> to vector<1x16x16x4xf32>
    tpu.vector_store %arg6[%c0_83, %c0_84, %c0_85, %c0_86], %131 {strides = array<i32>} : memref<1x16x16x4xf32, #tpu.memory_space<vmem>>, vector<1x16x16x4xf32>,
    return
  }
  func.func @transform_0(%arg0: i32) -> (i32, i32, i32, i32) {
    %c0_i32 = arith.constant 0 : i32
    %c0_i32_0 = arith.constant 0 : i32
    %c0_i32_1 = arith.constant 0 : i32
    %c0_i32_2 = arith.constant 0 : i32
    return %arg0, %c0_i32, %c0_i32_0, %c0_i32_1 : i32, i32, i32, i32
  }
  func.func @transform_1(%arg0: i32) -> (i32, i32, i32) {
    %c0_i32 = arith.constant 0 : i32
    %c0_i32_0 = arith.constant 0 : i32
    %c0_i32_1 = arith.constant 0 : i32
    %c0_i32_2 = arith.constant 0 : i32
    return %c0_i32, %c0_i32_0, %c0_i32_1 : i32, i32, i32
  }
  func.func @transform_2(%arg0: i32) -> (i32, i32) {
    %c0_i32 = arith.constant 0 : i32
    %c0_i32_0 = arith.constant 0 : i32
    %c0_i32_1 = arith.constant 0 : i32
    return %c0_i32, %c0_i32_0 : i32, i32
  }
  func.func @transform_3(%arg0: i32) -> (i32, i32, i32) {
    %c0_i32 = arith.constant 0 : i32
    %c0_i32_0 = arith.constant 0 : i32
    %c0_i32_1 = arith.constant 0 : i32
    %c0_i32_2 = arith.constant 0 : i32
    return %c0_i32, %c0_i32_0, %c0_i32_1 : i32, i32, i32
  }
  func.func @transform_4(%arg0: i32) -> (i32, i32) {
    %c0_i32 = arith.constant 0 : i32
    %c0_i32_0 = arith.constant 0 : i32
    %c0_i32_1 = arith.constant 0 : i32
    return %c0_i32, %c0_i32_0 : i32, i32
  }
  func.func @transform_5(%arg0: i32) -> (i32, i32, i32, i32) {
    %c0_i32 = arith.constant 0 : i32
    %c0_i32_0 = arith.constant 0 : i32
    %c0_i32_1 = arith.constant 0 : i32
    %c0_i32_2 = arith.constant 0 : i32
    return %arg0, %c0_i32, %c0_i32_0, %c0_i32_1 : i32, i32, i32, i32
  }
}

</mosaic_0001>

<bundles_post_ra>
// kernel: res_block_forward.1
= control target key start
LH: loop header
LB: loop body
LE: loop exit
PB: predicated region body
PF: predicated region fallthrough
CT: control target
= control target key end

     0   :  { %s8850_s18 = smov 0   ;;  %s11243_s0 = inlined_call_operand.vmem [shape: f32[2,18,18,4], index: 0, kind: input, shape index: {}]   ;;  %s11244_s1 = inlined_call_operand.vmem [shape: f32[9,4,4], index: 1, kind: input, shape index: {}]   ;;  %s11245_s2 = inlined_call_operand.vmem [shape: f32[1,4], index: 2, kind: input, shape index: {}]   ;;  %s11246_s3 = inlined_call_operand.vmem [shape: f32[9,4,4], index: 3, kind: input, shape index: {}]   ;;  %s11247_s4 = inlined_call_operand.vmem [shape: f32[1,4], index: 4, kind: input, shape index: {}]   ;;  %s11248_s5 = inlined_call_operand.vmem [shape: f32[2,16,16,4], index: 5, kind: output, shape index: {}]  }
   0x1 LB: > { %s6172_s19 = sadd.s32 4294967295, %s8817_s18   ;;  %p6176_p0 = scmp.ge.s32.totalorder %s8817_s18, 1  ;;  %s8817_s18 = sphi %s8850_s18, %s15_s18  }
   0x2   : > { %p187_p1 = scmp.lt.s32.totalorder %s8817_s18, 3 }
   0x4   : > { %p188_p2 = pnand %p6176_p0, %p187_p1 }
   0x6   : > { %191 = sbr.rel (%p188_p2) target bundleno = 1552 (0x610), region = 40 }
   0xd   : > { %v6180_v0 = vld [vmem:[%s11244_s1 + $0x4] sm:$0xf]  ;;  %vm478_vm0 = vcmask 1043456   ;;  %p215_p3 = scmp.lt.s32.totalorder %s6172_s19, 1  ;;  %v281_v1 = vld [vmem:[%s11244_s1] sm:$0xf] }
   0xe   : > { %7389 = vmatprep.subr.msk.mxu0 %vm478_vm0, %v6180_v0  ;;  %vm330_vm1 = vcmask 1046528   ;;  %vm413_vm2 = vcmask 31744   ;;  %v8925_v24 = vld [vmem:[%s11244_s1 + $0x8] sm:$0xf]  ;;  %vm999_vm3 = vcmask 1045504   ;;  %vm3132_vm4 = vcmask 25600  }
   0xf   : > { %7390 = vmatpush3.msk.msra.mxu0 %vm478_vm0, %v6180_v0  ;;  %s11655_s19 = smov (!%p215_p3, %s6172_s19), 1 }
  0x10   : > { %7439 = vmatprep.subr.msk.mxu0 %vm478_vm0, %v281_v1  ;;  %s8801_s24 = smul.u32 432, %s11655_s19  ;;  %s6794_s16 = sshll.u32 %s11655_s19, 8 }
  0x11   : > { %s11111_s21 = scalar_lea.vmem %s11248_s5, %s6794_s16 }
  0x12   : > { %s8873_s27 = scalar_lea.vmem %s11243_s0, %s8801_s24 }
  0x13   : > { %v8876_v2 = vld [vmem:[%s8873_s27] sm:$0xff]  ;;  %v8879_v3 = vld [vmem:[%s8873_s27 + $0x8] sm:$0xff]  ;;  %v8882_v4 = vld [vmem:[%s8873_s27 + $0x10] sm:$0x3] }
  0x14   : > { %v331_v5 = vrot.slane %v8876_v2, 1  ;;  %v332_v6 = vrot.slane %v8879_v3, 1  ;;  %v334_v7 = vrot.slane %v8882_v4, 1  ;;  %v8888_v8 = vld [vmem:[%s8873_s27 + $0x18] sm:$0xff]  ;;  %v8891_v9 = vld [vmem:[%s8873_s27 + $0x20] sm:$0xff]  ;;  %v8899_v13 = vld [vmem:[%s8873_s27 + $0x30] sm:$0xff] }
  0x15   : > { %v336_v10 = vrot.slane %v8888_v8, 1  ;;  %v337_v11 = vrot.slane %v8891_v9, 1  ;;  %v8896_v12 = vld [vmem:[%s8873_s27 + $0x28] sm:$0x3]  ;;  %v8902_v14 = vld [vmem:[%s8873_s27 + $0x38] sm:$0xff]  ;;  %v341_v18 = vrot.slane %v8899_v13, 1 }
  0x16   : > { %v333_v15 = vsel %vm330_vm1, %v331_v5, %v332_v6  ;;  %v335_v16 = vsel %vm330_vm1, %v332_v6, %v334_v7  ;;  %v339_v17 = vrot.slane %v8896_v12, 1  ;;  %v8909_v19 = vld [vmem:[%s8873_s27 + $0x40] sm:$0x3]  ;;  %v342_v21 = vrot.slane %v8902_v14, 1  ;;  %v8917_v22 = vld [vmem:[%s8873_s27 + $0x48] sm:$0xff]  ;;  %v8920_v23 = vld [vmem:[%s8873_s27 + $0x50] sm:$0xff] }
  0x17   : > { %7391 = vmatprep.mubr.msk.f32.mxu0 %vm413_vm2, %v333_v15  ;;  %v8913_v20 = vsel %vm330_vm1, %v336_v10, %v337_v11  ;;  %v344_v26 = vrot.slane %v8909_v19, 1  ;;  %v346_v28 = vrot.slane %v8917_v22, 1  ;;  %v347_v29 = vrot.slane %v8920_v23, 1  ;;  %v8941_v30 = vld [vmem:[%s8873_s27 + $0x58] sm:$0x3]  ;;  %v8946_v31 = vld [vmem:[%s8873_s27 + $0x60] sm:$0xff] }
  0x18   : > { %11408 = vst [vmem:[#allocation3_spill] sm:$0xff] %v8913_v20  ;;  %7392 = vmatmul.mubr.msk.f32.vlgmr.msra.gmra.mrb[0].mxu0 %vm413_vm2, %v335_v16  ;;  %v8932_v25 = vsel %vm330_vm1, %v337_v11, %v339_v17  ;;  %v8936_v27 = vsel %vm330_vm1, %v341_v18, %v342_v21  ;;  %v8949_v32 = vld [vmem:[%s8873_s27 + $0x68] sm:$0xff]  ;;  %v349_v34 = vrot.slane %v8941_v30, 1  ;;  %v351_v36 = vrot.slane %v8946_v31, 1  ;;  %v8965_v38 = vld [vmem:[%s8873_s27 + $0x70] sm:$0x3] }
  0x19   : > { %7440 = vmatpush3.msk.msra.mxu0 %vm478_vm0, %v281_v1  ;;  %7394 = vmatprep.mubr.msk.f32.mxu0 %vm413_vm2, %v8913_v20  ;;  %11409 = vst [vmem:[#allocation4_spill] sm:$0xff] %v8932_v25  ;;  %11410 = vst [vmem:[#allocation5_spill] sm:$0xff] %v8936_v27  ;;  %v8956_v33 = vsel %vm330_vm1, %v342_v21, %v344_v26  ;;  %v8960_v35 = vsel %vm330_vm1, %v346_v28, %v347_v29  ;;  %v352_v37 = vrot.slane %v8949_v32, 1  ;;  %v8968_v39 = vld [vmem:[%s8873_s27 + $0x78] sm:$0xff]  ;;  %v8971_v40 = vld [vmem:[%s8873_s27 + $0x80] sm:$0xff] }
  0x1a   : > { %7489 = vmatprep.subr.msk.mxu0 %vm478_vm0, %v8925_v24  ;;  %11411 = vst [vmem:[#allocation6_spill] sm:$0xff] %v8956_v33  ;;  %11412 = vst [vmem:[#allocation7_spill] sm:$0xff] %v8960_v35  ;;  %v8978_v41 = vsel %vm330_vm1, %v347_v29, %v349_v34  ;;  %v354_v42 = vrot.slane %v8965_v38, 1  ;;  %v356_v44 = vrot.slane %v8968_v39, 1  ;;  %v357_v45 = vrot.slane %v8971_v40, 1  ;;  %v8990_v47 = vld [vmem:[%s8873_s27 + $0x90] sm:$0xff] }
  0x1b   : > { %11413 = vst [vmem:[#allocation8_spill] sm:$0xff] %v8978_v41  ;;  %v8982_v43 = vsel %vm330_vm1, %v351_v36, %v352_v37  ;;  %v8987_v46 = vld [vmem:[%s8873_s27 + $0x88] sm:$0x3]  ;;  %v8993_v48 = vld [vmem:[%s8873_s27 + $0x98] sm:$0xff]  ;;  %v361_v52 = vrot.slane %v8990_v47, 1  ;;  %v9015_v56 = vld [vmem:[%s8873_s27 + $0xb0] sm:$0xff] }
  0x1c   : > { %7395 = vmatmul.mubr.msk.f32.gmra.mrb[2].mxu0 %vm413_vm2, %v8932_v25  ;;  %11414 = vst [vmem:[#allocation9_spill] sm:$0xff] %v8982_v43  ;;  %v9000_v49 = vsel %vm330_vm1, %v352_v37, %v354_v42  ;;  %v359_v50 = vrot.slane %v8987_v46, 1  ;;  %v9004_v51 = vsel %vm330_vm1, %v356_v44, %v357_v45  ;;  %v362_v53 = vrot.slane %v8993_v48, 1  ;;  %v9009_v54 = vld [vmem:[%s8873_s27 + $0xa0] sm:$0x3]  ;;  %v9012_v55 = vld [vmem:[%s8873_s27 + $0xa8] sm:$0xff] }
  0x1d   : > { %7397 = vmatprep.mubr.msk.f32.mxu0 %vm413_vm2, %v8936_v27  ;;  %11415 = vst [vmem:[#allocation10_spill] sm:$0xff] %v9000_v49  ;;  %11416 = vst [vmem:[#allocation11_spill] sm:$0xff] %v9004_v51  ;;  %v364_v58 = vrot.slane %v9009_v54, 1  ;;  %v366_v60 = vrot.slane %v9012_v55, 1  ;;  %v367_v61 = vrot.slane %v9015_v56, 1  ;;  %v9034_v63 = vld [vmem:[%s8873_s27 + $0xc0] sm:$0xff] }
  0x1e   : > { %v9022_v57 = vsel %vm330_vm1, %v357_v45, %v359_v50  ;;  %v9026_v59 = vsel %vm330_vm1, %v361_v52, %v362_v53  ;;  %v9031_v62 = vld [vmem:[%s8873_s27 + $0xb8] sm:$0x3]  ;;  %v9037_v0 = vld [vmem:[%s8873_s27 + $0xc8] sm:$0xff]  ;;  %v371_v7 = vrot.slane %v9034_v63, 1  ;;  %v9053_v11 = vld [vmem:[%s8873_s27 + $0xd0] sm:$0x3] }
  0x1f   : > { %11417 = vst [vmem:[#allocation12_spill] sm:$0xff] %v9022_v57  ;;  %11418 = vst [vmem:[#allocation13_spill] sm:$0xff] %v9026_v59  ;;  %v9044_v1 = vsel %vm330_vm1, %v362_v53, %v364_v58  ;;  %v369_v5 = vrot.slane %v9031_v62, 1  ;;  %v9048_v6 = vsel %vm330_vm1, %v366_v60, %v367_v61  ;;  %v372_v10 = vrot.slane %v9037_v0, 1  ;;  %v9056_v15 = vld [vmem:[%s8873_s27 + $0xd8] sm:$0xff]  ;;  %v9059_v16 = vld [vmem:[%s8873_s27 + $0xe0] sm:$0xff] }
  0x20   : > { %7398 = vmatmul.mubr.msk.f32.gmra.mrb[4].mxu0 %vm413_vm2, %v8956_v33  ;;  %11419 = vst [vmem:[#allocation14_spill] sm:$0xff] %v9044_v1  ;;  %11420 = vst [vmem:[#allocation15_spill] sm:$0xff] %v9048_v6  ;;  %v374_v18 = vrot.slane %v9053_v11, 1  ;;  %v376_v26 = vrot.slane %v9056_v15, 1  ;;  %v377_v28 = vrot.slane %v9059_v16, 1  ;;  %v9078_v34 = vld [vmem:[%s8873_s27 + $0xf0] sm:$0xff] }
  0x21   : > { %7400 = vmatprep.mubr.msk.f32.mxu0 %vm413_vm2, %v8960_v35  ;;  %v9066_v17 = vsel %vm330_vm1, %v367_v61, %v369_v5  ;;  %v9070_v21 = vsel %vm330_vm1, %v371_v7, %v372_v10  ;;  %v9075_v29 = vld [vmem:[%s8873_s27 + $0xe8] sm:$0x3]  ;;  %v9081_v36 = vld [vmem:[%s8873_s27 + $0xf8] sm:$0xff]  ;;  %v381_v45 = vrot.slane %v9078_v34, 1  ;;  %v9097_v52 = vld [vmem:[%s8873_s27 + $0x100] sm:$0x3] }
  0x22   : > { %11421 = vst [vmem:[#allocation16_spill] sm:$0xff] %v9066_v17  ;;  %11422 = vst [vmem:[#allocation17_spill] sm:$0xff] %v9070_v21  ;;  %v9088_v37 = vsel %vm330_vm1, %v372_v10, %v374_v18  ;;  %v379_v42 = vrot.slane %v9075_v29, 1  ;;  %v9092_v44 = vsel %vm330_vm1, %v376_v26, %v377_v28  ;;  %v382_v50 = vrot.slane %v9081_v36, 1  ;;  %v9100_v53 = vld [vmem:[%s8873_s27 + $0x108] sm:$0xff]  ;;  %v9103_v58 = vld [vmem:[%s8873_s27 + $0x110] sm:$0xff] }
  0x23   : > { %11423 = vst [vmem:[#allocation18_spill] sm:$0xff] %v9088_v37  ;;  %11424 = vst [vmem:[#allocation19_spill] sm:$0xff] %v9092_v44  ;;  %v384_v61 = vrot.slane %v9097_v52, 1  ;;  %v386_v7 = vrot.slane %v9100_v53, 1  ;;  %v387_v10 = vrot.slane %v9103_v58, 1  ;;  %v9122_v26 = vld [vmem:[%s8873_s27 + $0x120] sm:$0xff] }
  0x24   : > { %7401 = vmatmul.mubr.msk.f32.gmra.mrb[6].mxu0 %vm413_vm2, %v8978_v41  ;;  %v9110_v60 = vsel %vm330_vm1, %v377_v28, %v379_v42  ;;  %v9114_v5 = vsel %vm330_vm1, %v381_v45, %v382_v50  ;;  %v9119_v18 = vld [vmem:[%s8873_s27 + $0x118] sm:$0x3] }
  0x25   : > { %7403 = vmatprep.mubr.msk.f32.mxu0 %vm413_vm2, %v8982_v43  ;;  %11425 = vst [vmem:[#allocation20_spill] sm:$0xff] %v9110_v60  ;;  %11426 = vst [vmem:[#allocation21_spill] sm:$0xff] %v9114_v5  ;;  %v9132_v28 = vsel %vm330_vm1, %v382_v50, %v384_v61  ;;  %v389_v42 = vrot.slane %v9119_v18, 1  ;;  %v9136_v45 = vsel %vm330_vm1, %v386_v7, %v387_v10  ;;  %v9188_v43 = vld [vmem:[%s8873_s27 + $0x168] sm:$0xff]  ;;  %v9207_v35 = vld [vmem:[%s8873_s27 + $0x178] sm:$0x3] }
  0x26   : > { %11427 = vst [vmem:[#allocation22_spill] sm:$0xff] %v9132_v28  ;;  %11428 = vst [vmem:[#allocation23_spill] sm:$0xff] %v9136_v45 }
  0x27   : > { %v9154_v50 = vsel %vm330_vm1, %v387_v10, %v389_v42 }
  0x28   : > { %7404 = vmatmul.mubr.msk.f32.gmra.mrb[8].mxu0 %vm413_vm2, %v9000_v49  ;;  %11429 = vst [vmem:[#allocation24_spill] sm:$0xff] %v9154_v50  ;;  %v9185_v49 = vld [vmem:[%s8873_s27 + $0x160] sm:$0x3] }
  0x29   : > { %7406 = vmatprep.mubr.msk.f32.mxu0 %vm413_vm2, %v9004_v51 }
  0x2c   : > { %7407 = vmatmul.mubr.msk.f32.gmra.mrb[10].mxu0 %vm413_vm2, %v9022_v57 }
  0x2d   : > { %7409 = vmatprep.mubr.msk.f32.mxu0 %vm413_vm2, %v9026_v59  ;;  %v9163_v59 = vld [vmem:[%s8873_s27 + $0x148] sm:$0x3] }
  0x2e   : > { %v399_v10 = vrot.slane %v9163_v59, 1 }
  0x30   : > { %7410 = vmatmul.mubr.msk.f32.gmra.mrb[12].mxu0 %vm413_vm2, %v9044_v1 }
  0x31   : > { %7412 = vmatprep.mubr.msk.f32.mxu0 %vm413_vm2, %v9048_v6 }
  0x34   : > { %7413 = vmatmul.mubr.msk.f32.gmra.mrb[14].mxu0 %vm413_vm2, %v9066_v17  ;;  %v9141_v17 = vld [vmem:[%s8873_s27 + $0x130] sm:$0x3] }
  0x35   : > { %7415 = vmatprep.mubr.msk.f32.mxu0 %vm413_vm2, %v9070_v21  ;;  %v394_v61 = vrot.slane %v9141_v17, 1 }
  0x38   : > { %7416 = vmatmul.mubr.msk.f32.gmra.mrb[16].mxu0 %vm413_vm2, %v9088_v37  ;;  %v391_v37 = vrot.slane %v9122_v26, 1 }
  0x39   : > { %7418 = vmatprep.mubr.msk.f32.mxu0 %vm413_vm2, %v9092_v44  ;;  %v9125_v44 = vld [vmem:[%s8873_s27 + $0x128] sm:$0xff] }
  0x3a   : > { %v392_v21 = vrot.slane %v9125_v44, 1 }
  0x3c   : > { %7419 = vmatmul.mubr.msk.f32.gmra.mrb[18].mxu0 %vm413_vm2, %v9110_v60  ;;  %v9144_v60 = vld [vmem:[%s8873_s27 + $0x138] sm:$0xff]  ;;  %v9158_v7 = vsel %vm330_vm1, %v391_v37, %v392_v21  ;;  %v9176_v37 = vsel %vm330_vm1, %v392_v21, %v394_v61 }
  0x3d   : > { %7421 = vmatprep.mubr.msk.f32.mxu0 %vm413_vm2, %v9114_v5  ;;  %v9147_v5 = vld [vmem:[%s8873_s27 + $0x140] sm:$0xff]  ;;  %11430 = vst [vmem:[#allocation25_spill] sm:$0xff] %v9158_v7  ;;  %v396_v6 = vrot.slane %v9144_v60, 1  ;;  %11431 = vst [vmem:[#allocation26_spill] sm:$0xff] %v9176_v37 }
  0x3e   : > { %v397_v1 = vrot.slane %v9147_v5, 1 }
  0x40   : > { %7422 = vmatmul.mubr.msk.f32.gmra.mrb[20].mxu0 %vm413_vm2, %v9132_v28  ;;  %v9166_v28 = vld [vmem:[%s8873_s27 + $0x150] sm:$0xff]  ;;  %v9180_v42 = vsel %vm330_vm1, %v396_v6, %v397_v1  ;;  %v9198_v21 = vsel %vm330_vm1, %v397_v1, %v399_v10  ;;  %v404_v6 = vrot.slane %v9185_v49, 1  ;;  %v409_v10 = vrot.slane %v9207_v35, 1 }
  0x41   : > { %7424 = vmatprep.mubr.msk.f32.mxu0 %vm413_vm2, %v9136_v45  ;;  %v9169_v45 = vld [vmem:[%s8873_s27 + $0x158] sm:$0xff]  ;;  %11432 = vst [vmem:[#allocation27_spill] sm:$0xff] %v9180_v42  ;;  %v401_v57 = vrot.slane %v9166_v28, 1  ;;  %11433 = vst [vmem:[#allocation28_spill] sm:$0xff] %v9198_v21 }
  0x42   : > { %v402_v51 = vrot.slane %v9169_v45, 1 }
  0x44   : > { %7425 = vmatmul.mubr.msk.f32.gmra.mrb[22].mxu0 %vm413_vm2, %v9154_v50  ;;  %v9191_v50 = vld [vmem:[%s8873_s27 + $0x170] sm:$0xff]  ;;  %v9202_v61 = vsel %vm330_vm1, %v401_v57, %v402_v51  ;;  %v9214_v1 = vsel %vm330_vm1, %v402_v51, %v404_v6  ;;  %v6281_v51 = vld [vmem:[%s11244_s1 + $0xc] sm:$0xf] }
  0x45   : > { %7427 = vmatprep.mubr.msk.f32.mxu0 %vm413_vm2, %v9158_v7  ;;  %11434 = vst [vmem:[#allocation29_spill] sm:$0xff] %v9202_v61  ;;  %v406_v7 = vrot.slane %v9188_v43, 1  ;;  %v407_v41 = vrot.slane %v9191_v50, 1  ;;  %11435 = vst [vmem:[#allocation30_spill] sm:$0xff] %v9214_v1 }
  0x47   : > { %v9218_v57 = vsel %vm330_vm1, %v406_v7, %v407_v41  ;;  %v1003_v7 = vrot.slane %v8882_v4, 2 }
  0x48   : > { %7428 = vmatmul.mubr.msk.f32.gmra.mrb[24].mxu0 %vm413_vm2, %v9176_v37  ;;  %11436 = vst [vmem:[#allocation31_spill] sm:$0xff] %v9218_v57 }
  0x49   : > { %7430 = vmatprep.mubr.msk.f32.mxu0 %vm413_vm2, %v9180_v42  ;;  %v9225_v42 = vsel %vm330_vm1, %v407_v41, %v409_v10  ;;  %v1001_v41 = vrot.slane %v8879_v3, 2  ;;  %v1005_v10 = vrot.slane %v8888_v8, 2 }
  0x4a   : > { %11437 = vst [vmem:[#allocation32_spill] sm:$0xff] %v9225_v42 }
  0x4c   : > { %7431 = vmatmul.mubr.msk.f32.gmra.mrb[26].mxu0 %vm413_vm2, %v9198_v21 }
  0x4d   : > { %7433 = vmatprep.mubr.msk.f32.mxu0 %vm413_vm2, %v9202_v61 }
  0x50   : > { %7434 = vmatmul.mubr.msk.f32.gmra.mrb[28].mxu0 %vm413_vm2, %v9214_v1  ;;  %v9316_v1 = vld [vmem:[%s11244_s1 + $0x10] sm:$0xf] }
  0x51   : > { %7436 = vmatprep.mubr.msk.f32.mxu0 %vm413_vm2, %v9218_v57  ;;  %v1010_v57 = vrot.slane %v8899_v13, 2 }
  0x54   : > { %7437 = vmatmul.mubr.msk.f32.gmra.mrb[30].mxu0 %vm413_vm2, %v9225_v42  ;;  %v1006_v42 = vrot.slane %v8891_v9, 2 }
  0x55   : > { %7441 = vmatprep.mubr.msk.f32.mxu0 %vm413_vm2, %v8876_v2 }
  0x56   : > { %v9309_v4 = vsel %vm999_vm3, %v1005_v10, %v1006_v42  ;;  %v1016_v10 = vrot.slane %v8920_v23, 2 }
  0x58   : > { %7442 = vmatmul.mubr.msk.f32.vlgmr.msra.gmra.mrb[0].mxu0 %vm413_vm2, %v8879_v3  ;;  %v1008_v3 = vrot.slane %v8896_v12, 2 }
  0x59   : > { %7490 = vmatpush3.msk.msra.mxu0 %vm478_vm0, %v8925_v24  ;;  %7444 = vmatprep.mubr.msk.f32.mxu0 %vm413_vm2, %v8888_v8  ;;  %v1000_v24 = vrot.slane %v8876_v2, 2  ;;  %v1004_v2 = vsel %vm999_vm3, %v1001_v41, %v1003_v7 }
  0x5a   : > { %7539 = vmatprep.subr.msk.mxu0 %vm478_vm0, %v6281_v51  ;;  %v9323_v12 = vsel %vm999_vm3, %v1006_v42, %v1008_v3 }
  0x5b   : > { %v1002_v6 = vsel %vm999_vm3, %v1000_v24, %v1001_v41  ;;  %v1011_v24 = vrot.slane %v8902_v14, 2  ;;  %v1013_v41 = vrot.slane %v8909_v19, 2  ;;  %v1018_v19 = vrot.slane %v8941_v30, 2 }
  0x5c   : > { %7445 = vmatmul.mubr.msk.f32.gmra.mrb[2].mxu0 %vm413_vm2, %v8891_v9 }
  0x5d   : > { %7447 = vmatprep.mubr.msk.f32.mxu0 %vm413_vm2, %v8899_v13  ;;  %v9327_v7 = vsel %vm999_vm3, %v1010_v57, %v1011_v24  ;;  %v9338_v42 = vsel %vm999_vm3, %v1011_v24, %v1013_v41  ;;  %v9351_v3 = vsel %vm999_vm3, %v1016_v10, %v1018_v19  ;;  %v1023_v24 = vrot.slane %v8965_v38, 2 }
  0x5e   : > { %v1025_v41 = vrot.slane %v8968_v39, 2  ;;  %v1030_v19 = vrot.slane %v8990_v47, 2 }
  0x60   : > { %7448 = vmatmul.mubr.msk.f32.gmra.mrb[4].mxu0 %vm413_vm2, %v8902_v14 }
  0x61   : > { %7450 = vmatprep.mubr.msk.f32.mxu0 %vm413_vm2, %v8917_v22 }
  0x64   : > { %7451 = vmatmul.mubr.msk.f32.gmra.mrb[6].mxu0 %vm413_vm2, %v8920_v23 }
  0x65   : > { %7453 = vmatprep.mubr.msk.f32.mxu0 %vm413_vm2, %v8946_v31 }
  0x68   : > { %7454 = vmatmul.mubr.msk.f32.gmra.mrb[8].mxu0 %vm413_vm2, %v8949_v32 }
  0x69   : > { %7456 = vmatprep.mubr.msk.f32.mxu0 %vm413_vm2, %v8968_v39 }
  0x6c   : > { %7457 = vmatmul.mubr.msk.f32.gmra.mrb[10].mxu0 %vm413_vm2, %v8971_v40 }
  0x6d   : > { %7459 = vmatprep.mubr.msk.f32.mxu0 %vm413_vm2, %v8990_v47 }
  0x70   : > { %7460 = vmatmul.mubr.msk.f32.gmra.mrb[12].mxu0 %vm413_vm2, %v8993_v48 }
  0x71   : > { %7462 = vmatprep.mubr.msk.f32.mxu0 %vm413_vm2, %v9012_v55 }
  0x74   : > { %7463 = vmatmul.mubr.msk.f32.gmra.mrb[14].mxu0 %vm413_vm2, %v9015_v56 }
  0x75   : > { %7465 = vmatprep.mubr.msk.f32.mxu0 %vm413_vm2, %v9034_v63 }
  0x78   : > { %7466 = vmatmul.mubr.msk.f32.gmra.mrb[16].mxu0 %vm413_vm2, %v9037_v0 }
  0x79   : > { %7468 = vmatprep.mubr.msk.f32.mxu0 %vm413_vm2, %v9056_v15 }
  0x7c   : > { %7469 = vmatmul.mubr.msk.f32.gmra.mrb[18].mxu0 %vm413_vm2, %v9059_v16 }
  0x7d   : > { %7471 = vmatprep.mubr.msk.f32.mxu0 %vm413_vm2, %v9078_v34 }
  0x80   : > { %7472 = vmatmul.mubr.msk.f32.gmra.mrb[20].mxu0 %vm413_vm2, %v9081_v36 }
  0x81   : > { %7474 = vmatprep.mubr.msk.f32.mxu0 %vm413_vm2, %v9100_v53 }
  0x84   : > { %7475 = vmatmul.mubr.msk.f32.gmra.mrb[22].mxu0 %vm413_vm2, %v9103_v58 }
  0x85   : > { %7477 = vmatprep.mubr.msk.f32.mxu0 %vm413_vm2, %v9122_v26 }
  0x88   : > { %7478 = vmatmul.mubr.msk.f32.gmra.mrb[24].mxu0 %vm413_vm2, %v9125_v44 }
  0x89   : > { %7480 = vmatprep.mubr.msk.f32.mxu0 %vm413_vm2, %v9144_v60 }
  0x8c   : > { %7481 = vmatmul.mubr.msk.f32.gmra.mrb[26].mxu0 %vm413_vm2, %v9147_v5 }
  0x8d   : > { %7483 = vmatprep.mubr.msk.f32.mxu0 %vm413_vm2, %v9166_v28 }
  0x90   : > { %7484 = vmatmul.mubr.msk.f32.gmra.mrb[28].mxu0 %vm413_vm2, %v9169_v45 }
  0x91   : > { %7486 = vmatprep.mubr.msk.f32.mxu0 %vm413_vm2, %v9188_v43 }
  0x94   : > { %7487 = vmatmul.mubr.msk.f32.gmra.mrb[30].mxu0 %vm413_vm2, %v9191_v50 }
  0x95   : > { %7491 = vmatprep.mubr.msk.f32.mxu0 %vm413_vm2, %v1002_v6  ;;  %v1015_v6 = vrot.slane %v8917_v22, 2 }
  0x97   : > { %v9342_v57 = vsel %vm999_vm3, %v1015_v6, %v1016_v10  ;;  %v1026_v6 = vrot.slane %v8971_v40, 2  ;;  %v1028_v10 = vrot.slane %v8987_v46, 2 }
  0x98   : > { %7492 = vmatmul.mubr.msk.f32.vlgmr.msra.gmra.mrb[0].mxu0 %vm413_vm2, %v1004_v2  ;;  %11438 = vst [vmem:[#allocation33_spill] sm:$0xff] %v9342_v57  ;;  %v1021_v2 = vrot.slane %v8949_v32, 2 }
  0x99   : > { %7540 = vmatpush3.msk.msra.mxu0 %vm478_vm0, %v6281_v51  ;;  %7494 = vmatprep.mubr.msk.f32.mxu0 %vm413_vm2, %v9309_v4  ;;  %v1020_v51 = vrot.slane %v8946_v31, 2  ;;  %v9368_v38 = vsel %vm999_vm3, %v1025_v41, %v1026_v6  ;;  %v1036_v41 = vrot.slane %v9015_v56, 2 }
  0x9a   : > { %7589 = vmatprep.subr.msk.mxu0 %vm478_vm0, %v9316_v1  ;;  %11440 = vst [vmem:[#allocation35_spill] sm:$0xff] %v9368_v38 }
  0x9b   : > { %v9355_v30 = vsel %vm999_vm3, %v1020_v51, %v1021_v2  ;;  %v1031_v51 = vrot.slane %v8993_v48, 2 }
  0x9c   : > { %7495 = vmatmul.mubr.msk.f32.gmra.mrb[2].mxu0 %vm413_vm2, %v9323_v12  ;;  %11439 = vst [vmem:[#allocation34_spill] sm:$0xff] %v9355_v30 }
  0x9d   : > { %7497 = vmatprep.mubr.msk.f32.mxu0 %vm413_vm2, %v9327_v7  ;;  %v9381_v46 = vsel %vm999_vm3, %v1030_v19, %v1031_v51  ;;  %v1041_v19 = vrot.slane %v9037_v0, 2 }
  0x9e   : > { %11441 = vst [vmem:[#allocation36_spill] sm:$0xff] %v9381_v46 }
  0xa0   : > { %7498 = vmatmul.mubr.msk.f32.gmra.mrb[4].mxu0 %vm413_vm2, %v9338_v42 }
  0xa1   : > { %7500 = vmatprep.mubr.msk.f32.mxu0 %vm413_vm2, %v9342_v57  ;;  %v9364_v57 = vsel %vm999_vm3, %v1021_v2, %v1023_v24  ;;  %v1033_v2 = vrot.slane %v9009_v54, 2  ;;  %v1035_v24 = vrot.slane %v9012_v55, 2 }
  0xa3   : > { %v9394_v54 = vsel %vm999_vm3, %v1035_v24, %v1036_v41  ;;  %v1046_v24 = vrot.slane %v9059_v16, 2 }
  0xa4   : > { %7501 = vmatmul.mubr.msk.f32.gmra.mrb[6].mxu0 %vm413_vm2, %v9351_v3  ;;  %11442 = vst [vmem:[#allocation37_spill] sm:$0xff] %v9394_v54 }
  0xa5   : > { %7503 = vmatprep.mubr.msk.f32.mxu0 %vm413_vm2, %v9355_v30  ;;  %v9377_v30 = vsel %vm999_vm3, %v1026_v6, %v1028_v10  ;;  %v1038_v6 = vrot.slane %v9031_v62, 2  ;;  %v1040_v10 = vrot.slane %v9034_v63, 2 }
  0xa7   : > { %v9407_v62 = vsel %vm999_vm3, %v1040_v10, %v1041_v19  ;;  %v1051_v10 = vrot.slane %v9081_v36, 2 }
  0xa8   : > { %7504 = vmatmul.mubr.msk.f32.gmra.mrb[8].mxu0 %vm413_vm2, %v9364_v57  ;;  %11443 = vst [vmem:[#allocation38_spill] sm:$0xff] %v9407_v62 }
  0xa9   : > { %7506 = vmatprep.mubr.msk.f32.mxu0 %vm413_vm2, %v9368_v38  ;;  %v9390_v38 = vsel %vm999_vm3, %v1031_v51, %v1033_v2  ;;  %v1043_v51 = vrot.slane %v9053_v11, 2  ;;  %v1045_v2 = vrot.slane %v9056_v15, 2 }
  0xab   : > { %v9420_v11 = vsel %vm999_vm3, %v1045_v2, %v1046_v24  ;;  %v1056_v2 = vrot.slane %v9103_v58, 2 }
  0xac   : > { %7507 = vmatmul.mubr.msk.f32.gmra.mrb[10].mxu0 %vm413_vm2, %v9377_v30  ;;  %11444 = vst [vmem:[#allocation39_spill] sm:$0xff] %v9420_v11 }
  0xad   : > { %7509 = vmatprep.mubr.msk.f32.mxu0 %vm413_vm2, %v9381_v46  ;;  %v9403_v46 = vsel %vm999_vm3, %v1036_v41, %v1038_v6  ;;  %v1048_v41 = vrot.slane %v9075_v29, 2  ;;  %v1050_v6 = vrot.slane %v9078_v34, 2 }
  0xaf   : > { %v9433_v29 = vsel %vm999_vm3, %v1050_v6, %v1051_v10  ;;  %v1061_v6 = vrot.slane %v9125_v44, 2 }
  0xb0   : > { %7510 = vmatmul.mubr.msk.f32.gmra.mrb[12].mxu0 %vm413_vm2, %v9390_v38  ;;  %11445 = vst [vmem:[#allocation40_spill] sm:$0xff] %v9433_v29 }
  0xb1   : > { %7512 = vmatprep.mubr.msk.f32.mxu0 %vm413_vm2, %v9394_v54  ;;  %v9416_v54 = vsel %vm999_vm3, %v1041_v19, %v1043_v51  ;;  %v1053_v19 = vrot.slane %v9097_v52, 2  ;;  %v1055_v51 = vrot.slane %v9100_v53, 2 }
  0xb3   : > { %v9446_v52 = vsel %vm999_vm3, %v1055_v51, %v1056_v2  ;;  %v1066_v51 = vrot.slane %v9147_v5, 2 }
  0xb4   : > { %7513 = vmatmul.mubr.msk.f32.gmra.mrb[14].mxu0 %vm413_vm2, %v9403_v46  ;;  %11447 = vst [vmem:[#allocation42_spill] sm:$0xff] %v9446_v52 }
  0xb5   : > { %7515 = vmatprep.mubr.msk.f32.mxu0 %vm413_vm2, %v9407_v62  ;;  %v9429_v62 = vsel %vm999_vm3, %v1046_v24, %v1048_v41  ;;  %v1058_v24 = vrot.slane %v9119_v18, 2  ;;  %v1060_v41 = vrot.slane %v9122_v26, 2 }
  0xb7   : > { %v9459_v18 = vsel %vm999_vm3, %v1060_v41, %v1061_v6  ;;  %v1071_v41 = vrot.slane %v9169_v45, 2 }
  0xb8   : > { %7516 = vmatmul.mubr.msk.f32.gmra.mrb[16].mxu0 %vm413_vm2, %v9416_v54  ;;  %11448 = vst [vmem:[#allocation43_spill] sm:$0xff] %v9459_v18 }
  0xb9   : > { %7518 = vmatprep.mubr.msk.f32.mxu0 %vm413_vm2, %v9420_v11  ;;  %v9442_v11 = vsel %vm999_vm3, %v1051_v10, %v1053_v19  ;;  %v1063_v10 = vrot.slane %v9141_v17, 2  ;;  %v1065_v19 = vrot.slane %v9144_v60, 2 }
  0xba   : > { %11446 = vst [vmem:[#allocation41_spill] sm:$0xff] %v9442_v11 }
  0xbb   : > { %v9472_v17 = vsel %vm999_vm3, %v1065_v19, %v1066_v51  ;;  %v1076_v19 = vrot.slane %v9191_v50, 2 }
  0xbc   : > { %7519 = vmatmul.mubr.msk.f32.gmra.mrb[18].mxu0 %vm413_vm2, %v9429_v62  ;;  %11450 = vst [vmem:[#allocation45_spill] sm:$0xff] %v9472_v17 }
  0xbd   : > { %7521 = vmatprep.mubr.msk.f32.mxu0 %vm413_vm2, %v9433_v29  ;;  %v9455_v29 = vsel %vm999_vm3, %v1056_v2, %v1058_v24  ;;  %v1068_v2 = vrot.slane %v9163_v59, 2  ;;  %v1070_v24 = vrot.slane %v9166_v28, 2 }
  0xbf   : > { %v9485_v59 = vsel %vm999_vm3, %v1070_v24, %v1071_v41  ;;  %v11452_v24 = vld [vmem:[#allocation7_spill] sm:$0xff] }
  0xc0   : > { %7522 = vmatmul.mubr.msk.f32.gmra.mrb[20].mxu0 %vm413_vm2, %v9442_v11  ;;  %11451 = vst [vmem:[#allocation46_spill] sm:$0xff] %v9485_v59 }
  0xc1   : > { %7524 = vmatprep.mubr.msk.f32.mxu0 %vm413_vm2, %v9446_v52  ;;  %v9468_v52 = vsel %vm999_vm3, %v1061_v6, %v1063_v10  ;;  %v1073_v6 = vrot.slane %v9185_v49, 2  ;;  %v1075_v10 = vrot.slane %v9188_v43, 2 }
  0xc2   : > { %11449 = vst [vmem:[#allocation44_spill] sm:$0xff] %v9468_v52 }
  0xc3   : > { %v9498_v49 = vsel %vm999_vm3, %v1075_v10, %v1076_v19  ;;  %v11455_v10 = vld [vmem:[#allocation10_spill] sm:$0xff] }
  0xc4   : > { %7525 = vmatmul.mubr.msk.f32.gmra.mrb[22].mxu0 %vm413_vm2, %v9455_v29 }
  0xc5   : > { %7527 = vmatprep.mubr.msk.f32.mxu0 %vm413_vm2, %v9459_v18  ;;  %v9481_v18 = vsel %vm999_vm3, %v1066_v51, %v1068_v2  ;;  %v1078_v51 = vrot.slane %v9207_v35, 2  ;;  %v6349_v35 = vld [vmem:[%s11244_s1 + $0x14] sm:$0xf] }
  0xc7   : > { %v9505_v2 = vsel %vm999_vm3, %v1076_v19, %v1078_v51  ;;  %v11456_v19 = vld [vmem:[#allocation11_spill] sm:$0xff]  ;;  %v11457_v51 = vld [vmem:[#allocation12_spill] sm:$0xff] }
  0xc8   : > { %7528 = vmatmul.mubr.msk.f32.gmra.mrb[24].mxu0 %vm413_vm2, %v9468_v52 }
  0xc9   : > { %7530 = vmatprep.mubr.msk.f32.mxu0 %vm413_vm2, %v9472_v17  ;;  %v9494_v17 = vsel %vm999_vm3, %v1071_v41, %v1073_v6  ;;  %v11453_v41 = vld [vmem:[#allocation8_spill] sm:$0xff]  ;;  %v11454_v6 = vld [vmem:[#allocation9_spill] sm:$0xff] }
  0xcc   : > { %7531 = vmatmul.mubr.msk.f32.gmra.mrb[26].mxu0 %vm413_vm2, %v9481_v18 }
  0xcd   : > { %7533 = vmatprep.mubr.msk.f32.mxu0 %vm413_vm2, %v9485_v59 }
  0xd0   : > { %7534 = vmatmul.mubr.msk.f32.gmra.mrb[28].mxu0 %vm413_vm2, %v9494_v17 }
  0xd1   : > { %7536 = vmatprep.mubr.msk.f32.mxu0 %vm413_vm2, %v9498_v49 }
  0xd4   : > { %7537 = vmatmul.mubr.msk.f32.gmra.mrb[30].mxu0 %vm413_vm2, %v9505_v2 }
  0xd5   : > { %7541 = vmatprep.mubr.msk.f32.mxu0 %vm413_vm2, %v8888_v8  ;;  %v9574_v8 = vld [vmem:[%s8873_s27 + $0x180] sm:$0xff] }
  0xd8   : > { %7542 = vmatmul.mubr.msk.f32.vlgmr.msra.gmra.mrb[0].mxu0 %vm413_vm2, %v8891_v9  ;;  %v9581_v9 = vld [vmem:[%s8873_s27 + $0x188] sm:$0xff] }
  0xd9   : > { %7590 = vmatpush3.msk.msra.mxu0 %vm478_vm0, %v9316_v1  ;;  %7544 = vmatprep.mubr.msk.f32.mxu0 %vm413_vm2, %v8899_v13  ;;  %v6383_v1 = vld [vmem:[%s11244_s1 + $0x18] sm:$0xf] }
  0xda   : > { %7639 = vmatprep.subr.msk.mxu0 %vm478_vm0, %v6349_v35 }
  0xdc   : > { %7545 = vmatmul.mubr.msk.f32.gmra.mrb[2].mxu0 %vm413_vm2, %v8902_v14 }
  0xdd   : > { %7547 = vmatprep.mubr.msk.f32.mxu0 %vm413_vm2, %v8917_v22 }
  0xe0   : > { %7548 = vmatmul.mubr.msk.f32.gmra.mrb[4].mxu0 %vm413_vm2, %v8920_v23 }
  0xe1   : > { %7550 = vmatprep.mubr.msk.f32.mxu0 %vm413_vm2, %v8946_v31 }
  0xe4   : > { %7551 = vmatmul.mubr.msk.f32.gmra.mrb[6].mxu0 %vm413_vm2, %v8949_v32 }
  0xe5   : > { %7553 = vmatprep.mubr.msk.f32.mxu0 %vm413_vm2, %v8968_v39 }
  0xe8   : > { %7554 = vmatmul.mubr.msk.f32.gmra.mrb[8].mxu0 %vm413_vm2, %v8971_v40 }
  0xe9   : > { %7556 = vmatprep.mubr.msk.f32.mxu0 %vm413_vm2, %v8990_v47 }
  0xec   : > { %7557 = vmatmul.mubr.msk.f32.gmra.mrb[10].mxu0 %vm413_vm2, %v8993_v48 }
  0xed   : > { %7559 = vmatprep.mubr.msk.f32.mxu0 %vm413_vm2, %v9012_v55 }
  0xf0   : > { %7560 = vmatmul.mubr.msk.f32.gmra.mrb[12].mxu0 %vm413_vm2, %v9015_v56 }
  0xf1   : > { %7562 = vmatprep.mubr.msk.f32.mxu0 %vm413_vm2, %v9034_v63 }
  0xf4   : > { %7563 = vmatmul.mubr.msk.f32.gmra.mrb[14].mxu0 %vm413_vm2, %v9037_v0 }
  0xf5   : > { %7565 = vmatprep.mubr.msk.f32.mxu0 %vm413_vm2, %v9056_v15 }
  0xf8   : > { %7566 = vmatmul.mubr.msk.f32.gmra.mrb[16].mxu0 %vm413_vm2, %v9059_v16 }
  0xf9   : > { %7568 = vmatprep.mubr.msk.f32.mxu0 %vm413_vm2, %v9078_v34 }
  0xfc   : > { %7569 = vmatmul.mubr.msk.f32.gmra.mrb[18].mxu0 %vm413_vm2, %v9081_v36 }
  0xfd   : > { %7571 = vmatprep.mubr.msk.f32.mxu0 %vm413_vm2, %v9100_v53 }
 0x100   : > { %7572 = vmatmul.mubr.msk.f32.gmra.mrb[20].mxu0 %vm413_vm2, %v9103_v58 }
 0x101   : > { %7574 = vmatprep.mubr.msk.f32.mxu0 %vm413_vm2, %v9122_v26 }
 0x104   : > { %7575 = vmatmul.mubr.msk.f32.gmra.mrb[22].mxu0 %vm413_vm2, %v9125_v44 }
 0x105   : > { %7577 = vmatprep.mubr.msk.f32.mxu0 %vm413_vm2, %v9144_v60 }
 0x108   : > { %7578 = vmatmul.mubr.msk.f32.gmra.mrb[24].mxu0 %vm413_vm2, %v9147_v5 }
 0x109   : > { %7580 = vmatprep.mubr.msk.f32.mxu0 %vm413_vm2, %v9166_v28 }
 0x10c   : > { %7581 = vmatmul.mubr.msk.f32.gmra.mrb[26].mxu0 %vm413_vm2, %v9169_v45 }
 0x10d   : > { %7583 = vmatprep.mubr.msk.f32.mxu0 %vm413_vm2, %v9188_v43 }
 0x110   : > { %7584 = vmatmul.mubr.msk.f32.gmra.mrb[28].mxu0 %vm413_vm2, %v9191_v50 }
 0x111   : > { %7586 = vmatprep.mubr.msk.f32.mxu0 %vm413_vm2, %v9574_v8 }
 0x114   : > { %7587 = vmatmul.mubr.msk.f32.gmra.mrb[30].mxu0 %vm413_vm2, %v9581_v9 }
 0x115   : > { %7591 = vmatprep.mubr.msk.f32.mxu0 %vm413_vm2, %v8913_v20  ;;  %v11459_v20 = vld [vmem:[#allocation14_spill] sm:$0xff] }
 0x118   : > { %7592 = vmatmul.mubr.msk.f32.vlgmr.msra.gmra.mrb[0].mxu0 %vm413_vm2, %v8932_v25  ;;  %v11460_v25 = vld [vmem:[#allocation15_spill] sm:$0xff] }
 0x119   : > { %7640 = vmatpush3.msk.msra.mxu0 %vm478_vm0, %v6349_v35  ;;  %7594 = vmatprep.mubr.msk.f32.mxu0 %vm413_vm2, %v8936_v27  ;;  %v11458_v35 = vld [vmem:[#allocation13_spill] sm:$0xff] }
 0x11a   : > { %7689 = vmatprep.subr.msk.mxu0 %vm478_vm0, %v6383_v1 }
 0x11c   : > { %7595 = vmatmul.mubr.msk.f32.gmra.mrb[2].mxu0 %vm413_vm2, %v8956_v33 }
 0x11d   : > { %7597 = vmatprep.mubr.msk.f32.mxu0 %vm413_vm2, %v11452_v24 }
 0x120   : > { %7598 = vmatmul.mubr.msk.f32.gmra.mrb[4].mxu0 %vm413_vm2, %v11453_v41  ;;  %v11461_v41 = vld [vmem:[#allocation16_spill] sm:$0xff] }
 0x121   : > { %7600 = vmatprep.mubr.msk.f32.mxu0 %vm413_vm2, %v11454_v6  ;;  %v11462_v6 = vld [vmem:[#allocation17_spill] sm:$0xff] }
 0x124   : > { %7601 = vmatmul.mubr.msk.f32.gmra.mrb[6].mxu0 %vm413_vm2, %v11455_v10  ;;  %v11469_v10 = vld [vmem:[#allocation24_spill] sm:$0xff] }
 0x125   : > { %7603 = vmatprep.mubr.msk.f32.mxu0 %vm413_vm2, %v11456_v19  ;;  %v11463_v19 = vld [vmem:[#allocation18_spill] sm:$0xff] }
 0x128   : > { %7604 = vmatmul.mubr.msk.f32.gmra.mrb[8].mxu0 %vm413_vm2, %v11457_v51  ;;  %v11464_v51 = vld [vmem:[#allocation19_spill] sm:$0xff] }
 0x129   : > { %7606 = vmatprep.mubr.msk.f32.mxu0 %vm413_vm2, %v11458_v35  ;;  %v11465_v35 = vld [vmem:[#allocation20_spill] sm:$0xff] }
 0x12c   : > { %7607 = vmatmul.mubr.msk.f32.gmra.mrb[10].mxu0 %vm413_vm2, %v11459_v20  ;;  %v11466_v20 = vld [vmem:[#allocation21_spill] sm:$0xff] }
 0x12d   : > { %7609 = vmatprep.mubr.msk.f32.mxu0 %vm413_vm2, %v11460_v25  ;;  %v11467_v25 = vld [vmem:[#allocation22_spill] sm:$0xff] }
 0x130   : > { %7610 = vmatmul.mubr.msk.f32.gmra.mrb[12].mxu0 %vm413_vm2, %v11461_v41  ;;  %v11468_v41 = vld [vmem:[#allocation23_spill] sm:$0xff] }
 0x131   : > { %7612 = vmatprep.mubr.msk.f32.mxu0 %vm413_vm2, %v11462_v6  ;;  %v11470_v6 = vld [vmem:[#allocation25_spill] sm:$0xff] }
 0x134   : > { %7613 = vmatmul.mubr.msk.f32.gmra.mrb[14].mxu0 %vm413_vm2, %v11463_v19 }
 0x135   : > { %7615 = vmatprep.mubr.msk.f32.mxu0 %vm413_vm2, %v11464_v51  ;;  %v11471_v51 = vld [vmem:[#allocation27_spill] sm:$0xff] }
 0x138   : > { %7616 = vmatmul.mubr.msk.f32.gmra.mrb[16].mxu0 %vm413_vm2, %v11465_v35  ;;  %v11475_v35 = vld [vmem:[#allocation32_spill] sm:$0xff] }
 0x139   : > { %7618 = vmatprep.mubr.msk.f32.mxu0 %vm413_vm2, %v11466_v20  ;;  %v11472_v20 = vld [vmem:[#allocation30_spill] sm:$0xff] }
 0x13c   : > { %7619 = vmatmul.mubr.msk.f32.gmra.mrb[18].mxu0 %vm413_vm2, %v11467_v25  ;;  %v1676_v25 = vrot.slane %v9581_v9, 1 }
 0x13d   : > { %7621 = vmatprep.mubr.msk.f32.mxu0 %vm413_vm2, %v11468_v41  ;;  %v1675_v41 = vrot.slane %v9574_v8, 1 }
 0x140   : > { %7622 = vmatmul.mubr.msk.f32.gmra.mrb[20].mxu0 %vm413_vm2, %v11469_v10  ;;  %v275_v10 = vld [vmem:[%s8873_s27 + $0x190] sm:$0x3] }
 0x141   : > { %7624 = vmatprep.mubr.msk.f32.mxu0 %vm413_vm2, %v11470_v6  ;;  %v11473_v6 = vld [vmem:[#allocation31_spill] sm:$0xff] }
 0x144   : > { %7625 = vmatmul.mubr.msk.f32.gmra.mrb[22].mxu0 %vm413_vm2, %v9176_v37  ;;  %v1678_v37 = vrot.slane %v275_v10, 1 }
 0x145   : > { %7627 = vmatprep.mubr.msk.f32.mxu0 %vm413_vm2, %v11471_v51  ;;  %v9652_v51 = vsel %vm330_vm1, %v1675_v41, %v1676_v25  ;;  %v6417_v41 = vld [vmem:[%s11244_s1 + $0x1c] sm:$0xf] }
 0x146   : > { %11474 = vst [vmem:[#allocation47_spill] sm:$0xff] %v9652_v51 }
 0x148   : > { %7628 = vmatmul.mubr.msk.f32.gmra.mrb[24].mxu0 %vm413_vm2, %v9198_v21 }
 0x149   : > { %7630 = vmatprep.mubr.msk.f32.mxu0 %vm413_vm2, %v9202_v61  ;;  %v9659_v61 = vsel %vm330_vm1, %v1676_v25, %v1678_v37  ;;  %v11477_v25 = vld [vmem:[#allocation33_spill] sm:$0xff]  ;;  %v11478_v37 = vld [vmem:[#allocation34_spill] sm:$0xff] }
 0x14a   : > { %11476 = vst [vmem:[#allocation48_spill] sm:$0xff] %v9659_v61 }
 0x14c   : > { %7631 = vmatmul.mubr.msk.f32.gmra.mrb[26].mxu0 %vm413_vm2, %v11472_v20 }
 0x14d   : > { %7633 = vmatprep.mubr.msk.f32.mxu0 %vm413_vm2, %v11473_v6 }
 0x150   : > { %7634 = vmatmul.mubr.msk.f32.gmra.mrb[28].mxu0 %vm413_vm2, %v11475_v35 }
 0x151   : > { %7636 = vmatprep.mubr.msk.f32.mxu0 %vm413_vm2, %v9652_v51 }
 0x154   : > { %7637 = vmatmul.mubr.msk.f32.gmra.mrb[30].mxu0 %vm413_vm2, %v9659_v61 }
 0x155   : > { %7641 = vmatprep.mubr.msk.f32.mxu0 %vm413_vm2, %v9309_v4  ;;  %v11479_v4 = vld [vmem:[#allocation35_spill] sm:$0xff] }
 0x158   : > { %7642 = vmatmul.mubr.msk.f32.vlgmr.msra.gmra.mrb[0].mxu0 %vm413_vm2, %v9323_v12  ;;  %v11480_v12 = vld [vmem:[#allocation36_spill] sm:$0xff] }
 0x159   : > { %7690 = vmatpush3.msk.msra.mxu0 %vm478_vm0, %v6383_v1  ;;  %7644 = vmatprep.mubr.msk.f32.mxu0 %vm413_vm2, %v9327_v7  ;;  %v11481_v1 = vld [vmem:[#allocation37_spill] sm:$0xff] }
 0x15a   : > { %7739 = vmatprep.subr.msk.mxu0 %vm478_vm0, %v6417_v41 }
 0x15c   : > { %7645 = vmatmul.mubr.msk.f32.gmra.mrb[2].mxu0 %vm413_vm2, %v9338_v42 }
 0x15d   : > { %7647 = vmatprep.mubr.msk.f32.mxu0 %vm413_vm2, %v11477_v25 }
 0x160   : > { %7648 = vmatmul.mubr.msk.f32.gmra.mrb[4].mxu0 %vm413_vm2, %v9351_v3 }
 0x161   : > { %7650 = vmatprep.mubr.msk.f32.mxu0 %vm413_vm2, %v11478_v37  ;;  %v11482_v37 = vld [vmem:[#allocation38_spill] sm:$0xff] }
 0x164   : > { %7651 = vmatmul.mubr.msk.f32.gmra.mrb[6].mxu0 %vm413_vm2, %v9364_v57 }
 0x165   : > { %7653 = vmatprep.mubr.msk.f32.mxu0 %vm413_vm2, %v11479_v4  ;;  %v11483_v4 = vld [vmem:[#allocation39_spill] sm:$0xff] }
 0x168   : > { %7654 = vmatmul.mubr.msk.f32.gmra.mrb[8].mxu0 %vm413_vm2, %v9377_v30 }
 0x169   : > { %7656 = vmatprep.mubr.msk.f32.mxu0 %vm413_vm2, %v11480_v12  ;;  %v11484_v12 = vld [vmem:[#allocation40_spill] sm:$0xff] }
 0x16c   : > { %7657 = vmatmul.mubr.msk.f32.gmra.mrb[10].mxu0 %vm413_vm2, %v9390_v38 }
 0x16d   : > { %7659 = vmatprep.mubr.msk.f32.mxu0 %vm413_vm2, %v11481_v1  ;;  %v11485_v1 = vld [vmem:[#allocation42_spill] sm:$0xff] }
 0x170   : > { %7660 = vmatmul.mubr.msk.f32.gmra.mrb[12].mxu0 %vm413_vm2, %v9403_v46 }
 0x171   : > { %7662 = vmatprep.mubr.msk.f32.mxu0 %vm413_vm2, %v11482_v37  ;;  %v11486_v37 = vld [vmem:[#allocation43_spill] sm:$0xff] }
 0x174   : > { %7663 = vmatmul.mubr.msk.f32.gmra.mrb[14].mxu0 %vm413_vm2, %v9416_v54 }
 0x175   : > { %7665 = vmatprep.mubr.msk.f32.mxu0 %vm413_vm2, %v11483_v4  ;;  %v11487_v4 = vld [vmem:[#allocation45_spill] sm:$0xff] }
 0x178   : > { %7666 = vmatmul.mubr.msk.f32.gmra.mrb[16].mxu0 %vm413_vm2, %v9429_v62 }
 0x179   : > { %7668 = vmatprep.mubr.msk.f32.mxu0 %vm413_vm2, %v11484_v12 }
 0x17c   : > { %7669 = vmatmul.mubr.msk.f32.gmra.mrb[18].mxu0 %vm413_vm2, %v9442_v11  ;;  %v1979_v11 = vrot.slane %v9581_v9, 2 }
 0x17d   : > { %7671 = vmatprep.mubr.msk.f32.mxu0 %vm413_vm2, %v11485_v1  ;;  %v1978_v1 = vrot.slane %v9574_v8, 2 }
 0x180   : > { %7672 = vmatmul.mubr.msk.f32.gmra.mrb[20].mxu0 %vm413_vm2, %v9455_v29 }
 0x181   : > { %7674 = vmatprep.mubr.msk.f32.mxu0 %vm413_vm2, %v11486_v37  ;;  %v9729_v37 = vsel %vm999_vm3, %v1978_v1, %v1979_v11 }
 0x184   : > { %7675 = vmatmul.mubr.msk.f32.gmra.mrb[22].mxu0 %vm413_vm2, %v9468_v52  ;;  %v1981_v52 = vrot.slane %v275_v10, 2  ;;  %v6451_v10 = vld [vmem:[%s11244_s1 + $0x20] sm:$0xf] }
 0x185   : > { %7677 = vmatprep.mubr.msk.f32.mxu0 %vm413_vm2, %v11487_v4 }
 0x188   : > { %7678 = vmatmul.mubr.msk.f32.gmra.mrb[24].mxu0 %vm413_vm2, %v9481_v18 }
 0x189   : > { %7680 = vmatprep.mubr.msk.f32.mxu0 %vm413_vm2, %v9485_v59  ;;  %v9736_v59 = vsel %vm999_vm3, %v1979_v11, %v1981_v52  ;;  %v11508_v11 = vld [vmem:[#allocation34_spill] sm:$0xff]  ;;  %v11509_v52 = vld [vmem:[#allocation35_spill] sm:$0xff] }
 0x18c   : > { %7681 = vmatmul.mubr.msk.f32.gmra.mrb[26].mxu0 %vm413_vm2, %v9494_v17 }
 0x18d   : > { %7683 = vmatprep.mubr.msk.f32.mxu0 %vm413_vm2, %v9498_v49 }
 0x190   : > { %7684 = vmatmul.mubr.msk.f32.gmra.mrb[28].mxu0 %vm413_vm2, %v9505_v2 }
 0x191   : > { %7686 = vmatprep.mubr.msk.f32.mxu0 %vm413_vm2, %v9729_v37 }
 0x194   : > { %7687 = vmatmul.mubr.msk.f32.gmra.mrb[30].mxu0 %vm413_vm2, %v9736_v59 }
 0x195   : > { %7691 = vmatprep.mubr.msk.f32.mxu0 %vm413_vm2, %v8899_v13  ;;  %v9804_v13 = vld [vmem:[%s8873_s27 + $0x198] sm:$0xff] }
 0x198   : > { %7692 = vmatmul.mubr.msk.f32.vlgmr.msra.gmra.mrb[0].mxu0 %vm413_vm2, %v8902_v14  ;;  %v9811_v14 = vld [vmem:[%s8873_s27 + $0x1a0] sm:$0xff] }
 0x199   : > { %7740 = vmatpush3.msk.msra.mxu0 %vm478_vm0, %v6417_v41  ;;  %7694 = vmatprep.mubr.msk.f32.mxu0 %vm413_vm2, %v8917_v22  ;;  %v11488_v22 = vld [vmem:[#allocation8_spill] sm:$0xff] }
 0x19a   : > { %7789 = vmatprep.subr.msk.mxu0 %vm478_vm0, %v6451_v10 }
 0x19c   : > { %7695 = vmatmul.mubr.msk.f32.gmra.mrb[2].mxu0 %vm413_vm2, %v8920_v23  ;;  %v11489_v23 = vld [vmem:[#allocation9_spill] sm:$0xff] }
 0x19d   : > { %7697 = vmatprep.mubr.msk.f32.mxu0 %vm413_vm2, %v8946_v31  ;;  %v11490_v31 = vld [vmem:[#allocation10_spill] sm:$0xff] }
 0x1a0   : > { %7698 = vmatmul.mubr.msk.f32.gmra.mrb[4].mxu0 %vm413_vm2, %v8949_v32  ;;  %v11491_v32 = vld [vmem:[#allocation11_spill] sm:$0xff] }
 0x1a1   : > { %7700 = vmatprep.mubr.msk.f32.mxu0 %vm413_vm2, %v8968_v39  ;;  %v11492_v39 = vld [vmem:[#allocation12_spill] sm:$0xff] }
 0x1a4   : > { %7701 = vmatmul.mubr.msk.f32.gmra.mrb[6].mxu0 %vm413_vm2, %v8971_v40  ;;  %v11493_v40 = vld [vmem:[#allocation13_spill] sm:$0xff] }
 0x1a5   : > { %7703 = vmatprep.mubr.msk.f32.mxu0 %vm413_vm2, %v8990_v47  ;;  %v11495_v47 = vld [vmem:[#allocation15_spill] sm:$0xff] }
 0x1a8   : > { %7704 = vmatmul.mubr.msk.f32.gmra.mrb[8].mxu0 %vm413_vm2, %v8993_v48  ;;  %v11496_v48 = vld [vmem:[#allocation16_spill] sm:$0xff] }
 0x1a9   : > { %7706 = vmatprep.mubr.msk.f32.mxu0 %vm413_vm2, %v9012_v55  ;;  %v11497_v55 = vld [vmem:[#allocation17_spill] sm:$0xff] }
 0x1ac   : > { %7707 = vmatmul.mubr.msk.f32.gmra.mrb[10].mxu0 %vm413_vm2, %v9015_v56  ;;  %v11498_v56 = vld [vmem:[#allocation19_spill] sm:$0xff] }
 0x1ad   : > { %7709 = vmatprep.mubr.msk.f32.mxu0 %vm413_vm2, %v9034_v63  ;;  %v11499_v63 = vld [vmem:[#allocation20_spill] sm:$0xff] }
 0x1b0   : > { %7710 = vmatmul.mubr.msk.f32.gmra.mrb[12].mxu0 %vm413_vm2, %v9037_v0  ;;  %v11500_v0 = vld [vmem:[#allocation21_spill] sm:$0xff] }
 0x1b1   : > { %7712 = vmatprep.mubr.msk.f32.mxu0 %vm413_vm2, %v9056_v15  ;;  %v11501_v15 = vld [vmem:[#allocation22_spill] sm:$0xff] }
 0x1b4   : > { %7713 = vmatmul.mubr.msk.f32.gmra.mrb[14].mxu0 %vm413_vm2, %v9059_v16  ;;  %v11502_v16 = vld [vmem:[#allocation23_spill] sm:$0xff] }
 0x1b5   : > { %7715 = vmatprep.mubr.msk.f32.mxu0 %vm413_vm2, %v9078_v34  ;;  %v11503_v34 = vld [vmem:[#allocation24_spill] sm:$0xff] }
 0x1b8   : > { %7716 = vmatmul.mubr.msk.f32.gmra.mrb[16].mxu0 %vm413_vm2, %v9081_v36  ;;  %v11504_v36 = vld [vmem:[#allocation25_spill] sm:$0xff] }
 0x1b9   : > { %7718 = vmatprep.mubr.msk.f32.mxu0 %vm413_vm2, %v9100_v53  ;;  %v11506_v53 = vld [vmem:[#allocation27_spill] sm:$0xff] }
 0x1bc   : > { %7719 = vmatmul.mubr.msk.f32.gmra.mrb[18].mxu0 %vm413_vm2, %v9103_v58  ;;  %v11507_v58 = vld [vmem:[#allocation29_spill] sm:$0xff] }
 0x1bd   : > { %7721 = vmatprep.mubr.msk.f32.mxu0 %vm413_vm2, %v9122_v26  ;;  %v278_v26 = vld [vmem:[%s8873_s27 + $0x1a8] sm:$0x3] }
 0x1c0   : > { %7722 = vmatmul.mubr.msk.f32.gmra.mrb[20].mxu0 %vm413_vm2, %v9125_v44  ;;  %v11505_v44 = vld [vmem:[#allocation26_spill] sm:$0xff] }
 0x1c1   : > { %7724 = vmatprep.mubr.msk.f32.mxu0 %vm413_vm2, %v9144_v60  ;;  %v2518_v60 = vrot.slane %v9804_v13, 1 }
 0x1c4   : > { %7725 = vmatmul.mubr.msk.f32.gmra.mrb[22].mxu0 %vm413_vm2, %v9147_v5  ;;  %v2519_v5 = vrot.slane %v9811_v14, 1 }
 0x1c5   : > { %7727 = vmatprep.mubr.msk.f32.mxu0 %vm413_vm2, %v9166_v28  ;;  %v2521_v28 = vrot.slane %v278_v26, 1 }
 0x1c8   : > { %7728 = vmatmul.mubr.msk.f32.gmra.mrb[24].mxu0 %vm413_vm2, %v9169_v45  ;;  %v2520_v45 = vsel %vm330_vm1, %v2518_v60, %v2519_v5  ;;  %v10036_v60 = vld [vmem:[%s11245_s2] ss:$0 sm:$0xff] }
 0x1c9   : > { %7730 = vmatprep.mubr.msk.f32.mxu0 %vm413_vm2, %v9188_v43  ;;  %v11494_v43 = vld [vmem:[#allocation14_spill] sm:$0xff] }
 0x1cc   : > { %7731 = vmatmul.mubr.msk.f32.gmra.mrb[26].mxu0 %vm413_vm2, %v9191_v50  ;;  %v2522_v50 = vsel %vm330_vm1, %v2519_v5, %v2521_v28 }
 0x1cd   : > { %7733 = vmatprep.mubr.msk.f32.mxu0 %vm413_vm2, %v9574_v8  ;;  %v2790_v8 = vrot.slane %v9811_v14, 2 }
 0x1d0   : > { %7734 = vmatmul.mubr.msk.f32.gmra.mrb[28].mxu0 %vm413_vm2, %v9581_v9 }
 0x1d1   : > { %7736 = vmatprep.mubr.msk.f32.mxu0 %vm413_vm2, %v9804_v13 }
 0x1d4   : > { %7737 = vmatmul.mubr.msk.f32.gmra.mrb[30].mxu0 %vm413_vm2, %v9811_v14  ;;  %v10029_v14 = vld [vmem:[%s11246_s3 + $0x8] sm:$0xf] }
 0x1d5   : > { %7741 = vmatprep.mubr.msk.f32.mxu0 %vm413_vm2, %v8936_v27 }
 0x1d8   : > { %7742 = vmatmul.mubr.msk.f32.vlgmr.msra.gmra.mrb[0].mxu0 %vm413_vm2, %v8956_v33 }
 0x1d9   : > { %7790 = vmatpush3.msk.msra.mxu0 %vm478_vm0, %v6451_v10  ;;  %7744 = vmatprep.mubr.msk.f32.mxu0 %vm413_vm2, %v11452_v24 }
 0x1dc   : > { %7745 = vmatmul.mubr.msk.f32.gmra.mrb[2].mxu0 %vm413_vm2, %v11488_v22 }
 0x1dd   : > { %7747 = vmatprep.mubr.msk.f32.mxu0 %vm413_vm2, %v11489_v23 }
 0x1e0   : > { %7748 = vmatmul.mubr.msk.f32.gmra.mrb[4].mxu0 %vm413_vm2, %v11490_v31 }
 0x1e1   : > { %7750 = vmatprep.mubr.msk.f32.mxu0 %vm413_vm2, %v11491_v32 }
 0x1e4   : > { %7751 = vmatmul.mubr.msk.f32.gmra.mrb[6].mxu0 %vm413_vm2, %v11492_v39 }
 0x1e5   : > { %7753 = vmatprep.mubr.msk.f32.mxu0 %vm413_vm2, %v11493_v40 }
 0x1e8   : > { %7754 = vmatmul.mubr.msk.f32.gmra.mrb[8].mxu0 %vm413_vm2, %v11494_v43 }
 0x1e9   : > { %7756 = vmatprep.mubr.msk.f32.mxu0 %vm413_vm2, %v11495_v47 }
 0x1ec   : > { %7757 = vmatmul.mubr.msk.f32.gmra.mrb[10].mxu0 %vm413_vm2, %v11496_v48 }
 0x1ed   : > { %7759 = vmatprep.mubr.msk.f32.mxu0 %vm413_vm2, %v11497_v55 }
 0x1f0   : > { %7760 = vmatmul.mubr.msk.f32.gmra.mrb[12].mxu0 %vm413_vm2, %v11463_v19 }
 0x1f1   : > { %7762 = vmatprep.mubr.msk.f32.mxu0 %vm413_vm2, %v11498_v56 }
 0x1f4   : > { %7763 = vmatmul.mubr.msk.f32.gmra.mrb[14].mxu0 %vm413_vm2, %v11499_v63 }
 0x1f5   : > { %7765 = vmatprep.mubr.msk.f32.mxu0 %vm413_vm2, %v11500_v0 }
 0x1f8   : > { %7766 = vmatmul.mubr.msk.f32.gmra.mrb[16].mxu0 %vm413_vm2, %v11501_v15 }
 0x1f9   : > { %7768 = vmatprep.mubr.msk.f32.mxu0 %vm413_vm2, %v11502_v16 }
 0x1fc   : > { %7769 = vmatmul.mubr.msk.f32.gmra.mrb[18].mxu0 %vm413_vm2, %v11503_v34 }
 0x1fd   : > { %7771 = vmatprep.mubr.msk.f32.mxu0 %vm413_vm2, %v11504_v36 }
 0x200   : > { %7772 = vmatmul.mubr.msk.f32.gmra.mrb[20].mxu0 %vm413_vm2, %v11505_v44 }
 0x201   : > { %7774 = vmatprep.mubr.msk.f32.mxu0 %vm413_vm2, %v11506_v53 }
 0x204   : > { %7775 = vmatmul.mubr.msk.f32.gmra.mrb[22].mxu0 %vm413_vm2, %v9198_v21 }
 0x205   : > { %7777 = vmatprep.mubr.msk.f32.mxu0 %vm413_vm2, %v11507_v58 }
 0x208   : > { %7778 = vmatmul.mubr.msk.f32.gmra.mrb[24].mxu0 %vm413_vm2, %v11472_v20 }
 0x209   : > { %7780 = vmatprep.mubr.msk.f32.mxu0 %vm413_vm2, %v11473_v6 }
 0x20c   : > { %7781 = vmatmul.mubr.msk.f32.gmra.mrb[26].mxu0 %vm413_vm2, %v11475_v35 }
 0x20d   : > { %7783 = vmatprep.mubr.msk.f32.mxu0 %vm413_vm2, %v9652_v51 }
 0x210   : > { %7784 = vmatmul.mubr.msk.f32.gmra.mrb[28].mxu0 %vm413_vm2, %v9659_v61 }
 0x211   : > { %7786 = vmatprep.mubr.msk.f32.mxu0 %vm413_vm2, %v2520_v45 }
 0x214   : > { %7787 = vmatmul.mubr.msk.f32.gmra.mrb[30].mxu0 %vm413_vm2, %v2522_v50 }
 0x215   : > { %7791 = vmatprep.mubr.msk.f32.mxu0 %vm413_vm2, %v9327_v7  ;;  %v11510_v7 = vld [vmem:[#allocation36_spill] sm:$0xff] }
 0x218   : > { %7792 = vmatmul.mubr.msk.f32.vlgmr.msra.gmra.mrb[0].mxu0 %vm413_vm2, %v9338_v42  ;;  %v11511_v42 = vld [vmem:[#allocation37_spill] sm:$0xff] }
 0x219   : > { %7794 = vmatprep.mubr.msk.f32.mxu0 %vm413_vm2, %v11477_v25 }
 0x21c   : > { %7795 = vmatmul.mubr.msk.f32.gmra.mrb[2].mxu0 %vm413_vm2, %v9351_v3  ;;  %v11512_v3 = vld [vmem:[#allocation38_spill] sm:$0xff] }
 0x21d   : > { %7797 = vmatprep.mubr.msk.f32.mxu0 %vm413_vm2, %v11508_v11 }
 0x220   : > { %7798 = vmatmul.mubr.msk.f32.gmra.mrb[4].mxu0 %vm413_vm2, %v9364_v57  ;;  %v11513_v57 = vld [vmem:[#allocation39_spill] sm:$0xff] }
 0x221   : > { %7800 = vmatprep.mubr.msk.f32.mxu0 %vm413_vm2, %v11509_v52 }
 0x224   : > { %7801 = vmatmul.mubr.msk.f32.gmra.mrb[6].mxu0 %vm413_vm2, %v9377_v30  ;;  %v11514_v30 = vld [vmem:[#allocation41_spill] sm:$0xff] }
 0x225   : > { %7803 = vmatprep.mubr.msk.f32.mxu0 %vm413_vm2, %v11510_v7 }
 0x228   : > { %7804 = vmatmul.mubr.msk.f32.gmra.mrb[8].mxu0 %vm413_vm2, %v9390_v38  ;;  %v11515_v38 = vld [vmem:[#allocation42_spill] sm:$0xff] }
 0x229   : > { %7806 = vmatprep.mubr.msk.f32.mxu0 %vm413_vm2, %v11511_v42 }
 0x22c   : > { %7807 = vmatmul.mubr.msk.f32.gmra.mrb[10].mxu0 %vm413_vm2, %v9403_v46  ;;  %v11516_v46 = vld [vmem:[#allocation43_spill] sm:$0xff] }
 0x22d   : > { %7809 = vmatprep.mubr.msk.f32.mxu0 %vm413_vm2, %v11512_v3 }
 0x230   : > { %7810 = vmatmul.mubr.msk.f32.gmra.mrb[12].mxu0 %vm413_vm2, %v9416_v54  ;;  %v11517_v54 = vld [vmem:[#allocation44_spill] sm:$0xff] }
 0x231   : > { %7812 = vmatprep.mubr.msk.f32.mxu0 %vm413_vm2, %v11513_v57 }
 0x234   : > { %7813 = vmatmul.mubr.msk.f32.gmra.mrb[14].mxu0 %vm413_vm2, %v9429_v62  ;;  %v11518_v62 = vld [vmem:[#allocation46_spill] sm:$0xff] }
 0x235   : > { %7815 = vmatprep.mubr.msk.f32.mxu0 %vm413_vm2, %v11484_v12 }
 0x238   : > { %7816 = vmatmul.mubr.msk.f32.gmra.mrb[16].mxu0 %vm413_vm2, %v11514_v30 }
 0x239   : > { %7818 = vmatprep.mubr.msk.f32.mxu0 %vm413_vm2, %v11515_v38 }
 0x23c   : > { %7819 = vmatmul.mubr.msk.f32.gmra.mrb[18].mxu0 %vm413_vm2, %v9455_v29  ;;  %v2789_v29 = vrot.slane %v9804_v13, 2  ;;  %v3272_v13 = vld [vmem:[%s11246_s3] sm:$0xf] }
 0x23d   : > { %7821 = vmatprep.mubr.msk.f32.mxu0 %vm413_vm2, %v11516_v46 }
 0x23e   : > { %v2791_v9 = vsel %vm999_vm3, %v2789_v29, %v2790_v8 }
 0x240   : > { %7822 = vmatmul.mubr.msk.f32.gmra.mrb[20].mxu0 %vm413_vm2, %v11517_v54 }
 0x241   : > { %7824 = vmatprep.mubr.msk.f32.mxu0 %vm413_vm2, %v11487_v4  ;;  %v6486_v4 = vld [vmem:[%s11246_s3 + $0x4] sm:$0xf] }
 0x242   : > { %7839 = vmatprep.subr.msk.mxu1 %vm478_vm0, %v6486_v4 }
 0x243   : > { %7840 = vmatpush3.msk.msra.mxu1 %vm478_vm0, %v6486_v4 }
 0x244   : > { %7825 = vmatmul.mubr.msk.f32.gmra.mrb[22].mxu0 %vm413_vm2, %v9481_v18  ;;  %v2792_v18 = vrot.slane %v278_v26, 2  ;;  %7889 = vmatprep.subr.msk.mxu1 %vm478_vm0, %v3272_v13 }
 0x245   : > { %7827 = vmatprep.mubr.msk.f32.mxu0 %vm413_vm2, %v11518_v62 }
 0x248   : > { %7828 = vmatmul.mubr.msk.f32.gmra.mrb[24].mxu0 %vm413_vm2, %v9494_v17  ;;  %v2793_v17 = vsel %vm999_vm3, %v2790_v8, %v2792_v18 }
 0x249   : > { %7830 = vmatprep.mubr.msk.f32.mxu0 %vm413_vm2, %v9498_v49  ;;  %v8819_v49 = vmov 0.0  }
 0x24a   : > { %3135 = vst.msk [vmem:[#allocation2 + $0x20] sm:$0xff] %vm413_vm2, %v8819_v49  ;;  %3130 = vst.msk [vmem:[#allocation2] sm:$0xff] %vm413_vm2, %v8819_v49 }
 0x24b   : > { %3131 = vst.msk [vmem:[#allocation2 + $0x8] sm:$0xff] %vm413_vm2, %v8819_v49  ;;  %3134 = vst.msk [vmem:[#allocation2 + $0x18] sm:$0xff] %vm413_vm2, %v8819_v49 }
 0x24c   : > { %7831 = vmatmul.mubr.msk.f32.gmra.mrb[26].mxu0 %vm413_vm2, %v9505_v2  ;;  %3137 = vst.msk [vmem:[#allocation2 + $0x30] sm:$0xff] %vm413_vm2, %v8819_v49  ;;  %3138 = vst.msk [vmem:[#allocation2 + $0x38] sm:$0xff] %vm413_vm2, %v8819_v49 }
 0x24d   : > { %7833 = vmatprep.mubr.msk.f32.mxu0 %vm413_vm2, %v9729_v37  ;;  %3140 = vst.msk [vmem:[#allocation2 + $0x48] sm:$0xff] %vm413_vm2, %v8819_v49  ;;  %3141 = vst.msk [vmem:[#allocation2 + $0x50] sm:$0xff] %vm413_vm2, %v8819_v49 }
 0x24e   : > { %3143 = vst.msk [vmem:[#allocation2 + $0x60] sm:$0xff] %vm413_vm2, %v8819_v49  ;;  %3144 = vst.msk [vmem:[#allocation2 + $0x68] sm:$0xff] %vm413_vm2, %v8819_v49 }
 0x24f   : > { %3146 = vst.msk [vmem:[#allocation2 + $0x78] sm:$0xff] %vm413_vm2, %v8819_v49  ;;  %3147 = vst.msk [vmem:[#allocation2 + $0x80] sm:$0xff] %vm413_vm2, %v8819_v49 }
 0x250   : > { %7834 = vmatmul.mubr.msk.f32.gmra.mrb[28].mxu0 %vm413_vm2, %v9736_v59  ;;  %3149 = vst.msk [vmem:[#allocation2 + $0x90] sm:$0xff] %vm413_vm2, %v8819_v49  ;;  %3150 = vst.msk [vmem:[#allocation2 + $0x98] sm:$0xff] %vm413_vm2, %v8819_v49 }
 0x251   : > { %7836 = vmatprep.mubr.msk.f32.mxu0 %vm413_vm2, %v2791_v9  ;;  %3152 = vst.msk [vmem:[#allocation2 + $0xa8] sm:$0xff] %vm413_vm2, %v8819_v49  ;;  %3153 = vst.msk [vmem:[#allocation2 + $0xb0] sm:$0xff] %vm413_vm2, %v8819_v49  ;;  %v10003_v59 = vld [vmem:[#allocation2] sm:$0xff] }
 0x252   : > { %3155 = vst.msk [vmem:[#allocation2 + $0xc0] sm:$0xff] %vm413_vm2, %v8819_v49  ;;  %3156 = vst.msk [vmem:[#allocation2 + $0xc8] sm:$0xff] %vm413_vm2, %v8819_v49  ;;  %v10005_v2 = vld [vmem:[#allocation2 + $0x8] sm:$0xff]  ;;  %v3321_v41 = vrot.slane %v10003_v59, 1 }
 0x253   : > { %3158 = vst.msk [vmem:[#allocation2 + $0xd8] sm:$0xff] %vm413_vm2, %v8819_v49  ;;  %3159 = vst.msk [vmem:[#allocation2 + $0xe0] sm:$0xff] %vm413_vm2, %v8819_v49  ;;  %v3322_v25 = vrot.slane %v10005_v2, 1 }
 0x254   : > { %7837 = vmatmul.mubr.msk.f32.gmra.mrb[30].mxu0 %vm413_vm2, %v2793_v17  ;;  %3161 = vst.msk [vmem:[#allocation2 + $0xf0] sm:$0xff] %vm413_vm2, %v8819_v49  ;;  %3162 = vst.msk [vmem:[#allocation2 + $0xf8] sm:$0xff] %vm413_vm2, %v8819_v49 }
 0x255   : > { %3164 = vst.msk [vmem:[#allocation2 + $0x108] sm:$0xff] %vm413_vm2, %v8819_v49  ;;  %3165 = vst.msk [vmem:[#allocation2 + $0x110] sm:$0xff] %vm413_vm2, %v8819_v49  ;;  %v3323_v1 = vsel %vm330_vm1, %v3321_v41, %v3322_v25 }
 0x256   : > { %3167 = vst.msk [vmem:[#allocation2 + $0x120] sm:$0xff] %vm413_vm2, %v8819_v49  ;;  %3168 = vst.msk [vmem:[#allocation2 + $0x128] sm:$0xff] %vm413_vm2, %v8819_v49  ;;  %7841 = vmatprep.mubr.msk.f32.mxu1 %vm413_vm2, %v3323_v1 }
 0x257   : > { %3170 = vst.msk [vmem:[#allocation2 + $0x138] sm:$0xff] %vm413_vm2, %v8819_v49  ;;  %3171 = vst.msk [vmem:[#allocation2 + $0x140] sm:$0xff] %vm413_vm2, %v8819_v49 }
 0x258   : > { %3173 = vst.msk [vmem:[#allocation2 + $0x150] sm:$0xff] %vm413_vm2, %v8819_v49  ;;  %3174 = vst.msk [vmem:[#allocation2 + $0x158] sm:$0xff] %vm413_vm2, %v8819_v49 }
 0x259   : > { %3176 = vst.msk [vmem:[#allocation2 + $0x168] sm:$0xff] %vm413_vm2, %v8819_v49  ;;  %3177 = vst.msk [vmem:[#allocation2 + $0x170] sm:$0xff] %vm413_vm2, %v8819_v49 }
 0x25a   : > { %3179 = vst.msk [vmem:[#allocation2 + $0x180] sm:$0xff] %vm413_vm2, %v8819_v49  ;;  %3180 = vst.msk [vmem:[#allocation2 + $0x188] sm:$0xff] %vm413_vm2, %v8819_v49 }
 0x25b   : > { %3182 = vst.msk [vmem:[#allocation2 + $0x198] sm:$0xff] %vm413_vm2, %v8819_v49  ;;  %3183 = vst.msk [vmem:[#allocation2 + $0x1a0] sm:$0xff] %vm413_vm2, %v8819_v49 }
 0x25c   : > { %3136 = vst.msk [vmem:[#allocation2 + $0x28] sm:$0x3] %vm3132_vm4, %v8819_v49  ;;  %3133 = vst.msk [vmem:[#allocation2 + $0x10] sm:$0x3] %vm3132_vm4, %v8819_v49 }
 0x25d   : > { %3139 = vst.msk [vmem:[#allocation2 + $0x40] sm:$0x3] %vm3132_vm4, %v8819_v49  ;;  %3142 = vst.msk [vmem:[#allocation2 + $0x58] sm:$0x3] %vm3132_vm4, %v8819_v49 }
 0x25e   : > { %3145 = vst.msk [vmem:[#allocation2 + $0x70] sm:$0x3] %vm3132_vm4, %v8819_v49  ;;  %3148 = vst.msk [vmem:[#allocation2 + $0x88] sm:$0x3] %vm3132_vm4, %v8819_v49 }
 0x25f   : > { %3151 = vst.msk [vmem:[#allocation2 + $0xa0] sm:$0x3] %vm3132_vm4, %v8819_v49  ;;  %3154 = vst.msk [vmem:[#allocation2 + $0xb8] sm:$0x3] %vm3132_vm4, %v8819_v49 }
 0x260   : > { %3157 = vst.msk [vmem:[#allocation2 + $0xd0] sm:$0x3] %vm3132_vm4, %v8819_v49  ;;  %3160 = vst.msk [vmem:[#allocation2 + $0xe8] sm:$0x3] %vm3132_vm4, %v8819_v49 }
 0x261   : > { %3163 = vst.msk [vmem:[#allocation2 + $0x100] sm:$0x3] %vm3132_vm4, %v8819_v49  ;;  %3166 = vst.msk [vmem:[#allocation2 + $0x118] sm:$0x3] %vm3132_vm4, %v8819_v49 }
 0x262   : > { %3169 = vst.msk [vmem:[#allocation2 + $0x130] sm:$0x3] %vm3132_vm4, %v8819_v49  ;;  %3172 = vst.msk [vmem:[#allocation2 + $0x148] sm:$0x3] %vm3132_vm4, %v8819_v49 }
 0x263   : > { %3175 = vst.msk [vmem:[#allocation2 + $0x160] sm:$0x3] %vm3132_vm4, %v8819_v49  ;;  %3178 = vst.msk [vmem:[#allocation2 + $0x178] sm:$0x3] %vm3132_vm4, %v8819_v49  ;;  %v10009_v37 = vld [vmem:[#allocation2 + $0x10] sm:$0x3] }
 0x264   : > { %3181 = vst.msk [vmem:[#allocation2 + $0x190] sm:$0x3] %vm3132_vm4, %v8819_v49  ;;  %3184 = vst.msk [vmem:[#allocation2 + $0x1a8] sm:$0x3] %vm3132_vm4, %v8819_v49  ;;  %v3324_v12 = vrot.slane %v10009_v37, 1 }
 0x266   : > { %v3325_v10 = vsel %vm330_vm1, %v3322_v25, %v3324_v12 }
 0x267   : > { %7842 = vmatmul.mubr.msk.f32.vlgmr.msra.gmra.mrb[0].mxu1 %vm413_vm2, %v3325_v10 }
 0x268   : > { %7890 = vmatpush3.msk.msra.mxu1 %vm478_vm0, %v3272_v13 }
 0x269   : > { %7939 = vmatprep.subr.msk.mxu1 %vm478_vm0, %v10029_v14 }
 0x2eb   : > { %v7793_v5 = vpop.f32.mrb[0].mxu0 }
 0x2ec   : > { %v3067_v26 = vadd.f32 %v7793_v5, %v10036_v60  ;;  %v2869_v28 = vpop.f32.mrb[1].mxu0 }
 0x2ed   : > { %v3066_v45 = vadd.f32 %v10036_v60, %v2869_v28 }
 0x2ee   : > { %v3099_v50 = vmax.f32 %v3067_v26, 0.0 }
 0x2ef   : > { %v3098_v11 = vmax.f32 %v3066_v45, 0.0  ;;  %v7796_v52 = vpop.f32.mrb[2].mxu0 }
 0x2f0   : > { %3187 = vst.msk [vmem:[#allocation2 + $0x21] sm:$0xff] %vm413_vm2, %v3099_v50  ;;  %v3069_v7 = vadd.f32 %v7796_v52, %v10036_v60  ;;  %v2879_v42 = vpop.f32.mrb[3].mxu0 }
 0x2f1   : > { %3186 = vst.msk [vmem:[#allocation2 + $0x19] sm:$0xff] %vm413_vm2, %v3098_v11  ;;  %v3068_v3 = vadd.f32 %v10036_v60, %v2879_v42 }
 0x2f2   : > { %v3101_v57 = vmax.f32 %v3069_v7, 0.0 }
 0x2f3   : > { %v3100_v30 = vmax.f32 %v3068_v3, 0.0  ;;  %v7799_v38 = vpop.f32.mrb[4].mxu0 }
 0x2f4   : > { %3189 = vst.msk [vmem:[#allocation2 + $0x39] sm:$0xff] %vm413_vm2, %v3101_v57  ;;  %v3071_v46 = vadd.f32 %v7799_v38, %v10036_v60  ;;  %v2889_v54 = vpop.f32.mrb[5].mxu0 }
 0x2f5   : > { %3188 = vst.msk [vmem:[#allocation2 + $0x31] sm:$0xff] %vm413_vm2, %v3100_v30  ;;  %v3070_v62 = vadd.f32 %v10036_v60, %v2889_v54 }
 0x2f6   : > { %v3103_v29 = vmax.f32 %v3071_v46, 0.0 }
 0x2f7   : > { %v3102_v8 = vmax.f32 %v3070_v62, 0.0  ;;  %v7802_v18 = vpop.f32.mrb[6].mxu0  ;;  %v10048_v9 = vld [vmem:[#allocation2 + $0x28] sm:$0x3] }
 0x2f8   : > { %3191 = vst.msk [vmem:[#allocation2 + $0x51] sm:$0xff] %vm413_vm2, %v3103_v29  ;;  %v3073_v17 = vadd.f32 %v7802_v18, %v10036_v60  ;;  %v2899_v49 = vpop.f32.mrb[7].mxu0  ;;  %v10052_v41 = vld [vmem:[#allocation2 + $0x18] sm:$0xff]  ;;  %v10054_v25 = vld [vmem:[#allocation2 + $0x20] sm:$0xff]  ;;  %v3329_v4 = vrot.slane %v10048_v9, 1 }
 0x2f9   : > { %3190 = vst.msk [vmem:[#allocation2 + $0x49] sm:$0xff] %vm413_vm2, %v3102_v8  ;;  %v3072_v12 = vadd.f32 %v10036_v60, %v2899_v49  ;;  %v3326_v1 = vrot.slane %v10052_v41, 1  ;;  %v3327_v10 = vrot.slane %v10054_v25, 1 }
 0x2fa   : > { %v3105_v13 = vmax.f32 %v3073_v17, 0.0 }
 0x2fb   : > { %v3104_v5 = vmax.f32 %v3072_v12, 0.0  ;;  %v7805_v26 = vpop.f32.mrb[8].mxu0  ;;  %v10062_v28 = vsel %vm330_vm1, %v3326_v1, %v3327_v10  ;;  %v10065_v45 = vsel %vm330_vm1, %v3327_v10, %v3329_v4  ;;  %v10067_v50 = vld [vmem:[#allocation2 + $0x40] sm:$0x3] }
 0x2fc   : > { %3193 = vst.msk [vmem:[#allocation2 + $0x69] sm:$0xff] %vm413_vm2, %v3105_v13  ;;  %v3075_v11 = vadd.f32 %v7805_v26, %v10036_v60  ;;  %v2909_v52 = vpop.f32.mrb[9].mxu0  ;;  %7844 = vmatprep.mubr.msk.f32.mxu1 %vm413_vm2, %v10062_v28  ;;  %v10073_v7 = vld [vmem:[#allocation2 + $0x30] sm:$0xff]  ;;  %v10075_v42 = vld [vmem:[#allocation2 + $0x38] sm:$0xff]  ;;  %v3334_v3 = vrot.slane %v10067_v50, 1 }
 0x2fd   : > { %3192 = vst.msk [vmem:[#allocation2 + $0x61] sm:$0xff] %vm413_vm2, %v3104_v5  ;;  %v3074_v57 = vadd.f32 %v10036_v60, %v2909_v52  ;;  %7845 = vmatmul.mubr.msk.f32.gmra.mrb[2].mxu1 %vm413_vm2, %v10065_v45  ;;  %v3331_v30 = vrot.slane %v10073_v7, 1  ;;  %v3332_v38 = vrot.slane %v10075_v42, 1 }
 0x2fe   : > { %v3107_v46 = vmax.f32 %v3075_v11, 0.0 }
 0x2ff   : > { %v3106_v54 = vmax.f32 %v3074_v57, 0.0  ;;  %v7808_v62 = vpop.f32.mrb[10].mxu0  ;;  %v10085_v29 = vsel %vm330_vm1, %v3331_v30, %v3332_v38  ;;  %v10088_v8 = vsel %vm330_vm1, %v3332_v38, %v3334_v3  ;;  %v10090_v18 = vld [vmem:[#allocation2 + $0x58] sm:$0x3] }
 0x300   : > { %3195 = vst.msk [vmem:[#allocation2 + $0x81] sm:$0xff] %vm413_vm2, %v3107_v46  ;;  %v3077_v17 = vadd.f32 %v7808_v62, %v10036_v60  ;;  %v2919_v49 = vpop.f32.mrb[11].mxu0  ;;  %7847 = vmatprep.mubr.msk.f32.mxu1 %vm413_vm2, %v10085_v29  ;;  %v10096_v4 = vld [vmem:[#allocation2 + $0x48] sm:$0xff]  ;;  %v10098_v12 = vld [vmem:[#allocation2 + $0x50] sm:$0xff]  ;;  %v3339_v1 = vrot.slane %v10090_v18, 1 }
 0x301   : > { %3194 = vst.msk [vmem:[#allocation2 + $0x79] sm:$0xff] %vm413_vm2, %v3106_v54  ;;  %v3076_v10 = vadd.f32 %v10036_v60, %v2919_v49  ;;  %7848 = vmatmul.mubr.msk.f32.gmra.mrb[4].mxu1 %vm413_vm2, %v10088_v8  ;;  %v3336_v13 = vrot.slane %v10096_v4, 1  ;;  %v3337_v5 = vrot.slane %v10098_v12, 1 }
 0x302   : > { %v3109_v26 = vmax.f32 %v3077_v17, 0.0 }
 0x303   : > { %v3108_v11 = vmax.f32 %v3076_v10, 0.0  ;;  %v7811_v52 = vpop.f32.mrb[12].mxu0  ;;  %v10108_v3 = vsel %vm330_vm1, %v3336_v13, %v3337_v5  ;;  %v10111_v57 = vsel %vm330_vm1, %v3337_v5, %v3339_v1  ;;  %v10113_v30 = vld [vmem:[#allocation2 + $0x70] sm:$0x3] }
 0x304   : > { %3197 = vst.msk [vmem:[#allocation2 + $0x99] sm:$0xff] %vm413_vm2, %v3109_v26  ;;  %v3079_v38 = vadd.f32 %v7811_v52, %v10036_v60  ;;  %v2929_v46 = vpop.f32.mrb[13].mxu0  ;;  %7850 = vmatprep.mubr.msk.f32.mxu1 %vm413_vm2, %v10108_v3  ;;  %v10119_v54 = vld [vmem:[#allocation2 + $0x60] sm:$0xff]  ;;  %v10121_v62 = vld [vmem:[#allocation2 + $0x68] sm:$0xff]  ;;  %v3344_v17 = vrot.slane %v10113_v30, 1 }
 0x305   : > { %3196 = vst.msk [vmem:[#allocation2 + $0x91] sm:$0xff] %vm413_vm2, %v3108_v11  ;;  %v3078_v49 = vadd.f32 %v10036_v60, %v2929_v46  ;;  %7851 = vmatmul.mubr.msk.f32.gmra.mrb[6].mxu1 %vm413_vm2, %v10111_v57  ;;  %v3341_v1 = vrot.slane %v10119_v54, 1  ;;  %v3342_v10 = vrot.slane %v10121_v62, 1 }
 0x306   : > { %v3111_v13 = vmax.f32 %v3079_v38, 0.0 }
 0x307   : > { %v3110_v5 = vmax.f32 %v3078_v49, 0.0  ;;  %v7814_v26 = vpop.f32.mrb[14].mxu0  ;;  %v10131_v52 = vsel %vm330_vm1, %v3341_v1, %v3342_v10  ;;  %v10134_v51 = vsel %vm330_vm1, %v3342_v10, %v3344_v17  ;;  %v10136_v61 = vld [vmem:[#allocation2 + $0x88] sm:$0x3] }
 0x308   : > { %11519 = vst [vmem:[#allocation33_spill] sm:$0xff] %v10131_v52  ;;  %11520 = vst [vmem:[#allocation40_spill] sm:$0xff] %v10134_v51  ;;  %v3081_v11 = vadd.f32 %v7814_v26, %v10036_v60  ;;  %v2939_v46 = vpop.f32.mrb[15].mxu0  ;;  %7853 = vmatprep.mubr.msk.f32.mxu1 %vm413_vm2, %v10131_v52  ;;  %v10142_v6 = vld [vmem:[#allocation2 + $0x78] sm:$0xff]  ;;  %v10144_v38 = vld [vmem:[#allocation2 + $0x80] sm:$0xff]  ;;  %v3349_v49 = vrot.slane %v10136_v61, 1 }
 0x309   : > { %3199 = vst.msk [vmem:[#allocation2 + $0xb1] sm:$0xff] %vm413_vm2, %v3111_v13  ;;  %3198 = vst.msk [vmem:[#allocation2 + $0xa9] sm:$0xff] %vm413_vm2, %v3110_v5  ;;  %v3080_v17 = vadd.f32 %v10036_v60, %v2939_v46  ;;  %7854 = vmatmul.mubr.msk.f32.gmra.mrb[8].mxu1 %vm413_vm2, %v10134_v51  ;;  %v3346_v1 = vrot.slane %v10142_v6, 1  ;;  %v3347_v10 = vrot.slane %v10144_v38, 1 }
 0x30a   : > { %v3113_v13 = vmax.f32 %v3081_v11, 0.0 }
 0x30b   : > { %v3112_v26 = vmax.f32 %v3080_v17, 0.0  ;;  %v7817_v35 = vpop.f32.mrb[16].mxu0  ;;  %v10154_v58 = vsel %vm330_vm1, %v3346_v1, %v3347_v10  ;;  %v10157_v20 = vsel %vm330_vm1, %v3347_v10, %v3349_v49  ;;  %v10159_v53 = vld [vmem:[#allocation2 + $0xa0] sm:$0x3] }
 0x30c   : > { %11521 = vst [vmem:[#allocation45_spill] sm:$0xff] %v10154_v58  ;;  %11522 = vst [vmem:[#allocation34_spill] sm:$0xff] %v10157_v20  ;;  %v3083_v5 = vadd.f32 %v7817_v35, %v10036_v60  ;;  %v2949_v46 = vpop.f32.mrb[17].mxu0  ;;  %7856 = vmatprep.mubr.msk.f32.mxu1 %vm413_vm2, %v10154_v58  ;;  %v10165_v21 = vld [vmem:[#allocation2 + $0x90] sm:$0xff]  ;;  %v10167_v11 = vld [vmem:[#allocation2 + $0x98] sm:$0xff]  ;;  %v3354_v17 = vrot.slane %v10159_v53, 1 }
 0x30d   : > { %3201 = vst.msk [vmem:[#allocation2 + $0xc9] sm:$0xff] %vm413_vm2, %v3113_v13  ;;  %3200 = vst.msk [vmem:[#allocation2 + $0xc1] sm:$0xff] %vm413_vm2, %v3112_v26  ;;  %v3082_v49 = vadd.f32 %v10036_v60, %v2949_v46  ;;  %7857 = vmatmul.mubr.msk.f32.gmra.mrb[10].mxu1 %vm413_vm2, %v10157_v20  ;;  %v3351_v1 = vrot.slane %v10165_v21, 1  ;;  %v3352_v35 = vrot.slane %v10167_v11, 1 }
 0x30e   : > { %v3115_v10 = vmax.f32 %v3083_v5, 0.0 }
 0x30f   : > { %v3114_v13 = vmax.f32 %v3082_v49, 0.0  ;;  %v7820_v36 = vpop.f32.mrb[18].mxu0  ;;  %v10177_v44 = vsel %vm330_vm1, %v3351_v1, %v3352_v35  ;;  %v10180_v16 = vsel %vm330_vm1, %v3352_v35, %v3354_v17 }
 0x310   : > { %11523 = vst [vmem:[#allocation35_spill] sm:$0xff] %v10177_v44  ;;  %11524 = vst [vmem:[#allocation36_spill] sm:$0xff] %v10180_v16  ;;  %v10182_v34 = vld [vmem:[#allocation2 + $0xb8] sm:$0x3]  ;;  %v3085_v26 = vadd.f32 %v7820_v36, %v10036_v60  ;;  %v2959_v46 = vpop.f32.mrb[19].mxu0  ;;  %7859 = vmatprep.mubr.msk.f32.mxu1 %vm413_vm2, %v10177_v44  ;;  %v10188_v0 = vld [vmem:[#allocation2 + $0xa8] sm:$0xff] }
 0x311   : > { %3203 = vst.msk [vmem:[#allocation2 + $0xe1] sm:$0xff] %vm413_vm2, %v3115_v10  ;;  %v10190_v5 = vld [vmem:[#allocation2 + $0xb0] sm:$0xff]  ;;  %v3359_v49 = vrot.slane %v10182_v34, 1  ;;  %3202 = vst.msk [vmem:[#allocation2 + $0xd9] sm:$0xff] %vm413_vm2, %v3114_v13  ;;  %v3084_v17 = vadd.f32 %v10036_v60, %v2959_v46  ;;  %7860 = vmatmul.mubr.msk.f32.gmra.mrb[12].mxu1 %vm413_vm2, %v10180_v16  ;;  %v3356_v1 = vrot.slane %v10188_v0, 1 }
 0x312   : > { %v3357_v36 = vrot.slane %v10190_v5, 1  ;;  %v3117_v35 = vmax.f32 %v3085_v26, 0.0 }
 0x313   : > { %v3116_v10 = vmax.f32 %v3084_v17, 0.0  ;;  %v7823_v15 = vpop.f32.mrb[20].mxu0 }
 0x314   : > { %v10200_v56 = vsel %vm330_vm1, %v3356_v1, %v3357_v36  ;;  %v10203_v63 = vsel %vm330_vm1, %v3357_v36, %v3359_v49  ;;  %v10205_v55 = vld [vmem:[#allocation2 + $0xd0] sm:$0x3]  ;;  %3205 = vst.msk [vmem:[#allocation2 + $0xf9] sm:$0xff] %vm413_vm2, %v3117_v35  ;;  %v3087_v13 = vadd.f32 %v7823_v15, %v10036_v60  ;;  %v2969_v46 = vpop.f32.mrb[21].mxu0  ;;  %v10211_v19 = vld [vmem:[#allocation2 + $0xc0] sm:$0xff]  ;;  %v10213_v26 = vld [vmem:[#allocation2 + $0xc8] sm:$0xff] }
 0x315   : > { %11525 = vst [vmem:[#allocation37_spill] sm:$0xff] %v10200_v56  ;;  %11526 = vst [vmem:[#allocation38_spill] sm:$0xff] %v10203_v63  ;;  %7862 = vmatprep.mubr.msk.f32.mxu1 %vm413_vm2, %v10200_v56  ;;  %v3364_v17 = vrot.slane %v10205_v55, 1  ;;  %v3086_v49 = vadd.f32 %v10036_v60, %v2969_v46  ;;  %v3361_v1 = vrot.slane %v10211_v19, 1  ;;  %v3362_v15 = vrot.slane %v10213_v26, 1 }
 0x316   : > { %3204 = vst.msk [vmem:[#allocation2 + $0xf1] sm:$0xff] %vm413_vm2, %v3116_v10  ;;  %7863 = vmatmul.mubr.msk.f32.gmra.mrb[14].mxu1 %vm413_vm2, %v10203_v63  ;;  %v3119_v36 = vmax.f32 %v3087_v13, 0.0 }
 0x317   : > { %v3118_v35 = vmax.f32 %v3086_v49, 0.0  ;;  %v7826_v47 = vpop.f32.mrb[22].mxu0  ;;  %v10223_v48 = vsel %vm330_vm1, %v3361_v1, %v3362_v15  ;;  %v10226_v40 = vsel %vm330_vm1, %v3362_v15, %v3364_v17 }
 0x318   : > { %11527 = vst [vmem:[#allocation39_spill] sm:$0xff] %v10223_v48  ;;  %11528 = vst [vmem:[#allocation41_spill] sm:$0xff] %v10226_v40  ;;  %v10228_v43 = vld [vmem:[#allocation2 + $0xe8] sm:$0x3]  ;;  %v3089_v10 = vadd.f32 %v7826_v47, %v10036_v60  ;;  %v2979_v46 = vpop.f32.mrb[23].mxu0  ;;  %7865 = vmatprep.mubr.msk.f32.mxu1 %vm413_vm2, %v10223_v48  ;;  %v10234_v32 = vld [vmem:[#allocation2 + $0xd8] sm:$0xff] }
 0x319   : > { %3207 = vst.msk [vmem:[#allocation2 + $0x111] sm:$0xff] %vm413_vm2, %v3119_v36  ;;  %v10236_v13 = vld [vmem:[#allocation2 + $0xe0] sm:$0xff]  ;;  %v3369_v49 = vrot.slane %v10228_v43, 1  ;;  %3206 = vst.msk [vmem:[#allocation2 + $0x109] sm:$0xff] %vm413_vm2, %v3118_v35  ;;  %v3088_v17 = vadd.f32 %v10036_v60, %v2979_v46  ;;  %v3366_v1 = vrot.slane %v10234_v32, 1 }
 0x31a   : > { %7866 = vmatmul.mubr.msk.f32.gmra.mrb[16].mxu1 %vm413_vm2, %v10226_v40  ;;  %v3367_v47 = vrot.slane %v10236_v13, 1  ;;  %v3121_v15 = vmax.f32 %v3089_v10, 0.0 }
 0x31b   : > { %v3120_v36 = vmax.f32 %v3088_v17, 0.0  ;;  %v7829_v39 = vpop.f32.mrb[24].mxu0  ;;  %v10251_v24 = vld [vmem:[#allocation2 + $0x100] sm:$0x3] }
 0x31c   : > { %v10246_v23 = vsel %vm330_vm1, %v3366_v1, %v3367_v47  ;;  %v10249_v31 = vsel %vm330_vm1, %v3367_v47, %v3369_v49  ;;  %3209 = vst.msk [vmem:[#allocation2 + $0x129] sm:$0xff] %vm413_vm2, %v3121_v15  ;;  %v3091_v35 = vadd.f32 %v7829_v39, %v10036_v60  ;;  %v2989_v46 = vpop.f32.mrb[25].mxu0  ;;  %v3374_v17 = vrot.slane %v10251_v24, 1 }
 0x31d   : > { %11529 = vst [vmem:[#allocation42_spill] sm:$0xff] %v10246_v23  ;;  %11530 = vst [vmem:[#allocation43_spill] sm:$0xff] %v10249_v31  ;;  %7868 = vmatprep.mubr.msk.f32.mxu1 %vm413_vm2, %v10246_v23  ;;  %v10257_v22 = vld [vmem:[#allocation2 + $0xf0] sm:$0xff]  ;;  %v10259_v10 = vld [vmem:[#allocation2 + $0xf8] sm:$0xff]  ;;  %v3090_v49 = vadd.f32 %v10036_v60, %v2989_v46 }
 0x31e   : > { %3208 = vst.msk [vmem:[#allocation2 + $0x121] sm:$0xff] %vm413_vm2, %v3120_v36  ;;  %7869 = vmatmul.mubr.msk.f32.gmra.mrb[18].mxu1 %vm413_vm2, %v10249_v31  ;;  %v3371_v1 = vrot.slane %v10257_v22, 1  ;;  %v3372_v39 = vrot.slane %v10259_v10, 1  ;;  %v3123_v47 = vmax.f32 %v3091_v35, 0.0 }
 0x31f   : > { %v3122_v15 = vmax.f32 %v3090_v49, 0.0  ;;  %v7832_v27 = vpop.f32.mrb[26].mxu0 }
 0x320   : > { %v10269_v33 = vsel %vm330_vm1, %v3371_v1, %v3372_v39  ;;  %v10272_v23 = vsel %vm330_vm1, %v3372_v39, %v3374_v17  ;;  %v10274_v40 = vld [vmem:[#allocation2 + $0x118] sm:$0x3]  ;;  %3211 = vst.msk [vmem:[#allocation2 + $0x141] sm:$0xff] %vm413_vm2, %v3123_v47  ;;  %v3093_v36 = vadd.f32 %v7832_v27, %v10036_v60  ;;  %v2999_v46 = vpop.f32.mrb[27].mxu0  ;;  %v10280_v31 = vld [vmem:[#allocation2 + $0x108] sm:$0xff]  ;;  %v10282_v35 = vld [vmem:[#allocation2 + $0x110] sm:$0xff] }
 0x321   : > { %11531 = vst [vmem:[#allocation44_spill] sm:$0xff] %v10269_v33  ;;  %11532 = vst [vmem:[#allocation46_spill] sm:$0xff] %v10272_v23  ;;  %7871 = vmatprep.mubr.msk.f32.mxu1 %vm413_vm2, %v10269_v33  ;;  %v3379_v49 = vrot.slane %v10274_v40, 1  ;;  %v3092_v17 = vadd.f32 %v10036_v60, %v2999_v46  ;;  %v3376_v1 = vrot.slane %v10280_v31, 1  ;;  %v3377_v27 = vrot.slane %v10282_v35, 1 }
 0x322   : > { %3210 = vst.msk [vmem:[#allocation2 + $0x139] sm:$0xff] %vm413_vm2, %v3122_v15  ;;  %7872 = vmatmul.mubr.msk.f32.gmra.mrb[20].mxu1 %vm413_vm2, %v10272_v23  ;;  %v3125_v39 = vmax.f32 %v3093_v36, 0.0 }
 0x323   : > { %v3124_v47 = vmax.f32 %v3092_v17, 0.0  ;;  %v7835_v33 = vpop.f32.mrb[28].mxu0  ;;  %v10292_v48 = vsel %vm330_vm1, %v3376_v1, %v3377_v27  ;;  %v10295_v63 = vsel %vm330_vm1, %v3377_v27, %v3379_v49  ;;  %v10297_v56 = vld [vmem:[#allocation2 + $0x130] sm:$0x3] }
 0x324   : > { %11533 = vst [vmem:[#allocation49_spill] sm:$0xff] %v10292_v48  ;;  %11534 = vst [vmem:[#allocation50_spill] sm:$0xff] %v10295_v63  ;;  %v3095_v15 = vadd.f32 %v7835_v33, %v10036_v60  ;;  %v3009_v46 = vpop.f32.mrb[29].mxu0  ;;  %7874 = vmatprep.mubr.msk.f32.mxu1 %vm413_vm2, %v10292_v48  ;;  %v3384_v17 = vrot.slane %v10297_v56, 1 }
 0x325   : > { %3213 = vst.msk [vmem:[#allocation2 + $0x159] sm:$0xff] %vm413_vm2, %v3125_v39  ;;  %v10303_v23 = vld [vmem:[#allocation2 + $0x120] sm:$0xff]  ;;  %v10305_v36 = vld [vmem:[#allocation2 + $0x128] sm:$0xff]  ;;  %3212 = vst.msk [vmem:[#allocation2 + $0x151] sm:$0xff] %vm413_vm2, %v3124_v47  ;;  %v3094_v49 = vadd.f32 %v10036_v60, %v3009_v46 }
 0x326   : > { %7875 = vmatmul.mubr.msk.f32.gmra.mrb[22].mxu1 %vm413_vm2, %v10295_v63  ;;  %v3381_v1 = vrot.slane %v10303_v23, 1  ;;  %v3382_v33 = vrot.slane %v10305_v36, 1  ;;  %v3127_v27 = vmax.f32 %v3095_v15, 0.0 }
 0x327   : > { %v3126_v39 = vmax.f32 %v3094_v49, 0.0  ;;  %v7838_v48 = vpop.f32.mrb[30].mxu0  ;;  %v10320_v20 = vld [vmem:[#allocation2 + $0x148] sm:$0x3] }
 0x328   : > { %v10315_v16 = vsel %vm330_vm1, %v3381_v1, %v3382_v33  ;;  %v10318_v44 = vsel %vm330_vm1, %v3382_v33, %v3384_v17  ;;  %3215 = vst.msk [vmem:[#allocation2 + $0x171] sm:$0xff] %vm413_vm2, %v3127_v27  ;;  %v3097_v47 = vadd.f32 %v7838_v48, %v10036_v60  ;;  %v3019_v46 = vpop.f32.mrb[31].mxu0  ;;  %v3389_v49 = vrot.slane %v10320_v20, 1 }
 0x329   : > { %11535 = vst [vmem:[#allocation51_spill] sm:$0xff] %v10315_v16  ;;  %11536 = vst [vmem:[#allocation52_spill] sm:$0xff] %v10318_v44  ;;  %7877 = vmatprep.mubr.msk.f32.mxu1 %vm413_vm2, %v10315_v16  ;;  %v10326_v63 = vld [vmem:[#allocation2 + $0x138] sm:$0xff]  ;;  %v10328_v15 = vld [vmem:[#allocation2 + $0x140] sm:$0xff]  ;;  %v3096_v17 = vadd.f32 %v10036_v60, %v3019_v46 }
 0x32a   : > { %3214 = vst.msk [vmem:[#allocation2 + $0x169] sm:$0xff] %vm413_vm2, %v3126_v39  ;;  %7878 = vmatmul.mubr.msk.f32.gmra.mrb[24].mxu1 %vm413_vm2, %v10318_v44  ;;  %v3386_v1 = vrot.slane %v10326_v63, 1  ;;  %v3387_v48 = vrot.slane %v10328_v15, 1  ;;  %v3129_v33 = vmax.f32 %v3097_v47, 0.0  ;;  %v3998_v44 = vrot.slane %v10075_v42, 2 }
 0x32b   : > { %v3128_v27 = vmax.f32 %v3096_v17, 0.0 }
 0x32c   : > { %v10338_v16 = vsel %vm330_vm1, %v3386_v1, %v3387_v48  ;;  %v10341_v58 = vsel %vm330_vm1, %v3387_v48, %v3389_v49  ;;  %v10343_v51 = vld [vmem:[#allocation2 + $0x160] sm:$0x3]  ;;  %3217 = vst.msk [vmem:[#allocation2 + $0x189] sm:$0xff] %vm413_vm2, %v3129_v33  ;;  %v10348_v60 = vld [vmem:[#allocation2 + $0x150] sm:$0xff]  ;;  %v10350_v39 = vld [vmem:[#allocation2 + $0x158] sm:$0xff] }
 0x32d   : > { %11537 = vst [vmem:[#allocation53_spill] sm:$0xff] %v10338_v16  ;;  %11538 = vst [vmem:[#allocation54_spill] sm:$0xff] %v10341_v58  ;;  %7880 = vmatprep.mubr.msk.f32.mxu1 %vm413_vm2, %v10338_v16  ;;  %v3394_v47 = vrot.slane %v10343_v51, 1  ;;  %v3391_v46 = vrot.slane %v10348_v60, 1  ;;  %v3392_v49 = vrot.slane %v10350_v39, 1 }
 0x32e   : > { %3216 = vst.msk [vmem:[#allocation2 + $0x181] sm:$0xff] %vm413_vm2, %v3128_v27  ;;  %7881 = vmatmul.mubr.msk.f32.gmra.mrb[26].mxu1 %vm413_vm2, %v10341_v58 }
 0x32f   : > { %v10359_v17 = vsel %vm330_vm1, %v3391_v46, %v3392_v49  ;;  %v10362_v1 = vsel %vm330_vm1, %v3392_v49, %v3394_v47  ;;  %v10364_v48 = vld [vmem:[#allocation2 + $0x178] sm:$0x3] }
 0x330   : > { %11539 = vst [vmem:[#allocation55_spill] sm:$0xff] %v10359_v17  ;;  %11540 = vst [vmem:[#allocation56_spill] sm:$0xff] %v10362_v1  ;;  %7883 = vmatprep.mubr.msk.f32.mxu1 %vm413_vm2, %v10359_v17  ;;  %v3399_v58 = vrot.slane %v10364_v48, 1  ;;  %v3997_v17 = vrot.slane %v10073_v7, 2 }
 0x331   : > { %v10368_v33 = vld [vmem:[#allocation2 + $0x168] sm:$0xff]  ;;  %v10370_v27 = vld [vmem:[#allocation2 + $0x170] sm:$0xff] }
 0x332   : > { %7884 = vmatmul.mubr.msk.f32.gmra.mrb[28].mxu1 %vm413_vm2, %v10362_v1  ;;  %v3396_v46 = vrot.slane %v10368_v33, 1  ;;  %v3397_v16 = vrot.slane %v10370_v27, 1  ;;  %v6587_v1 = vld [vmem:[%s11246_s3 + $0xc] sm:$0xf] }
 0x334   : > { %v10378_v47 = vsel %vm330_vm1, %v3396_v46, %v3397_v16  ;;  %v10381_v49 = vsel %vm330_vm1, %v3397_v16, %v3399_v58  ;;  %v3987_v16 = vrot.slane %v10003_v59, 2  ;;  %v3988_v58 = vrot.slane %v10005_v2, 2 }
 0x335   : > { %11541 = vst [vmem:[#allocation57_spill] sm:$0xff] %v10378_v47  ;;  %11542 = vst [vmem:[#allocation58_spill] sm:$0xff] %v10381_v49  ;;  %7886 = vmatprep.mubr.msk.f32.mxu1 %vm413_vm2, %v10378_v47  ;;  %v3993_v47 = vrot.slane %v10054_v25, 2 }
 0x336   : > { %7887 = vmatmul.mubr.msk.f32.gmra.mrb[30].mxu1 %vm413_vm2, %v10381_v49  ;;  %v3989_v46 = vsel %vm999_vm3, %v3987_v16, %v3988_v58  ;;  %v3992_v49 = vrot.slane %v10052_v41, 2 }
 0x337   : > { %7891 = vmatprep.mubr.msk.f32.mxu1 %vm413_vm2, %v10003_v59 }
 0x338   : > { %v10473_v16 = vsel %vm999_vm3, %v3992_v49, %v3993_v47  ;;  %v10489_v49 = vsel %vm999_vm3, %v3997_v17, %v3998_v44  ;;  %v4007_v17 = vrot.slane %v10119_v54, 2 }
 0x33a   : > { %7892 = vmatmul.mubr.msk.f32.vlgmr.msra.gmra.mrb[0].mxu1 %vm413_vm2, %v10005_v2  ;;  %v3995_v2 = vrot.slane %v10048_v9, 2 }
 0x33b   : > { %7940 = vmatpush3.msk.msra.mxu1 %vm478_vm0, %v10029_v14  ;;  %7894 = vmatprep.mubr.msk.f32.mxu1 %vm413_vm2, %v10052_v41  ;;  %v3990_v14 = vrot.slane %v10009_v37, 2  ;;  %v10469_v37 = vld [vmem:[%s11246_s3 + $0x10] sm:$0xf] }
 0x33c   : > { %7989 = vmatprep.subr.msk.mxu1 %vm478_vm0, %v6587_v1  ;;  %v10483_v9 = vsel %vm999_vm3, %v3993_v47, %v3995_v2  ;;  %v4005_v47 = vrot.slane %v10090_v18, 2 }
 0x33d   : > { %v3991_v59 = vsel %vm999_vm3, %v3988_v58, %v3990_v14  ;;  %v4000_v58 = vrot.slane %v10067_v50, 2  ;;  %v4002_v14 = vrot.slane %v10096_v4, 2 }
 0x33e   : > { %7895 = vmatmul.mubr.msk.f32.gmra.mrb[2].mxu1 %vm413_vm2, %v10054_v25 }
 0x33f   : > { %7897 = vmatprep.mubr.msk.f32.mxu1 %vm413_vm2, %v10073_v7 }
 0x342   : > { %7898 = vmatmul.mubr.msk.f32.gmra.mrb[4].mxu1 %vm413_vm2, %v10075_v42 }
 0x343   : > { %7900 = vmatprep.mubr.msk.f32.mxu1 %vm413_vm2, %v10096_v4 }
 0x346   : > { %7901 = vmatmul.mubr.msk.f32.gmra.mrb[6].mxu1 %vm413_vm2, %v10098_v12 }
 0x347   : > { %7903 = vmatprep.mubr.msk.f32.mxu1 %vm413_vm2, %v10119_v54 }
 0x34a   : > { %7904 = vmatmul.mubr.msk.f32.gmra.mrb[8].mxu1 %vm413_vm2, %v10121_v62 }
 0x34b   : > { %7906 = vmatprep.mubr.msk.f32.mxu1 %vm413_vm2, %v10142_v6 }
 0x34e   : > { %7907 = vmatmul.mubr.msk.f32.gmra.mrb[10].mxu1 %vm413_vm2, %v10144_v38 }
 0x34f   : > { %7909 = vmatprep.mubr.msk.f32.mxu1 %vm413_vm2, %v10165_v21 }
 0x352   : > { %7910 = vmatmul.mubr.msk.f32.gmra.mrb[12].mxu1 %vm413_vm2, %v10167_v11 }
 0x353   : > { %7912 = vmatprep.mubr.msk.f32.mxu1 %vm413_vm2, %v10188_v0 }
 0x356   : > { %7913 = vmatmul.mubr.msk.f32.gmra.mrb[14].mxu1 %vm413_vm2, %v10190_v5 }
 0x357   : > { %7915 = vmatprep.mubr.msk.f32.mxu1 %vm413_vm2, %v10211_v19 }
 0x35a   : > { %7916 = vmatmul.mubr.msk.f32.gmra.mrb[16].mxu1 %vm413_vm2, %v10213_v26 }
 0x35b   : > { %7918 = vmatprep.mubr.msk.f32.mxu1 %vm413_vm2, %v10234_v32 }
 0x35e   : > { %7919 = vmatmul.mubr.msk.f32.gmra.mrb[18].mxu1 %vm413_vm2, %v10236_v13 }
 0x35f   : > { %7921 = vmatprep.mubr.msk.f32.mxu1 %vm413_vm2, %v10257_v22 }
 0x362   : > { %7922 = vmatmul.mubr.msk.f32.gmra.mrb[20].mxu1 %vm413_vm2, %v10259_v10 }
 0x363   : > { %7924 = vmatprep.mubr.msk.f32.mxu1 %vm413_vm2, %v10280_v31 }
 0x366   : > { %7925 = vmatmul.mubr.msk.f32.gmra.mrb[22].mxu1 %vm413_vm2, %v10282_v35 }
 0x367   : > { %7927 = vmatprep.mubr.msk.f32.mxu1 %vm413_vm2, %v10303_v23 }
 0x36a   : > { %7928 = vmatmul.mubr.msk.f32.gmra.mrb[24].mxu1 %vm413_vm2, %v10305_v36 }
 0x36b   : > { %7930 = vmatprep.mubr.msk.f32.mxu1 %vm413_vm2, %v10326_v63 }
 0x36e   : > { %7931 = vmatmul.mubr.msk.f32.gmra.mrb[26].mxu1 %vm413_vm2, %v10328_v15 }
 0x36f   : > { %7933 = vmatprep.mubr.msk.f32.mxu1 %vm413_vm2, %v10348_v60 }
 0x372   : > { %7934 = vmatmul.mubr.msk.f32.gmra.mrb[28].mxu1 %vm413_vm2, %v10350_v39 }
 0x373   : > { %7936 = vmatprep.mubr.msk.f32.mxu1 %vm413_vm2, %v10368_v33 }
 0x376   : > { %7937 = vmatmul.mubr.msk.f32.gmra.mrb[30].mxu1 %vm413_vm2, %v10370_v27 }
 0x377   : > { %7941 = vmatprep.mubr.msk.f32.mxu1 %vm413_vm2, %v3989_v46  ;;  %v10496_v46 = vsel %vm999_vm3, %v3998_v44, %v4000_v58  ;;  %v4010_v44 = vrot.slane %v10113_v30, 2  ;;  %v4012_v58 = vrot.slane %v10142_v6, 2 }
 0x37a   : > { %7942 = vmatmul.mubr.msk.f32.vlgmr.msra.gmra.mrb[0].mxu1 %vm413_vm2, %v3991_v59  ;;  %v4008_v59 = vrot.slane %v10121_v62, 2 }
 0x37b   : > { %7990 = vmatpush3.msk.msra.mxu1 %vm478_vm0, %v6587_v1  ;;  %7944 = vmatprep.mubr.msk.f32.mxu1 %vm413_vm2, %v10473_v16  ;;  %v4003_v1 = vrot.slane %v10098_v12, 2 }
 0x37c   : > { %8039 = vmatprep.subr.msk.mxu1 %vm478_vm0, %v10469_v37  ;;  %v10515_v18 = vsel %vm999_vm3, %v4007_v17, %v4008_v59  ;;  %v4018_v17 = vrot.slane %v10167_v11, 2 }
 0x37d   : > { %v10502_v50 = vsel %vm999_vm3, %v4002_v14, %v4003_v1  ;;  %v10509_v2 = vsel %vm999_vm3, %v4003_v1, %v4005_v47  ;;  %11544 = vst [vmem:[#allocation60_spill] sm:$0xff] %v10515_v18  ;;  %v4013_v14 = vrot.slane %v10144_v38, 2  ;;  %v4015_v1 = vrot.slane %v10136_v61, 2 }
 0x37e   : > { %7945 = vmatmul.mubr.msk.f32.gmra.mrb[2].mxu1 %vm413_vm2, %v10483_v9  ;;  %11543 = vst [vmem:[#allocation59_spill] sm:$0xff] %v10502_v50  ;;  %v4017_v47 = vrot.slane %v10165_v21, 2 }
 0x37f   : > { %7947 = vmatprep.mubr.msk.f32.mxu1 %vm413_vm2, %v10489_v49  ;;  %v10528_v30 = vsel %vm999_vm3, %v4012_v58, %v4013_v14  ;;  %v4023_v58 = vrot.slane %v10190_v5, 2 }
 0x380   : > { %11545 = vst [vmem:[#allocation61_spill] sm:$0xff] %v10528_v30  ;;  %v10541_v61 = vsel %vm999_vm3, %v4017_v47, %v4018_v17  ;;  %v4028_v47 = vrot.slane %v10213_v26, 2 }
 0x381   : > { %11546 = vst [vmem:[#allocation62_spill] sm:$0xff] %v10541_v61 }
 0x382   : > { %7948 = vmatmul.mubr.msk.f32.gmra.mrb[4].mxu1 %vm413_vm2, %v10496_v46 }
 0x383   : > { %7950 = vmatprep.mubr.msk.f32.mxu1 %vm413_vm2, %v10502_v50  ;;  %v10522_v50 = vsel %vm999_vm3, %v4008_v59, %v4010_v44  ;;  %v4020_v59 = vrot.slane %v10159_v53, 2  ;;  %v4022_v44 = vrot.slane %v10188_v0, 2 }
 0x385   : > { %v10554_v53 = vsel %vm999_vm3, %v4022_v44, %v4023_v58  ;;  %v4033_v44 = vrot.slane %v10236_v13, 2 }
 0x386   : > { %7951 = vmatmul.mubr.msk.f32.gmra.mrb[6].mxu1 %vm413_vm2, %v10509_v2  ;;  %11547 = vst [vmem:[#allocation63_spill] sm:$0xff] %v10554_v53 }
 0x387   : > { %7953 = vmatprep.mubr.msk.f32.mxu1 %vm413_vm2, %v10515_v18  ;;  %v10535_v18 = vsel %vm999_vm3, %v4013_v14, %v4015_v1  ;;  %v4025_v14 = vrot.slane %v10182_v34, 2  ;;  %v4027_v1 = vrot.slane %v10211_v19, 2 }
 0x389   : > { %v10567_v34 = vsel %vm999_vm3, %v4027_v1, %v4028_v47  ;;  %v4038_v1 = vrot.slane %v10259_v10, 2 }
 0x38a   : > { %7954 = vmatmul.mubr.msk.f32.gmra.mrb[8].mxu1 %vm413_vm2, %v10522_v50  ;;  %11548 = vst [vmem:[#allocation64_spill] sm:$0xff] %v10567_v34 }
 0x38b   : > { %7956 = vmatprep.mubr.msk.f32.mxu1 %vm413_vm2, %v10528_v30  ;;  %v10548_v30 = vsel %vm999_vm3, %v4018_v17, %v4020_v59  ;;  %v4030_v17 = vrot.slane %v10205_v55, 2  ;;  %v4032_v59 = vrot.slane %v10234_v32, 2 }
 0x38d   : > { %v10580_v55 = vsel %vm999_vm3, %v4032_v59, %v4033_v44  ;;  %v4043_v59 = vrot.slane %v10282_v35, 2 }
 0x38e   : > { %7957 = vmatmul.mubr.msk.f32.gmra.mrb[10].mxu1 %vm413_vm2, %v10535_v18  ;;  %11549 = vst [vmem:[#allocation65_spill] sm:$0xff] %v10580_v55 }
 0x38f   : > { %7959 = vmatprep.mubr.msk.f32.mxu1 %vm413_vm2, %v10541_v61  ;;  %v10561_v61 = vsel %vm999_vm3, %v4023_v58, %v4025_v14  ;;  %v4035_v58 = vrot.slane %v10228_v43, 2  ;;  %v4037_v14 = vrot.slane %v10257_v22, 2 }
 0x391   : > { %v10593_v43 = vsel %vm999_vm3, %v4037_v14, %v4038_v1  ;;  %v4048_v14 = vrot.slane %v10305_v36, 2 }
 0x392   : > { %7960 = vmatmul.mubr.msk.f32.gmra.mrb[12].mxu1 %vm413_vm2, %v10548_v30  ;;  %11550 = vst [vmem:[#allocation66_spill] sm:$0xff] %v10593_v43 }
 0x393   : > { %7962 = vmatprep.mubr.msk.f32.mxu1 %vm413_vm2, %v10554_v53  ;;  %v10574_v53 = vsel %vm999_vm3, %v4028_v47, %v4030_v17  ;;  %v4040_v47 = vrot.slane %v10251_v24, 2  ;;  %v4042_v17 = vrot.slane %v10280_v31, 2 }
 0x395   : > { %v10606_v24 = vsel %vm999_vm3, %v4042_v17, %v4043_v59  ;;  %v4053_v17 = vrot.slane %v10328_v15, 2 }
 0x396   : > { %7963 = vmatmul.mubr.msk.f32.gmra.mrb[14].mxu1 %vm413_vm2, %v10561_v61  ;;  %11552 = vst [vmem:[#allocation68_spill] sm:$0xff] %v10606_v24 }
 0x397   : > { %7965 = vmatprep.mubr.msk.f32.mxu1 %vm413_vm2, %v10567_v34  ;;  %v10587_v34 = vsel %vm999_vm3, %v4033_v44, %v4035_v58  ;;  %v4045_v44 = vrot.slane %v10274_v40, 2  ;;  %v4047_v58 = vrot.slane %v10303_v23, 2 }
 0x399   : > { %v10619_v40 = vsel %vm999_vm3, %v4047_v58, %v4048_v14  ;;  %v4058_v58 = vrot.slane %v10350_v39, 2 }
 0x39a   : > { %7966 = vmatmul.mubr.msk.f32.gmra.mrb[16].mxu1 %vm413_vm2, %v10574_v53  ;;  %11553 = vst [vmem:[#allocation69_spill] sm:$0xff] %v10619_v40 }
 0x39b   : > { %7968 = vmatprep.mubr.msk.f32.mxu1 %vm413_vm2, %v10580_v55  ;;  %v10600_v55 = vsel %vm999_vm3, %v4038_v1, %v4040_v47  ;;  %v4050_v1 = vrot.slane %v10297_v56, 2  ;;  %v4052_v47 = vrot.slane %v10326_v63, 2 }
 0x39c   : > { %11551 = vst [vmem:[#allocation67_spill] sm:$0xff] %v10600_v55 }
 0x39d   : > { %v10632_v56 = vsel %vm999_vm3, %v4052_v47, %v4053_v17  ;;  %v4063_v47 = vrot.slane %v10370_v27, 2 }
 0x39e   : > { %7969 = vmatmul.mubr.msk.f32.gmra.mrb[18].mxu1 %vm413_vm2, %v10587_v34  ;;  %11555 = vst [vmem:[#allocation71_spill] sm:$0xff] %v10632_v56 }
 0x39f   : > { %7971 = vmatprep.mubr.msk.f32.mxu1 %vm413_vm2, %v10593_v43  ;;  %v10613_v43 = vsel %vm999_vm3, %v4043_v59, %v4045_v44  ;;  %v4055_v59 = vrot.slane %v10320_v20, 2  ;;  %v4057_v44 = vrot.slane %v10348_v60, 2 }
 0x3a1   : > { %v10645_v20 = vsel %vm999_vm3, %v4057_v44, %v4058_v58  ;;  %v11559_v44 = vld [vmem:[#allocation34_spill] sm:$0xff] }
 0x3a2   : > { %7972 = vmatmul.mubr.msk.f32.gmra.mrb[20].mxu1 %vm413_vm2, %v10600_v55  ;;  %11556 = vst [vmem:[#allocation72_spill] sm:$0xff] %v10645_v20 }
 0x3a3   : > { %7974 = vmatprep.mubr.msk.f32.mxu1 %vm413_vm2, %v10606_v24  ;;  %v10626_v24 = vsel %vm999_vm3, %v4048_v14, %v4050_v1  ;;  %v4060_v14 = vrot.slane %v10343_v51, 2  ;;  %v4062_v1 = vrot.slane %v10368_v33, 2 }
 0x3a4   : > { %11554 = vst [vmem:[#allocation70_spill] sm:$0xff] %v10626_v24 }
 0x3a5   : > { %v10658_v51 = vsel %vm999_vm3, %v4062_v1, %v4063_v47  ;;  %v11562_v1 = vld [vmem:[#allocation37_spill] sm:$0xff] }
 0x3a6   : > { %7975 = vmatmul.mubr.msk.f32.gmra.mrb[22].mxu1 %vm413_vm2, %v10613_v43 }
 0x3a7   : > { %7977 = vmatprep.mubr.msk.f32.mxu1 %vm413_vm2, %v10619_v40  ;;  %v10639_v40 = vsel %vm999_vm3, %v4053_v17, %v4055_v59  ;;  %v4065_v17 = vrot.slane %v10364_v48, 2  ;;  %v6655_v48 = vld [vmem:[%s11246_s3 + $0x14] sm:$0xf] }
 0x3a9   : > { %v10663_v59 = vsel %vm999_vm3, %v4063_v47, %v4065_v17  ;;  %v11563_v47 = vld [vmem:[#allocation38_spill] sm:$0xff]  ;;  %v11564_v17 = vld [vmem:[#allocation39_spill] sm:$0xff] }
 0x3aa   : > { %7978 = vmatmul.mubr.msk.f32.gmra.mrb[24].mxu1 %vm413_vm2, %v10626_v24 }
 0x3ab   : > { %7980 = vmatprep.mubr.msk.f32.mxu1 %vm413_vm2, %v10632_v56  ;;  %v10652_v56 = vsel %vm999_vm3, %v4058_v58, %v4060_v14  ;;  %v11560_v58 = vld [vmem:[#allocation35_spill] sm:$0xff]  ;;  %v11561_v14 = vld [vmem:[#allocation36_spill] sm:$0xff] }
 0x3ae   : > { %7981 = vmatmul.mubr.msk.f32.gmra.mrb[26].mxu1 %vm413_vm2, %v10639_v40 }
 0x3af   : > { %7983 = vmatprep.mubr.msk.f32.mxu1 %vm413_vm2, %v10645_v20 }
 0x3b2   : > { %7984 = vmatmul.mubr.msk.f32.gmra.mrb[28].mxu1 %vm413_vm2, %v10652_v56 }
 0x3b3   : > { %7986 = vmatprep.mubr.msk.f32.mxu1 %vm413_vm2, %v10658_v51 }
 0x3b6   : > { %7987 = vmatmul.mubr.msk.f32.gmra.mrb[30].mxu1 %vm413_vm2, %v10663_v59 }
 0x3b7   : > { %7991 = vmatprep.mubr.msk.f32.mxu1 %vm413_vm2, %v10052_v41  ;;  %v10733_v41 = vld [vmem:[#allocation2 + $0x180] sm:$0xff] }
 0x3ba   : > { %7992 = vmatmul.mubr.msk.f32.vlgmr.msra.gmra.mrb[0].mxu1 %vm413_vm2, %v10054_v25  ;;  %v10737_v25 = vld [vmem:[#allocation2 + $0x188] sm:$0xff] }
 0x3bb   : > { %8040 = vmatpush3.msk.msra.mxu1 %vm478_vm0, %v10469_v37  ;;  %7994 = vmatprep.mubr.msk.f32.mxu1 %vm413_vm2, %v10073_v7  ;;  %v6689_v37 = vld [vmem:[%s11246_s3 + $0x18] sm:$0xf] }
 0x3bc   : > { %8089 = vmatprep.subr.msk.mxu1 %vm478_vm0, %v6655_v48 }
 0x3be   : > { %7995 = vmatmul.mubr.msk.f32.gmra.mrb[2].mxu1 %vm413_vm2, %v10075_v42 }
 0x3bf   : > { %7997 = vmatprep.mubr.msk.f32.mxu1 %vm413_vm2, %v10096_v4 }
 0x3c2   : > { %7998 = vmatmul.mubr.msk.f32.gmra.mrb[4].mxu1 %vm413_vm2, %v10098_v12 }
 0x3c3   : > { %8000 = vmatprep.mubr.msk.f32.mxu1 %vm413_vm2, %v10119_v54 }
 0x3c6   : > { %8001 = vmatmul.mubr.msk.f32.gmra.mrb[6].mxu1 %vm413_vm2, %v10121_v62 }
 0x3c7   : > { %8003 = vmatprep.mubr.msk.f32.mxu1 %vm413_vm2, %v10142_v6 }
 0x3ca   : > { %8004 = vmatmul.mubr.msk.f32.gmra.mrb[8].mxu1 %vm413_vm2, %v10144_v38 }
 0x3cb   : > { %8006 = vmatprep.mubr.msk.f32.mxu1 %vm413_vm2, %v10165_v21 }
 0x3ce   : > { %8007 = vmatmul.mubr.msk.f32.gmra.mrb[10].mxu1 %vm413_vm2, %v10167_v11 }
 0x3cf   : > { %8009 = vmatprep.mubr.msk.f32.mxu1 %vm413_vm2, %v10188_v0 }
 0x3d2   : > { %8010 = vmatmul.mubr.msk.f32.gmra.mrb[12].mxu1 %vm413_vm2, %v10190_v5 }
 0x3d3   : > { %8012 = vmatprep.mubr.msk.f32.mxu1 %vm413_vm2, %v10211_v19 }
 0x3d6   : > { %8013 = vmatmul.mubr.msk.f32.gmra.mrb[14].mxu1 %vm413_vm2, %v10213_v26 }
 0x3d7   : > { %8015 = vmatprep.mubr.msk.f32.mxu1 %vm413_vm2, %v10234_v32 }
 0x3da   : > { %8016 = vmatmul.mubr.msk.f32.gmra.mrb[16].mxu1 %vm413_vm2, %v10236_v13 }
 0x3db   : > { %8018 = vmatprep.mubr.msk.f32.mxu1 %vm413_vm2, %v10257_v22 }
 0x3de   : > { %8019 = vmatmul.mubr.msk.f32.gmra.mrb[18].mxu1 %vm413_vm2, %v10259_v10 }
 0x3df   : > { %8021 = vmatprep.mubr.msk.f32.mxu1 %vm413_vm2, %v10280_v31 }
 0x3e2   : > { %8022 = vmatmul.mubr.msk.f32.gmra.mrb[20].mxu1 %vm413_vm2, %v10282_v35 }
 0x3e3   : > { %8024 = vmatprep.mubr.msk.f32.mxu1 %vm413_vm2, %v10303_v23 }
 0x3e6   : > { %8025 = vmatmul.mubr.msk.f32.gmra.mrb[22].mxu1 %vm413_vm2, %v10305_v36 }
 0x3e7   : > { %8027 = vmatprep.mubr.msk.f32.mxu1 %vm413_vm2, %v10326_v63 }
 0x3ea   : > { %8028 = vmatmul.mubr.msk.f32.gmra.mrb[24].mxu1 %vm413_vm2, %v10328_v15 }
 0x3eb   : > { %8030 = vmatprep.mubr.msk.f32.mxu1 %vm413_vm2, %v10348_v60 }
 0x3ee   : > { %8031 = vmatmul.mubr.msk.f32.gmra.mrb[26].mxu1 %vm413_vm2, %v10350_v39 }
 0x3ef   : > { %8033 = vmatprep.mubr.msk.f32.mxu1 %vm413_vm2, %v10368_v33 }
 0x3f2   : > { %8034 = vmatmul.mubr.msk.f32.gmra.mrb[28].mxu1 %vm413_vm2, %v10370_v27 }
 0x3f3   : > { %8036 = vmatprep.mubr.msk.f32.mxu1 %vm413_vm2, %v10733_v41 }
 0x3f6   : > { %8037 = vmatmul.mubr.msk.f32.gmra.mrb[30].mxu1 %vm413_vm2, %v10737_v25 }
 0x3f7   : > { %8041 = vmatprep.mubr.msk.f32.mxu1 %vm413_vm2, %v10062_v28  ;;  %v11557_v28 = vld [vmem:[#allocation40_spill] sm:$0xff] }
 0x3fa   : > { %8042 = vmatmul.mubr.msk.f32.vlgmr.msra.gmra.mrb[0].mxu1 %vm413_vm2, %v10065_v45  ;;  %v11558_v45 = vld [vmem:[#allocation45_spill] sm:$0xff] }
 0x3fb   : > { %8090 = vmatpush3.msk.msra.mxu1 %vm478_vm0, %v6655_v48  ;;  %8044 = vmatprep.mubr.msk.f32.mxu1 %vm413_vm2, %v10085_v29  ;;  %v11565_v48 = vld [vmem:[#allocation41_spill] sm:$0xff] }
 0x3fc   : > { %8139 = vmatprep.subr.msk.mxu1 %vm478_vm0, %v6689_v37 }
 0x3fe   : > { %8045 = vmatmul.mubr.msk.f32.gmra.mrb[2].mxu1 %vm413_vm2, %v10088_v8 }
 0x3ff   : > { %8047 = vmatprep.mubr.msk.f32.mxu1 %vm413_vm2, %v10108_v3 }
 0x402   : > { %8048 = vmatmul.mubr.msk.f32.gmra.mrb[4].mxu1 %vm413_vm2, %v10111_v57 }
 0x403   : > { %8050 = vmatprep.mubr.msk.f32.mxu1 %vm413_vm2, %v10131_v52  ;;  %v11579_v52 = vld [vmem:[#allocation58_spill] sm:$0xff] }
 0x406   : > { %8051 = vmatmul.mubr.msk.f32.gmra.mrb[6].mxu1 %vm413_vm2, %v11557_v28  ;;  %v11578_v28 = vld [vmem:[#allocation57_spill] sm:$0xff] }
 0x407   : > { %8053 = vmatprep.mubr.msk.f32.mxu1 %vm413_vm2, %v11558_v45  ;;  %v11566_v45 = vld [vmem:[#allocation42_spill] sm:$0xff] }
 0x40a   : > { %8054 = vmatmul.mubr.msk.f32.gmra.mrb[8].mxu1 %vm413_vm2, %v11559_v44  ;;  %v11567_v44 = vld [vmem:[#allocation43_spill] sm:$0xff] }
 0x40b   : > { %8056 = vmatprep.mubr.msk.f32.mxu1 %vm413_vm2, %v11560_v58  ;;  %v11568_v58 = vld [vmem:[#allocation44_spill] sm:$0xff] }
 0x40e   : > { %8057 = vmatmul.mubr.msk.f32.gmra.mrb[10].mxu1 %vm413_vm2, %v11561_v14  ;;  %v11569_v14 = vld [vmem:[#allocation46_spill] sm:$0xff] }
 0x40f   : > { %8059 = vmatprep.mubr.msk.f32.mxu1 %vm413_vm2, %v11562_v1  ;;  %v11570_v1 = vld [vmem:[#allocation49_spill] sm:$0xff] }
 0x412   : > { %8060 = vmatmul.mubr.msk.f32.gmra.mrb[12].mxu1 %vm413_vm2, %v11563_v47  ;;  %v11571_v47 = vld [vmem:[#allocation50_spill] sm:$0xff] }
 0x413   : > { %8062 = vmatprep.mubr.msk.f32.mxu1 %vm413_vm2, %v11564_v17  ;;  %v11572_v17 = vld [vmem:[#allocation51_spill] sm:$0xff] }
 0x416   : > { %8063 = vmatmul.mubr.msk.f32.gmra.mrb[14].mxu1 %vm413_vm2, %v11565_v48  ;;  %v11573_v48 = vld [vmem:[#allocation52_spill] sm:$0xff] }
 0x417   : > { %8065 = vmatprep.mubr.msk.f32.mxu1 %vm413_vm2, %v11566_v45  ;;  %v11574_v45 = vld [vmem:[#allocation53_spill] sm:$0xff] }
 0x41a   : > { %8066 = vmatmul.mubr.msk.f32.gmra.mrb[16].mxu1 %vm413_vm2, %v11567_v44  ;;  %v11575_v44 = vld [vmem:[#allocation54_spill] sm:$0xff] }
 0x41b   : > { %8068 = vmatprep.mubr.msk.f32.mxu1 %vm413_vm2, %v11568_v58  ;;  %v11576_v58 = vld [vmem:[#allocation55_spill] sm:$0xff] }
 0x41e   : > { %8069 = vmatmul.mubr.msk.f32.gmra.mrb[18].mxu1 %vm413_vm2, %v11569_v14  ;;  %v4663_v14 = vrot.slane %v10737_v25, 1 }
 0x41f   : > { %8071 = vmatprep.mubr.msk.f32.mxu1 %vm413_vm2, %v11570_v1  ;;  %v4662_v1 = vrot.slane %v10733_v41, 1 }
 0x422   : > { %8072 = vmatmul.mubr.msk.f32.gmra.mrb[20].mxu1 %vm413_vm2, %v11571_v47  ;;  %v11577_v47 = vld [vmem:[#allocation56_spill] sm:$0xff] }
 0x423   : > { %8074 = vmatprep.mubr.msk.f32.mxu1 %vm413_vm2, %v11572_v17  ;;  %v3268_v17 = vld [vmem:[#allocation2 + $0x190] sm:$0x3] }
 0x426   : > { %8075 = vmatmul.mubr.msk.f32.gmra.mrb[22].mxu1 %vm413_vm2, %v11573_v48  ;;  %v4665_v48 = vrot.slane %v3268_v17, 1 }
 0x427   : > { %8077 = vmatprep.mubr.msk.f32.mxu1 %vm413_vm2, %v11574_v45 }
 0x42a   : > { %8078 = vmatmul.mubr.msk.f32.gmra.mrb[24].mxu1 %vm413_vm2, %v11575_v44  ;;  %v10809_v44 = vsel %vm330_vm1, %v4662_v1, %v4663_v14  ;;  %v11584_v1 = vld [vmem:[#allocation63_spill] sm:$0xff] }
 0x42b   : > { %8080 = vmatprep.mubr.msk.f32.mxu1 %vm413_vm2, %v11576_v58  ;;  %v10814_v58 = vsel %vm330_vm1, %v4663_v14, %v4665_v48  ;;  %v11580_v14 = vld [vmem:[#allocation59_spill] sm:$0xff]  ;;  %v11585_v48 = vld [vmem:[#allocation64_spill] sm:$0xff] }
 0x42e   : > { %8081 = vmatmul.mubr.msk.f32.gmra.mrb[26].mxu1 %vm413_vm2, %v11577_v47 }
 0x42f   : > { %8083 = vmatprep.mubr.msk.f32.mxu1 %vm413_vm2, %v11578_v28  ;;  %v6723_v28 = vld [vmem:[%s11246_s3 + $0x1c] sm:$0xf] }
 0x432   : > { %8084 = vmatmul.mubr.msk.f32.gmra.mrb[28].mxu1 %vm413_vm2, %v11579_v52 }
 0x433   : > { %8086 = vmatprep.mubr.msk.f32.mxu1 %vm413_vm2, %v10809_v44 }
 0x436   : > { %8087 = vmatmul.mubr.msk.f32.gmra.mrb[30].mxu1 %vm413_vm2, %v10814_v58 }
 0x437   : > { %8091 = vmatprep.mubr.msk.f32.mxu1 %vm413_vm2, %v10473_v16  ;;  %v11581_v16 = vld [vmem:[#allocation60_spill] sm:$0xff] }
 0x43a   : > { %8092 = vmatmul.mubr.msk.f32.vlgmr.msra.gmra.mrb[0].mxu1 %vm413_vm2, %v10483_v9  ;;  %v11582_v9 = vld [vmem:[#allocation61_spill] sm:$0xff] }
 0x43b   : > { %8140 = vmatpush3.msk.msra.mxu1 %vm478_vm0, %v6689_v37  ;;  %8094 = vmatprep.mubr.msk.f32.mxu1 %vm413_vm2, %v10489_v49  ;;  %v11583_v37 = vld [vmem:[#allocation62_spill] sm:$0xff] }
 0x43c   : > { %8189 = vmatprep.subr.msk.mxu1 %vm478_vm0, %v6723_v28 }
 0x43e   : > { %8095 = vmatmul.mubr.msk.f32.gmra.mrb[2].mxu1 %vm413_vm2, %v10496_v46 }
 0x43f   : > { %8097 = vmatprep.mubr.msk.f32.mxu1 %vm413_vm2, %v11580_v14 }
 0x442   : > { %8098 = vmatmul.mubr.msk.f32.gmra.mrb[4].mxu1 %vm413_vm2, %v10509_v2 }
 0x443   : > { %8100 = vmatprep.mubr.msk.f32.mxu1 %vm413_vm2, %v11581_v16 }
 0x446   : > { %8101 = vmatmul.mubr.msk.f32.gmra.mrb[6].mxu1 %vm413_vm2, %v10522_v50 }
 0x447   : > { %8103 = vmatprep.mubr.msk.f32.mxu1 %vm413_vm2, %v11582_v9  ;;  %v11586_v9 = vld [vmem:[#allocation65_spill] sm:$0xff] }
 0x44a   : > { %8104 = vmatmul.mubr.msk.f32.gmra.mrb[8].mxu1 %vm413_vm2, %v10535_v18 }
 0x44b   : > { %8106 = vmatprep.mubr.msk.f32.mxu1 %vm413_vm2, %v11583_v37  ;;  %v11587_v37 = vld [vmem:[#allocation66_spill] sm:$0xff] }
 0x44e   : > { %8107 = vmatmul.mubr.msk.f32.gmra.mrb[10].mxu1 %vm413_vm2, %v10548_v30 }
 0x44f   : > { %8109 = vmatprep.mubr.msk.f32.mxu1 %vm413_vm2, %v11584_v1  ;;  %v11588_v1 = vld [vmem:[#allocation68_spill] sm:$0xff] }
 0x452   : > { %8110 = vmatmul.mubr.msk.f32.gmra.mrb[12].mxu1 %vm413_vm2, %v10561_v61 }
 0x453   : > { %8112 = vmatprep.mubr.msk.f32.mxu1 %vm413_vm2, %v11585_v48  ;;  %v11589_v48 = vld [vmem:[#allocation69_spill] sm:$0xff] }
 0x456   : > { %8113 = vmatmul.mubr.msk.f32.gmra.mrb[14].mxu1 %vm413_vm2, %v10574_v53 }
 0x457   : > { %8115 = vmatprep.mubr.msk.f32.mxu1 %vm413_vm2, %v11586_v9  ;;  %v11590_v9 = vld [vmem:[#allocation71_spill] sm:$0xff] }
 0x45a   : > { %8116 = vmatmul.mubr.msk.f32.gmra.mrb[16].mxu1 %vm413_vm2, %v10587_v34 }
 0x45b   : > { %8118 = vmatprep.mubr.msk.f32.mxu1 %vm413_vm2, %v11587_v37 }
 0x45e   : > { %8119 = vmatmul.mubr.msk.f32.gmra.mrb[18].mxu1 %vm413_vm2, %v10600_v55  ;;  %v4934_v55 = vrot.slane %v10737_v25, 2 }
 0x45f   : > { %8121 = vmatprep.mubr.msk.f32.mxu1 %vm413_vm2, %v11588_v1  ;;  %v4933_v1 = vrot.slane %v10733_v41, 2 }
 0x462   : > { %8122 = vmatmul.mubr.msk.f32.gmra.mrb[20].mxu1 %vm413_vm2, %v10613_v43 }
 0x463   : > { %8124 = vmatprep.mubr.msk.f32.mxu1 %vm413_vm2, %v11589_v48 }
 0x466   : > { %8125 = vmatmul.mubr.msk.f32.gmra.mrb[22].mxu1 %vm413_vm2, %v10626_v24  ;;  %v4936_v24 = vrot.slane %v3268_v17, 2  ;;  %v6757_v17 = vld [vmem:[%s11246_s3 + $0x20] sm:$0xf] }
 0x467   : > { %8127 = vmatprep.mubr.msk.f32.mxu1 %vm413_vm2, %v11590_v9  ;;  %v10886_v9 = vsel %vm999_vm3, %v4933_v1, %v4934_v55 }
 0x46a   : > { %8128 = vmatmul.mubr.msk.f32.gmra.mrb[24].mxu1 %vm413_vm2, %v10639_v40 }
 0x46b   : > { %8130 = vmatprep.mubr.msk.f32.mxu1 %vm413_vm2, %v10645_v20  ;;  %v10891_v20 = vsel %vm999_vm3, %v4934_v55, %v4936_v24  ;;  %v11104_v24 = vld [vmem:[%s11247_s4] ss:$0 sm:$0xff] }
 0x46e   : > { %8131 = vmatmul.mubr.msk.f32.gmra.mrb[26].mxu1 %vm413_vm2, %v10652_v56 }
 0x46f   : > { %8133 = vmatprep.mubr.msk.f32.mxu1 %vm413_vm2, %v10658_v51 }
 0x472   : > { %8134 = vmatmul.mubr.msk.f32.gmra.mrb[28].mxu1 %vm413_vm2, %v10663_v59 }
 0x473   : > { %8136 = vmatprep.mubr.msk.f32.mxu1 %vm413_vm2, %v10886_v9 }
 0x476   : > { %8137 = vmatmul.mubr.msk.f32.gmra.mrb[30].mxu1 %vm413_vm2, %v10891_v20 }
 0x477   : > { %8141 = vmatprep.mubr.msk.f32.mxu1 %vm413_vm2, %v10073_v7  ;;  %v11598_v7 = vld [vmem:[#allocation38_spill] sm:$0xff] }
 0x47a   : > { %8142 = vmatmul.mubr.msk.f32.vlgmr.msra.gmra.mrb[0].mxu1 %vm413_vm2, %v10075_v42  ;;  %v11599_v42 = vld [vmem:[#allocation39_spill] sm:$0xff] }
 0x47b   : > { %8190 = vmatpush3.msk.msra.mxu1 %vm478_vm0, %v6723_v28  ;;  %8144 = vmatprep.mubr.msk.f32.mxu1 %vm413_vm2, %v10096_v4  ;;  %v11602_v4 = vld [vmem:[#allocation43_spill] sm:$0xff] }
 0x47c   : > { %8239 = vmatprep.subr.msk.mxu1 %vm478_vm0, %v6757_v17 }
 0x47e   : > { %8145 = vmatmul.mubr.msk.f32.gmra.mrb[2].mxu1 %vm413_vm2, %v10098_v12  ;;  %v11603_v12 = vld [vmem:[#allocation44_spill] sm:$0xff] }
 0x47f   : > { %8147 = vmatprep.mubr.msk.f32.mxu1 %vm413_vm2, %v10119_v54  ;;  %v11606_v54 = vld [vmem:[#allocation50_spill] sm:$0xff] }
 0x482   : > { %8148 = vmatmul.mubr.msk.f32.gmra.mrb[4].mxu1 %vm413_vm2, %v10121_v62  ;;  %v11607_v62 = vld [vmem:[#allocation51_spill] sm:$0xff] }
 0x483   : > { %8150 = vmatprep.mubr.msk.f32.mxu1 %vm413_vm2, %v10142_v6  ;;  %v10964_v6 = vld [vmem:[#allocation2 + $0x1a0] sm:$0xff] }
 0x486   : > { %8151 = vmatmul.mubr.msk.f32.gmra.mrb[6].mxu1 %vm413_vm2, %v10144_v38  ;;  %v11608_v38 = vld [vmem:[#allocation52_spill] sm:$0xff] }
 0x487   : > { %8153 = vmatprep.mubr.msk.f32.mxu1 %vm413_vm2, %v10165_v21  ;;  %v10958_v21 = vld [vmem:[#allocation2 + $0x198] sm:$0xff] }
 0x48a   : > { %8154 = vmatmul.mubr.msk.f32.gmra.mrb[8].mxu1 %vm413_vm2, %v10167_v11  ;;  %v11609_v11 = vld [vmem:[#allocation54_spill] sm:$0xff] }
 0x48b   : > { %8156 = vmatprep.mubr.msk.f32.mxu1 %vm413_vm2, %v10188_v0  ;;  %v11597_v0 = vld [vmem:[#allocation37_spill] sm:$0xff] }
 0x48e   : > { %8157 = vmatmul.mubr.msk.f32.gmra.mrb[10].mxu1 %vm413_vm2, %v10190_v5  ;;  %v11610_v5 = vld [vmem:[#allocation55_spill] sm:$0xff] }
 0x48f   : > { %8159 = vmatprep.mubr.msk.f32.mxu1 %vm413_vm2, %v10211_v19  ;;  %v11591_v19 = vld [vmem:[#allocation33_spill] sm:$0xff] }
 0x492   : > { %8160 = vmatmul.mubr.msk.f32.gmra.mrb[12].mxu1 %vm413_vm2, %v10213_v26  ;;  %v11611_v26 = vld [vmem:[#allocation57_spill] sm:$0xff] }
 0x493   : > { %8162 = vmatprep.mubr.msk.f32.mxu1 %vm413_vm2, %v10234_v32  ;;  %v11595_v32 = vld [vmem:[#allocation35_spill] sm:$0xff] }
 0x496   : > { %8163 = vmatmul.mubr.msk.f32.gmra.mrb[14].mxu1 %vm413_vm2, %v10236_v13  ;;  %v5473_v13 = vrot.slane %v10958_v21, 1 }
 0x497   : > { %8165 = vmatprep.mubr.msk.f32.mxu1 %vm413_vm2, %v10257_v22  ;;  %v11592_v22 = vld [vmem:[#allocation40_spill] sm:$0xff] }
 0x49a   : > { %8166 = vmatmul.mubr.msk.f32.gmra.mrb[16].mxu1 %vm413_vm2, %v10259_v10  ;;  %v5474_v10 = vrot.slane %v10964_v6, 1 }
 0x49b   : > { %8168 = vmatprep.mubr.msk.f32.mxu1 %vm413_vm2, %v10280_v31  ;;  %v11594_v31 = vld [vmem:[#allocation34_spill] sm:$0xff] }
 0x49e   : > { %8169 = vmatmul.mubr.msk.f32.gmra.mrb[18].mxu1 %vm413_vm2, %v10282_v35  ;;  %v3271_v35 = vld [vmem:[#allocation2 + $0x1a8] sm:$0x3] }
 0x49f   : > { %8171 = vmatprep.mubr.msk.f32.mxu1 %vm413_vm2, %v10303_v23  ;;  %v11593_v23 = vld [vmem:[#allocation45_spill] sm:$0xff] }
 0x4a2   : > { %8172 = vmatmul.mubr.msk.f32.gmra.mrb[20].mxu1 %vm413_vm2, %v10305_v36  ;;  %v5476_v36 = vrot.slane %v3271_v35, 1 }
 0x4a3   : > { %8174 = vmatprep.mubr.msk.f32.mxu1 %vm413_vm2, %v10326_v63  ;;  %v11596_v63 = vld [vmem:[#allocation36_spill] sm:$0xff] }
 0x4a6   : > { %8175 = vmatmul.mubr.msk.f32.gmra.mrb[22].mxu1 %vm413_vm2, %v10328_v15  ;;  %v5475_v15 = vsel %vm330_vm1, %v5473_v13, %v5474_v10 }
 0x4a7   : > { %8177 = vmatprep.mubr.msk.f32.mxu1 %vm413_vm2, %v10348_v60  ;;  %v5477_v60 = vsel %vm330_vm1, %v5474_v10, %v5476_v36 }
 0x4aa   : > { %8178 = vmatmul.mubr.msk.f32.gmra.mrb[24].mxu1 %vm413_vm2, %v10350_v39  ;;  %v11613_v39 = vld [vmem:[#allocation62_spill] sm:$0xff] }
 0x4ab   : > { %8180 = vmatprep.mubr.msk.f32.mxu1 %vm413_vm2, %v10368_v33  ;;  %v11614_v33 = vld [vmem:[#allocation63_spill] sm:$0xff] }
 0x4ae   : > { %8181 = vmatmul.mubr.msk.f32.gmra.mrb[26].mxu1 %vm413_vm2, %v10370_v27  ;;  %v11615_v27 = vld [vmem:[#allocation64_spill] sm:$0xff] }
 0x4af   : > { %8183 = vmatprep.mubr.msk.f32.mxu1 %vm413_vm2, %v10733_v41 }
 0x4b2   : > { %8184 = vmatmul.mubr.msk.f32.gmra.mrb[28].mxu1 %vm413_vm2, %v10737_v25  ;;  %v11623_v25 = vld [vmem:[#allocation3_spill] sm:$0xff] }
 0x4b3   : > { %8186 = vmatprep.mubr.msk.f32.mxu1 %vm413_vm2, %v10958_v21 }
 0x4b6   : > { %8187 = vmatmul.mubr.msk.f32.gmra.mrb[30].mxu1 %vm413_vm2, %v10964_v6 }
 0x4b7   : > { %8191 = vmatprep.mubr.msk.f32.mxu1 %vm413_vm2, %v10085_v29  ;;  %v11600_v29 = vld [vmem:[#allocation41_spill] sm:$0xff] }
 0x4ba   : > { %8192 = vmatmul.mubr.msk.f32.vlgmr.msra.gmra.mrb[0].mxu1 %vm413_vm2, %v10088_v8  ;;  %v11601_v8 = vld [vmem:[#allocation42_spill] sm:$0xff] }
 0x4bb   : > { %8240 = vmatpush3.msk.msra.mxu1 %vm478_vm0, %v6757_v17  ;;  %8194 = vmatprep.mubr.msk.f32.mxu1 %vm413_vm2, %v10108_v3  ;;  %v11604_v3 = vld [vmem:[#allocation46_spill] sm:$0xff] }
 0x4be   : > { %8195 = vmatmul.mubr.msk.f32.gmra.mrb[2].mxu1 %vm413_vm2, %v10111_v57  ;;  %v11605_v57 = vld [vmem:[#allocation49_spill] sm:$0xff] }
 0x4bf   : > { %8197 = vmatprep.mubr.msk.f32.mxu1 %vm413_vm2, %v11591_v19 }
 0x4c2   : > { %8198 = vmatmul.mubr.msk.f32.gmra.mrb[4].mxu1 %vm413_vm2, %v11592_v22  ;;  %v11627_v22 = vld [vmem:[#allocation7_spill] sm:$0xff] }
 0x4c3   : > { %8200 = vmatprep.mubr.msk.f32.mxu1 %vm413_vm2, %v11593_v23 }
 0x4c6   : > { %8201 = vmatmul.mubr.msk.f32.gmra.mrb[6].mxu1 %vm413_vm2, %v11594_v31 }
 0x4c7   : > { %8203 = vmatprep.mubr.msk.f32.mxu1 %vm413_vm2, %v11595_v32 }
 0x4ca   : > { %8204 = vmatmul.mubr.msk.f32.gmra.mrb[8].mxu1 %vm413_vm2, %v11596_v63 }
 0x4cb   : > { %8206 = vmatprep.mubr.msk.f32.mxu1 %vm413_vm2, %v11597_v0 }
 0x4ce   : > { %8207 = vmatmul.mubr.msk.f32.gmra.mrb[10].mxu1 %vm413_vm2, %v11598_v7  ;;  %v11628_v7 = vld [vmem:[#allocation10_spill] sm:$0xff] }
 0x4cf   : > { %8209 = vmatprep.mubr.msk.f32.mxu1 %vm413_vm2, %v11599_v42 }
 0x4d2   : > { %8210 = vmatmul.mubr.msk.f32.gmra.mrb[12].mxu1 %vm413_vm2, %v11600_v29  ;;  %v11629_v29 = vld [vmem:[#allocation9_spill] sm:$0xff] }
 0x4d3   : > { %8212 = vmatprep.mubr.msk.f32.mxu1 %vm413_vm2, %v11601_v8 }
 0x4d6   : > { %8213 = vmatmul.mubr.msk.f32.gmra.mrb[14].mxu1 %vm413_vm2, %v11602_v4 }
 0x4d7   : > { %8215 = vmatprep.mubr.msk.f32.mxu1 %vm413_vm2, %v11603_v12 }
 0x4da   : > { %8216 = vmatmul.mubr.msk.f32.gmra.mrb[16].mxu1 %vm413_vm2, %v11604_v3 }
 0x4db   : > { %8218 = vmatprep.mubr.msk.f32.mxu1 %vm413_vm2, %v11605_v57 }
 0x4de   : > { %8219 = vmatmul.mubr.msk.f32.gmra.mrb[18].mxu1 %vm413_vm2, %v11606_v54  ;;  %v11630_v54 = vld [vmem:[#allocation12_spill] sm:$0xff] }
 0x4df   : > { %8221 = vmatprep.mubr.msk.f32.mxu1 %vm413_vm2, %v11607_v62 }
 0x4e2   : > { %8222 = vmatmul.mubr.msk.f32.gmra.mrb[20].mxu1 %vm413_vm2, %v11608_v38  ;;  %v11631_v38 = vld [vmem:[#allocation11_spill] sm:$0xff] }
 0x4e3   : > { %8224 = vmatprep.mubr.msk.f32.mxu1 %vm413_vm2, %v11574_v45 }
 0x4e6   : > { %8225 = vmatmul.mubr.msk.f32.gmra.mrb[22].mxu1 %vm413_vm2, %v11609_v11 }
 0x4e7   : > { %8227 = vmatprep.mubr.msk.f32.mxu1 %vm413_vm2, %v11610_v5 }
 0x4ea   : > { %8228 = vmatmul.mubr.msk.f32.gmra.mrb[24].mxu1 %vm413_vm2, %v11577_v47 }
 0x4eb   : > { %8230 = vmatprep.mubr.msk.f32.mxu1 %vm413_vm2, %v11611_v26 }
 0x4ee   : > { %8231 = vmatmul.mubr.msk.f32.gmra.mrb[26].mxu1 %vm413_vm2, %v11579_v52  ;;  %v11612_v52 = vld [vmem:[#allocation61_spill] sm:$0xff] }
 0x4ef   : > { %8233 = vmatprep.mubr.msk.f32.mxu1 %vm413_vm2, %v10809_v44 }
 0x4f2   : > { %8234 = vmatmul.mubr.msk.f32.gmra.mrb[28].mxu1 %vm413_vm2, %v10814_v58 }
 0x4f3   : > { %8236 = vmatprep.mubr.msk.f32.mxu1 %vm413_vm2, %v5475_v15  ;;  %v11633_v15 = vld [vmem:[#allocation13_spill] sm:$0xff] }
 0x4f6   : > { %8237 = vmatmul.mubr.msk.f32.gmra.mrb[30].mxu1 %vm413_vm2, %v5477_v60 }
 0x4f7   : > { %8241 = vmatprep.mubr.msk.f32.mxu1 %vm413_vm2, %v10489_v49  ;;  %v11616_v49 = vld [vmem:[#allocation65_spill] sm:$0xff] }
 0x4fa   : > { %8242 = vmatmul.mubr.msk.f32.vlgmr.msra.gmra.mrb[0].mxu1 %vm413_vm2, %v10496_v46  ;;  %v11617_v46 = vld [vmem:[#allocation67_spill] sm:$0xff] }
 0x4fb   : > { %8244 = vmatprep.mubr.msk.f32.mxu1 %vm413_vm2, %v11580_v14  ;;  %v11624_v14 = vld [vmem:[#allocation6_spill] sm:$0xff] }
 0x4fe   : > { %8245 = vmatmul.mubr.msk.f32.gmra.mrb[2].mxu1 %vm413_vm2, %v10509_v2  ;;  %v11619_v2 = vld [vmem:[#allocation70_spill] sm:$0xff] }
 0x4ff   : > { %8247 = vmatprep.mubr.msk.f32.mxu1 %vm413_vm2, %v11581_v16 }
 0x502   : > { %8248 = vmatmul.mubr.msk.f32.gmra.mrb[4].mxu1 %vm413_vm2, %v10522_v50  ;;  %v11618_v50 = vld [vmem:[#allocation68_spill] sm:$0xff] }
 0x503   : > { %8250 = vmatprep.mubr.msk.f32.mxu1 %vm413_vm2, %v11612_v52 }
 0x506   : > { %8251 = vmatmul.mubr.msk.f32.gmra.mrb[6].mxu1 %vm413_vm2, %v10535_v18  ;;  %v11620_v18 = vld [vmem:[#allocation71_spill] sm:$0xff] }
 0x507   : > { %8253 = vmatprep.mubr.msk.f32.mxu1 %vm413_vm2, %v11613_v39 }
 0x50a   : > { %8254 = vmatmul.mubr.msk.f32.gmra.mrb[8].mxu1 %vm413_vm2, %v10548_v30  ;;  %v11621_v30 = vld [vmem:[#allocation72_spill] sm:$0xff] }
 0x50b   : > { %8256 = vmatprep.mubr.msk.f32.mxu1 %vm413_vm2, %v11614_v33 }
 0x50e   : > { %8257 = vmatmul.mubr.msk.f32.gmra.mrb[10].mxu1 %vm413_vm2, %v10561_v61  ;;  %v5744_v61 = vrot.slane %v10958_v21, 2 }
 0x50f   : > { %8259 = vmatprep.mubr.msk.f32.mxu1 %vm413_vm2, %v11615_v27 }
 0x512   : > { %8260 = vmatmul.mubr.msk.f32.gmra.mrb[12].mxu1 %vm413_vm2, %v10574_v53  ;;  %v5745_v53 = vrot.slane %v10964_v6, 2  ;;  %v11626_v6 = vld [vmem:[#allocation8_spill] sm:$0xff] }
 0x513   : > { %8262 = vmatprep.mubr.msk.f32.mxu1 %vm413_vm2, %v11616_v49  ;;  %v11634_v49 = vld [vmem:[#allocation16_spill] sm:$0xff] }
 0x514   : > { %v5746_v55 = vsel %vm999_vm3, %v5744_v61, %v5745_v53 }
 0x516   : > { %8263 = vmatmul.mubr.msk.f32.gmra.mrb[14].mxu1 %vm413_vm2, %v10587_v34  ;;  %v5747_v34 = vrot.slane %v3271_v35, 2  ;;  %v11632_v35 = vld [vmem:[#allocation14_spill] sm:$0xff] }
 0x517   : > { %8265 = vmatprep.mubr.msk.f32.mxu1 %vm413_vm2, %v11587_v37 }
 0x51a   : > { %8266 = vmatmul.mubr.msk.f32.gmra.mrb[16].mxu1 %vm413_vm2, %v11617_v46 }
 0x51b   : > { %8268 = vmatprep.mubr.msk.f32.mxu1 %vm413_vm2, %v11618_v50  ;;  %v11635_v50 = vld [vmem:[#allocation15_spill] sm:$0xff] }
 0x51e   : > { %8269 = vmatmul.mubr.msk.f32.gmra.mrb[18].mxu1 %vm413_vm2, %v10613_v43  ;;  %v5748_v43 = vsel %vm999_vm3, %v5745_v53, %v5747_v34  ;;  %v11636_v34 = vld [vmem:[#allocation18_spill] sm:$0xff] }
 0x51f   : > { %8271 = vmatprep.mubr.msk.f32.mxu1 %vm413_vm2, %v11589_v48 }
 0x522   : > { %8272 = vmatmul.mubr.msk.f32.gmra.mrb[20].mxu1 %vm413_vm2, %v11619_v2 }
 0x523   : > { %8274 = vmatprep.mubr.msk.f32.mxu1 %vm413_vm2, %v11620_v18 }
 0x526   : > { %8275 = vmatmul.mubr.msk.f32.gmra.mrb[22].mxu1 %vm413_vm2, %v10639_v40 }
 0x527   : > { %8277 = vmatprep.mubr.msk.f32.mxu1 %vm413_vm2, %v11621_v30 }
 0x52a   : > { %8278 = vmatmul.mubr.msk.f32.gmra.mrb[24].mxu1 %vm413_vm2, %v10652_v56 }
 0x52b   : > { %8280 = vmatprep.mubr.msk.f32.mxu1 %vm413_vm2, %v10658_v51 }
 0x52e   : > { %8281 = vmatmul.mubr.msk.f32.gmra.mrb[26].mxu1 %vm413_vm2, %v10663_v59  ;;  %v11622_v59 = vld [vmem:[#allocation4_spill] sm:$0xff] }
 0x52f   : > { %8283 = vmatprep.mubr.msk.f32.mxu1 %vm413_vm2, %v10886_v9  ;;  %v11625_v9 = vld [vmem:[#allocation5_spill] sm:$0xff] }
 0x532   : > { %8284 = vmatmul.mubr.msk.f32.gmra.mrb[28].mxu1 %vm413_vm2, %v10891_v20 }
 0x533   : > { %8286 = vmatprep.mubr.msk.f32.mxu1 %vm413_vm2, %v5746_v55 }
 0x536   : > { %8287 = vmatmul.mubr.msk.f32.gmra.mrb[30].mxu1 %vm413_vm2, %v5748_v43  ;;  %v11637_v43 = vld [vmem:[#allocation17_spill] sm:$0xff] }
 0x5cd   : > { %v8243_v40 = vpop.f32.mrb[0].mxu1 }
 0x5ce   : > { %v6022_v56 = vadd.f32 %v8243_v40, %v11104_v24  ;;  %v5824_v51 = vpop.f32.mrb[1].mxu1 }
 0x5cf   : > { %v6021_v20 = vadd.f32 %v11104_v24, %v5824_v51 }
 0x5d0   : > { %v6054_v41 = vadd.f32 %v6022_v56, %v11622_v59 }
 0x5d1   : > { %v6053_v28 = vadd.f32 %v6021_v20, %v11623_v25  ;;  %v8246_v45 = vpop.f32.mrb[2].mxu1 }
 0x5d2   : > { %6086 = vst.msk [vmem:[%s11111_s21 + $0x8] sm:$0xff] %vm413_vm2, %v6054_v41  ;;  %v6024_v44 = vadd.f32 %v8246_v45, %v11104_v24  ;;  %v5834_v58 = vpop.f32.mrb[3].mxu1  ;;  %v11638_v41 = vld [vmem:[#allocation20_spill] sm:$0xff] }
 0x5d3   : > { %6085 = vst.msk [vmem:[%s11111_s21] sm:$0xff] %vm413_vm2, %v6053_v28  ;;  %v6023_v47 = vadd.f32 %v11104_v24, %v5834_v58  ;;  %v11639_v28 = vld [vmem:[#allocation19_spill] sm:$0xff] }
 0x5d4   : > { %v6056_v16 = vadd.f32 %v6024_v44, %v11624_v14 }
 0x5d5   : > { %v6055_v37 = vadd.f32 %v6023_v47, %v11625_v9  ;;  %v8249_v1 = vpop.f32.mrb[4].mxu1 }
 0x5d6   : > { %6088 = vst.msk [vmem:[%s11111_s21 + $0x18] sm:$0xff] %vm413_vm2, %v6056_v16  ;;  %v6026_v48 = vadd.f32 %v8249_v1, %v11104_v24  ;;  %v5844_v17 = vpop.f32.mrb[5].mxu1  ;;  %v11640_v16 = vld [vmem:[#allocation22_spill] sm:$0xff] }
 0x5d7   : > { %6087 = vst.msk [vmem:[%s11111_s21 + $0x10] sm:$0xff] %vm413_vm2, %v6055_v37  ;;  %v6025_v21 = vadd.f32 %v11104_v24, %v5844_v17  ;;  %v11641_v37 = vld [vmem:[#allocation21_spill] sm:$0xff] }
 0x5d8   : > { %v6058_v19 = vadd.f32 %v6026_v48, %v11626_v6 }
 0x5d9   : > { %v6057_v23 = vadd.f32 %v6025_v21, %v11627_v22  ;;  %v8252_v31 = vpop.f32.mrb[6].mxu1 }
 0x5da   : > { %6090 = vst.msk [vmem:[%s11111_s21 + $0x28] sm:$0xff] %vm413_vm2, %v6058_v19  ;;  %v6028_v32 = vadd.f32 %v8252_v31, %v11104_v24  ;;  %v5854_v63 = vpop.f32.mrb[7].mxu1  ;;  %v11642_v19 = vld [vmem:[#allocation24_spill] sm:$0xff] }
 0x5db   : > { %6089 = vst.msk [vmem:[%s11111_s21 + $0x20] sm:$0xff] %vm413_vm2, %v6057_v23  ;;  %v6027_v0 = vadd.f32 %v11104_v24, %v5854_v63  ;;  %v11643_v23 = vld [vmem:[#allocation23_spill] sm:$0xff] }
 0x5dc   : > { %v6060_v42 = vadd.f32 %v6028_v32, %v11628_v7 }
 0x5dd   : > { %v6059_v8 = vadd.f32 %v6027_v0, %v11629_v29  ;;  %v8255_v4 = vpop.f32.mrb[8].mxu1 }
 0x5de   : > { %6092 = vst.msk [vmem:[%s11111_s21 + $0x38] sm:$0xff] %vm413_vm2, %v6060_v42  ;;  %v6030_v12 = vadd.f32 %v8255_v4, %v11104_v24  ;;  %v5864_v3 = vpop.f32.mrb[9].mxu1  ;;  %v11644_v42 = vld [vmem:[#allocation26_spill] sm:$0xff] }
 0x5df   : > { %6091 = vst.msk [vmem:[%s11111_s21 + $0x30] sm:$0xff] %vm413_vm2, %v6059_v8  ;;  %v6029_v57 = vadd.f32 %v11104_v24, %v5864_v3  ;;  %v11645_v8 = vld [vmem:[#allocation25_spill] sm:$0xff] }
 0x5e0   : > { %v6062_v62 = vadd.f32 %v6030_v12, %v11630_v54 }
 0x5e1   : > { %v6061_v11 = vadd.f32 %v6029_v57, %v11631_v38  ;;  %v8258_v5 = vpop.f32.mrb[10].mxu1 }
 0x5e2   : > { %6094 = vst.msk [vmem:[%s11111_s21 + $0x48] sm:$0xff] %vm413_vm2, %v6062_v62  ;;  %v6032_v26 = vadd.f32 %v8258_v5, %v11104_v24  ;;  %v5874_v13 = vpop.f32.mrb[11].mxu1  ;;  %v11646_v62 = vld [vmem:[#allocation28_spill] sm:$0xff] }
 0x5e3   : > { %6093 = vst.msk [vmem:[%s11111_s21 + $0x40] sm:$0xff] %vm413_vm2, %v6061_v11  ;;  %v6031_v10 = vadd.f32 %v11104_v24, %v5874_v13  ;;  %v11647_v11 = vld [vmem:[#allocation27_spill] sm:$0xff] }
 0x5e4   : > { %v6064_v36 = vadd.f32 %v6032_v26, %v11632_v35 }
 0x5e5   : > { %v6063_v60 = vadd.f32 %v6031_v10, %v11633_v15  ;;  %v8261_v52 = vpop.f32.mrb[12].mxu1 }
 0x5e6   : > { %6096 = vst.msk [vmem:[%s11111_s21 + $0x58] sm:$0xff] %vm413_vm2, %v6064_v36  ;;  %v6034_v39 = vadd.f32 %v8261_v52, %v11104_v24  ;;  %v5884_v33 = vpop.f32.mrb[13].mxu1  ;;  %v11648_v36 = vld [vmem:[#allocation30_spill] sm:$0xff] }
 0x5e7   : > { %6095 = vst.msk [vmem:[%s11111_s21 + $0x50] sm:$0xff] %vm413_vm2, %v6063_v60  ;;  %v6033_v27 = vadd.f32 %v11104_v24, %v5884_v33  ;;  %v11649_v60 = vld [vmem:[#allocation29_spill] sm:$0xff] }
 0x5e8   : > { %v6066_v46 = vadd.f32 %v6034_v39, %v11634_v49 }
 0x5e9   : > { %v6065_v2 = vadd.f32 %v6033_v27, %v11635_v50  ;;  %v8264_v18 = vpop.f32.mrb[14].mxu1 }
 0x5ea   : > { %6098 = vst.msk [vmem:[%s11111_s21 + $0x68] sm:$0xff] %vm413_vm2, %v6066_v46  ;;  %v6036_v30 = vadd.f32 %v8264_v18, %v11104_v24  ;;  %v5894_v61 = vpop.f32.mrb[15].mxu1  ;;  %v11650_v46 = vld [vmem:[#allocation32_spill] sm:$0xff] }
 0x5eb   : > { %6097 = vst.msk [vmem:[%s11111_s21 + $0x60] sm:$0xff] %vm413_vm2, %v6065_v2  ;;  %v6035_v53 = vadd.f32 %v11104_v24, %v5894_v61  ;;  %v11651_v2 = vld [vmem:[#allocation31_spill] sm:$0xff] }
 0x5ec   : > { %v6068_v55 = vadd.f32 %v6036_v30, %v11636_v34 }
 0x5ed   : > { %v6067_v40 = vadd.f32 %v6035_v53, %v11637_v43  ;;  %v8267_v56 = vpop.f32.mrb[16].mxu1 }
 0x5ee   : > { %6100 = vst.msk [vmem:[%s11111_s21 + $0x78] sm:$0xff] %vm413_vm2, %v6068_v55  ;;  %v6038_v51 = vadd.f32 %v8267_v56, %v11104_v24  ;;  %v5904_v20 = vpop.f32.mrb[17].mxu1  ;;  %v11652_v55 = vld [vmem:[#allocation48_spill] sm:$0xff] }
 0x5ef   : > { %6099 = vst.msk [vmem:[%s11111_s21 + $0x70] sm:$0xff] %vm413_vm2, %v6067_v40  ;;  %v6037_v59 = vadd.f32 %v11104_v24, %v5904_v20  ;;  %v11653_v40 = vld [vmem:[#allocation47_spill] sm:$0xff] }
 0x5f0   : > { %v6070_v25 = vadd.f32 %v6038_v51, %v11638_v41 }
 0x5f1   : > { %v6069_v45 = vadd.f32 %v6037_v59, %v11639_v28  ;;  %v8270_v44 = vpop.f32.mrb[18].mxu1 }
 0x5f2   : > { %6102 = vst.msk [vmem:[%s11111_s21 + $0x88] sm:$0xff] %vm413_vm2, %v6070_v25  ;;  %v6040_v58 = vadd.f32 %v8270_v44, %v11104_v24  ;;  %v5914_v47 = vpop.f32.mrb[19].mxu1 }
 0x5f3   : > { %6101 = vst.msk [vmem:[%s11111_s21 + $0x80] sm:$0xff] %vm413_vm2, %v6069_v45  ;;  %v6039_v14 = vadd.f32 %v11104_v24, %v5914_v47 }
 0x5f4   : > { %v6072_v9 = vadd.f32 %v6040_v58, %v11640_v16 }
 0x5f5   : > { %v6071_v1 = vadd.f32 %v6039_v14, %v11641_v37  ;;  %v8273_v48 = vpop.f32.mrb[20].mxu1 }
 0x5f6   : > { %6104 = vst.msk [vmem:[%s11111_s21 + $0x98] sm:$0xff] %vm413_vm2, %v6072_v9  ;;  %v6042_v17 = vadd.f32 %v8273_v48, %v11104_v24  ;;  %v5924_v21 = vpop.f32.mrb[21].mxu1 }
 0x5f7   : > { %6103 = vst.msk [vmem:[%s11111_s21 + $0x90] sm:$0xff] %vm413_vm2, %v6071_v1  ;;  %v6041_v6 = vadd.f32 %v11104_v24, %v5924_v21 }
 0x5f8   : > { %v6074_v22 = vadd.f32 %v6042_v17, %v11642_v19 }
 0x5f9   : > { %v6073_v31 = vadd.f32 %v6041_v6, %v11643_v23  ;;  %v8276_v32 = vpop.f32.mrb[22].mxu1 }
 0x5fa   : > { %6106 = vst.msk [vmem:[%s11111_s21 + $0xa8] sm:$0xff] %vm413_vm2, %v6074_v22  ;;  %v6044_v63 = vadd.f32 %v8276_v32, %v11104_v24  ;;  %v5934_v0 = vpop.f32.mrb[23].mxu1 }
 0x5fb   : > { %6105 = vst.msk [vmem:[%s11111_s21 + $0xa0] sm:$0xff] %vm413_vm2, %v6073_v31  ;;  %v6043_v7 = vadd.f32 %v11104_v24, %v5934_v0 }
 0x5fc   : > { %v6076_v29 = vadd.f32 %v6044_v63, %v11644_v42 }
 0x5fd   : > { %v6075_v4 = vadd.f32 %v6043_v7, %v11645_v8  ;;  %v8279_v12 = vpop.f32.mrb[24].mxu1 }
 0x5fe   : > { %6108 = vst.msk [vmem:[%s11111_s21 + $0xb8] sm:$0xff] %vm413_vm2, %v6076_v29  ;;  %v6046_v3 = vadd.f32 %v8279_v12, %v11104_v24  ;;  %v5944_v57 = vpop.f32.mrb[25].mxu1 }
 0x5ff   : > { %6107 = vst.msk [vmem:[%s11111_s21 + $0xb0] sm:$0xff] %vm413_vm2, %v6075_v4  ;;  %v6045_v54 = vadd.f32 %v11104_v24, %v5944_v57 }
 0x600   : > { %v6078_v38 = vadd.f32 %v6046_v3, %v11646_v62 }
 0x601   : > { %v6077_v5 = vadd.f32 %v6045_v54, %v11647_v11  ;;  %v8282_v26 = vpop.f32.mrb[26].mxu1 }
 0x602   : > { %6110 = vst.msk [vmem:[%s11111_s21 + $0xc8] sm:$0xff] %vm413_vm2, %v6078_v38  ;;  %v6048_v13 = vadd.f32 %v8282_v26, %v11104_v24  ;;  %v5954_v10 = vpop.f32.mrb[27].mxu1 }
 0x603   : > { %6109 = vst.msk [vmem:[%s11111_s21 + $0xc0] sm:$0xff] %vm413_vm2, %v6077_v5  ;;  %v6047_v35 = vadd.f32 %v11104_v24, %v5954_v10 }
 0x604   : > { %v6080_v15 = vadd.f32 %v6048_v13, %v11648_v36 }
 0x605   : > { %v6079_v52 = vadd.f32 %v6047_v35, %v11649_v60  ;;  %v8285_v39 = vpop.f32.mrb[28].mxu1 }
 0x606   : > { %6112 = vst.msk [vmem:[%s11111_s21 + $0xd8] sm:$0xff] %vm413_vm2, %v6080_v15  ;;  %v6050_v33 = vadd.f32 %v8285_v39, %v11104_v24  ;;  %v5964_v27 = vpop.f32.mrb[29].mxu1 }
 0x607   : > { %6111 = vst.msk [vmem:[%s11111_s21 + $0xd0] sm:$0xff] %vm413_vm2, %v6079_v52  ;;  %v6049_v49 = vadd.f32 %v11104_v24, %v5964_v27 }
 0x608   : > { %v6082_v50 = vadd.f32 %v6050_v33, %v11650_v46 }
 0x609   : > { %v6081_v18 = vadd.f32 %v6049_v49, %v11651_v2  ;;  %v8288_v30 = vpop.f32.mrb[30].mxu1 }
 0x60a   : > { %6114 = vst.msk [vmem:[%s11111_s21 + $0xe8] sm:$0xff] %vm413_vm2, %v6082_v50  ;;  %v6052_v61 = vadd.f32 %v8288_v30, %v11104_v24  ;;  %v5974_v53 = vpop.f32.mrb[31].mxu1 }
 0x60b   : > { %6113 = vst.msk [vmem:[%s11111_s21 + $0xe0] sm:$0xff] %vm413_vm2, %v6081_v18  ;;  %v6051_v34 = vadd.f32 %v11104_v24, %v5974_v53 }
 0x60c   : > { %v6084_v43 = vadd.f32 %v6052_v61, %v11652_v55 }
 0x60d   : > { %v6083_v56 = vadd.f32 %v6051_v34, %v11653_v40 }
 0x60e   : > { %6116 = vst.msk [vmem:[%s11111_s21 + $0xf8] sm:$0xff] %vm413_vm2, %v6084_v43 }
 0x60f   : > { %6115 = vst.msk [vmem:[%s11111_s21 + $0xf0] sm:$0xff] %vm413_vm2, %v6083_v56 }
 0x610 PF: > { %s15_s18 = sadd.s32 1, %s8817_s18  }
 0x611   : > { %p12_p4 = scmp.ge.s32.totalorder %s15_s18, 4  }
 0x613   :  { %14 = sbr.rel (!%p12_p4) target bundleno = 1 (0x1), region = 87 }

</bundles_post_ra>
